<compile_context>
chip_gen: v7x
topology: tpu7x:2x2x1
jax: 0.10.0
libtpu: 0.0.40
codegen_flags: <defaults>
</compile_context>

<pallas_src>
import math
import jax
import jax.numpy as jnp
from jax.experimental import pallas as pl
from jax.experimental.pallas import tpu as pltpu  # noqa: F401  (TPU backend)

# --------------------- task parameters (stand-in for opt['task_parameters'])
TASK = dict(
    focal=(1500.0, 1500.0),
    princpt=(16.0, 16.0),
    input_img_shape=(32, 32),   # (H, W)
    camera_3d_size=2.5,
)
NUM_JOINTS = 21
NUM_VERTS = 778
ROOT_JOINT_IDX = 0
HIDDEN = 32                    # transformer token dim
C_HI = 16                      # high-res backbone channels
C_BLUR = 32                    # low-res ("blur") backbone channels
POSE_DIM = 48                  # 3 root + 45 hand
SHAPE_DIM = 10
HEAD_DIM = SHAPE_DIM + POSE_DIM + 3          # meaningful regressor outputs (61)
HEAD_PAD = 128                               # regressor output padded to a full lane block
JDIM = HIDDEN + 3                            # per-joint [refined feat | joint_img] width (35)
FRJ_DIM = NUM_JOINTS * JDIM                  # flattened regressor joint input (735)
JBLK = 128                                   # per-coordinate lane block for joints
VBLK = 896                                   # per-coordinate lane block for vertices (7*128 >= 778)

K_VALUE = math.sqrt(TASK['focal'][0] * TASK['focal'][1] * TASK['camera_3d_size'] ** 2
                    / (TASK['input_img_shape'][0] * TASK['input_img_shape'][1]))


# ------------------------------------------------------------------ fused kernel
def _make_kernel(B, HW, HW2):
    f32 = jnp.float32
    bf = jnp.bfloat16
    J = NUM_JOINTS
    H = HIDDEN
    inv_sqrt_d = 1.0 / math.sqrt(H)
    fx, fy = TASK['focal']
    pcx, pcy = TASK['princpt']
    img_h, img_w = TASK['input_img_shape']

    def layernorm(x, g, b):
        mu = jnp.mean(x, axis=-1, keepdims=True)
        var = jnp.mean((x - mu) ** 2, axis=-1, keepdims=True)
        return (x - mu) * jax.lax.rsqrt(var + 1e-5) * g + b

    def kernel(p1a_ref, p1b_ref, coords_ref,
               s1w_ref, s1b_ref, s1wblk_ref, s1b4_ref, s2w_ref, s2b_ref,
               cw_ref, cb_ref, hmw_ref, hmb_ref, fjb_ref,
               wq_ref, wk_ref, wv_ref, wo_ref, w1_ref, w2_ref,
               g1_ref, be1_ref, g2_ref, be2_ref,
               wp_ref, wfj_ref, rb_ref,
               jdirs_ref, jt_ref, dirs_ref, vt_ref,
               pj_ref, blur_ref, geo_ref, mesh_ref):
        # ---------------- stem1 over all B*HW pixels (one matmul, bf16 -> f32 acc) ------------
        h = jnp.maximum(
            jnp.dot(p1a_ref[...], s1w_ref[...], preferred_element_type=f32) + s1b_ref[...], 0.0)
        h_bf = h.astype(bf)                                                     # (B*HW, 16)

        # ---- stem1 (patch-grouped, block-diagonal weight) + stem2 = feat_blur (no reshape) ----
        hg = jnp.maximum(
            jnp.dot(p1b_ref[...], s1wblk_ref[...], preferred_element_type=f32) + s1b4_ref[...], 0.0)
        fb = jnp.maximum(
            jnp.dot(hg.astype(bf), s2w_ref[...], preferred_element_type=f32) + s2b_ref[...], 0.0)
        blur_ref[...] = fb                                                      # (B*HW2, 32)

        # ---------------- fused unfolder 1x1 heads (batched over B*HW) ------------------------
        # per-pixel [feature-projection(32) | depth(1)]
        y = jnp.dot(h_bf, cw_ref[...], preferred_element_type=f32) + cb_ref[...]      # (B*HW, 33)
        # heatmap logits produced directly joint-major (J, B*HW): no in-kernel transpose
        logits = jax.lax.dot_general(hmw_ref[...], h_bf, (((1,), (1,)), ((), ())),
                                     preferred_element_type=f32) + hmb_ref[...]       # (J, B*HW)

        coords = coords_ref[...]
        fjb = fjb_ref[...]
        g1 = g1_ref[...]; be1 = be1_ref[...]; g2 = g2_ref[...]; be2 = be2_ref[...]
        wq = wq_ref[...]; wk = wk_ref[...]; wv = wv_ref[...]; wo = wo_ref[...]
        w1 = w1_ref[...]; w2 = w2_ref[...]
        pad_pj = jnp.zeros((J, 128 - (2 * H + 3)), f32)

        frj_rows = []
        pooled_rows = []
        # B is tiny & static: only the per-batch spatial softmax / attention pooling and the
        # 21-token transformer stay in this (unrolled) loop; everything above is B-batched.
        for b in range(B):
            lg = logits[:, b * HW:(b + 1) * HW]                         # (J, HW)  128-aligned slice
            lg = lg - jnp.max(lg, axis=-1, keepdims=True)
            e = jnp.exp(lg)
            att = e / jnp.sum(e, axis=-1, keepdims=True)                # exact div (soft-argmax path)
            yb = y[b * HW:(b + 1) * HW, :]                              # (HW, 33) 8-aligned slice
            pooled = jnp.dot(att, yb, preferred_element_type=f32)       # (J, 33) [feat(32)|depth(1)]
            xy = jnp.dot(att, coords, preferred_element_type=f32)       # (J, 2)  soft-argmax x,y
            fj = jnp.maximum(pooled[:, :H] + fjb, 0.0)                  # (J, 32) joint features
            jimg = jnp.concatenate([xy, pooled[:, H:H + 1]], axis=1)    # (J, 3)  x,y,z

            # ---------------- ktformer: one pre-LN transformer layer -------------------------
            t = fj
            hln = layernorm(t, g1, be1).astype(bf)
            q = jnp.dot(hln, wq, preferred_element_type=f32)
            k = jnp.dot(hln, wk, preferred_element_type=f32)
            v = jnp.dot(hln, wv, preferred_element_type=f32)
            s = jax.lax.dot_general(q.astype(bf), k.astype(bf), (((1,), (1,)), ((), ())),
                                    preferred_element_type=f32) * inv_sqrt_d
            s = s - jnp.max(s, axis=-1, keepdims=True)
            es = jnp.exp(s)
            p = es * pl.reciprocal(jnp.sum(es, axis=-1, keepdims=True), approx=True)
            a = jnp.dot(p.astype(bf), v.astype(bf), preferred_element_type=f32)
            t = t + jnp.dot(a.astype(bf), wo, preferred_element_type=f32)
            h2 = layernorm(t, g2, be2).astype(bf)
            ff = jnp.maximum(jnp.dot(h2, w1, preferred_element_type=f32), 0.0)
            t = t + jnp.dot(ff.astype(bf), w2, preferred_element_type=f32)

            # lane-dense per-joint output slab: [feat_joint | feat_refine | joint_img | 0]
            pj_ref[b] = jnp.concatenate([fj, t, jimg, pad_pj], axis=1)           # (J, 128)

            # flattened regressor inputs for this batch (refined joint feats + joint_img)
            u = jnp.concatenate([t, jimg], axis=1)                               # (J, 35)
            frj_rows.append(jnp.concatenate([u[j:j + 1, :] for j in range(J)], axis=1))
            pooled_rows.append(jnp.mean(fb[b * HW2:(b + 1) * HW2, :], axis=0, keepdims=True))

        frj = jnp.concatenate(frj_rows, axis=0)                                  # (B, 735)
        pooled_blur = jnp.concatenate(pooled_rows, axis=0)                       # (B, 32)

        # ---------------- regressor head: split-K dots, bf16 weights, f32 acc -----------------
        # TODO(synk): joint_img enters .detach()'ed in the reference; forward-only no-op here.
        head = (jnp.dot(pooled_blur.astype(bf), wp_ref[...], preferred_element_type=f32)
                + jnp.dot(frj.astype(bf), wfj_ref[...], preferred_element_type=f32)
                + rb_ref[...])                                                   # (B, 128)

        # ---------------- MANO blend shapes + pre-folded joint regressor ----------------------
        # TODO(synk): full MANO articulation (Rodrigues + LBS posing) replaced by a linear
        # blend-shape approximation; real MANO assets cannot be loaded in-script.
        bp = head[:, :SHAPE_DIM + POSE_DIM].astype(bf)                           # (B, 58)
        jpk = jnp.dot(bp, jdirs_ref[...], preferred_element_type=f32) + jt_ref[...]   # (B, 3*128)
        mpk = jnp.dot(bp, dirs_ref[...], preferred_element_type=f32) + vt_ref[...]    # (B, 3*896)

        tx = head[:, SHAPE_DIM + POSE_DIM:SHAPE_DIM + POSE_DIM + 1]
        ty = head[:, SHAPE_DIM + POSE_DIM + 1:SHAPE_DIM + POSE_DIM + 2]
        tz = K_VALUE * jax.nn.sigmoid(head[:, SHAPE_DIM + POSE_DIM + 2:SHAPE_DIM + POSE_DIM + 3])

        jx = jpk[:, 0:JBLK]
        jy = jpk[:, JBLK:2 * JBLK]
        jz = jpk[:, 2 * JBLK:3 * JBLK]
        inv_z = 1.0 / (jz + tz + 1e-4)                    # matches reference: no extra clamp
        prx = ((jx + tx) * inv_z * fx + pcx) * (1.0 / img_w)
        pry = ((jy + ty) * inv_z * fy + pcy) * (1.0 / img_h)
        jxr = jx - jx[:, ROOT_JOINT_IDX:ROOT_JOINT_IDX + 1]
        jyr = jy - jy[:, ROOT_JOINT_IDX:ROOT_JOINT_IDX + 1]
        jzr = jz - jz[:, ROOT_JOINT_IDX:ROOT_JOINT_IDX + 1]

        # lane-dense geometry slab: [head | proj_x | proj_y | joint_x | joint_y | joint_z]
        geo_ref[...] = jnp.concatenate([head, prx, pry, jxr, jyr, jzr], axis=1)  # (B, 768)

        trans = jnp.concatenate([jnp.broadcast_to(tx, (B, VBLK)),
                                 jnp.broadcast_to(ty, (B, VBLK)),
                                 jnp.broadcast_to(tz, (B, VBLK))], axis=1)       # (B, 3*896)
        mesh_ref[...] = mpk + trans

    return kernel


def _fused_call(params, p1a, p1b, coords, B, HW, HW2):
    tf = params['tf']
    return pl.pallas_call(
        _make_kernel(B, HW, HW2),
        out_shape=(jax.ShapeDtypeStruct((B, NUM_JOINTS, 128), jnp.float32),   # per-joint slab
                   jax.ShapeDtypeStruct((B * HW2, C_BLUR), jnp.float32),      # feat_blur
                   jax.ShapeDtypeStruct((B, 6 * 128), jnp.float32),           # geometry slab
                   jax.ShapeDtypeStruct((B, 3 * VBLK), jnp.float32)),         # packed mesh
    )(p1a, p1b, coords,
      params['s1w'], params['s1b'], params['s1w_blk'], params['s1b4'],
      params['s2w'], params['s2b'],
      params['cw'], params['cb'], params['hmw'], params['hmb'], params['fjb'],
      tf['wq'], tf['wk'], tf['wv'], tf['wo'], tf['w1'], tf['w2'],
      tf['ln1_g'], tf['ln1_b'], tf['ln2_g'], tf['ln2_b'],
      params['reg_wp'], params['reg_wfj'], params['reg_b'],
      params['jdirs_pk'], params['jt_pk'], params['dirs_pk'], params['vt_pk'])


# -------------------------------------------------------------------- glue helpers
def _nested_patches_from_image(x):
    """NHWC image -> stem1 patches (B, H1*W1, 4*C) with rows in nested (i2, j2, sy, sx) order
    so the patch-grouped (B*H2*W2, 16*C) view for stem2 is a pure row-major reshape."""
    B, H, W, C = x.shape
    H2, W2 = H // 4, W // 4
    x8 = x.reshape(B, H2, 2, 2, W2, 2, 2, C)            # (b, i2, sy, py, j2, sx, px, c)
    x8 = jnp.transpose(x8, (0, 1, 4, 2, 5, 3, 6, 7))    # (b, i2, j2, sy, sx, py, px, c)
    return x8.reshape(B, (H // 2) * (W // 2), 4 * C)


def _make_coords_nested(h1, w1):
    """Normalized (x, y) pixel coordinates in the same nested (i2, j2, sy, sx) row order."""
    h2, w2 = h1 // 2, w1 // 2
    ys, xs = jnp.meshgrid(jnp.arange(h1, dtype=jnp.float32),
                          jnp.arange(w1, dtype=jnp.float32), indexing='ij')
    xs = (xs + 0.5) / w1
    ys = (ys + 0.5) / h1
    g = jnp.stack([xs, ys], axis=-1)                    # (H1, W1, 2)
    g = g.reshape(h2, 2, w2, 2, 2)                      # (i2, sy, j2, sx, k)
    g = jnp.transpose(g, (0, 2, 1, 3, 4))               # (i2, j2, sy, sx, k)
    return g.reshape(h1 * w1, 2)


# ----------------------------------------------------------------------- parameters
def init_params(key):
    keys = iter(jax.random.split(key, 24))
    f32 = jnp.float32
    bf = jnp.bfloat16

    def draw(shape, scale=0.05):
        return scale * jax.random.normal(next(keys), shape, f32)

    # backbone ("ResNetBackbone" stand-in: two strided patchify-conv stems)
    s1w = draw((3 * 4, C_HI))
    s1b = jnp.zeros((1, C_HI), f32)
    s2w = draw((C_HI * 4, C_BLUR))
    s2b = jnp.zeros((1, C_BLUR), f32)

    # unfolder heads: per-pixel [feature-projection | depth] and joint-major heatmap head
    cw = draw((C_HI, HIDDEN + 1))
    cb = jnp.zeros((1, HIDDEN + 1), f32)
    hmw = draw((NUM_JOINTS, C_HI))
    hmb = jnp.zeros((NUM_JOINTS, 1), f32)
    fjb = jnp.zeros((1, HIDDEN), f32)

    # ktformer (single pre-LN transformer layer), bf16 matmul weights
    tf = {
        'wq': draw((HIDDEN, HIDDEN)).astype(bf), 'wk': draw((HIDDEN, HIDDEN)).astype(bf),
        'wv': draw((HIDDEN, HIDDEN)).astype(bf), 'wo': draw((HIDDEN, HIDDEN)).astype(bf),
        'w1': draw((HIDDEN, 4 * HIDDEN)).astype(bf), 'w2': draw((4 * HIDDEN, HIDDEN)).astype(bf),
        'ln1_g': jnp.ones((1, HIDDEN), f32), 'ln1_b': jnp.zeros((1, HIDDEN), f32),
        'ln2_g': jnp.ones((1, HIDDEN), f32), 'ln2_b': jnp.zeros((1, HIDDEN), f32),
    }

    # regressor (split-K: pooled blur stream / per-joint [refine|joint_img] stream), zero-padded
    # to 128 output lanes so the head lands in a lane-dense block.
    wp = jnp.pad(draw((C_BLUR, HEAD_DIM)), ((0, 0), (0, HEAD_PAD - HEAD_DIM))).astype(bf)
    wfj = jnp.pad(draw((FRJ_DIM, HEAD_DIM)), ((0, 0), (0, HEAD_PAD - HEAD_DIM))).astype(bf)
    rb = jnp.zeros((1, HEAD_PAD), f32)

    # synthetic MANO assets: blend-shape dirs, template, joint regressor (pre-folded).
    v_template = 0.1 * jax.random.normal(next(keys), (3, NUM_VERTS), f32)
    dirs = 0.01 * jax.random.normal(next(keys), (3, SHAPE_DIM + POSE_DIM, NUM_VERTS), f32)
    jreg = jax.nn.softmax(jax.random.normal(next(keys), (NUM_JOINTS, NUM_VERTS), f32), axis=-1)
    jregT = jreg.T                                          # (V, J)

    dirs_pk = jnp.zeros((SHAPE_DIM + POSE_DIM, 3 * VBLK), f32)
    vt_pk = jnp.zeros((1, 3 * VBLK), f32)
    jdirs_pk = jnp.zeros((SHAPE_DIM + POSE_DIM, 3 * JBLK), f32)
    jt_pk = jnp.zeros((1, 3 * JBLK), f32)
    for c in range(3):
        dirs_pk = dirs_pk.at[:, c * VBLK:c * VBLK + NUM_VERTS].set(dirs[c])
        vt_pk = vt_pk.at[:, c * VBLK:c * VBLK + NUM_VERTS].set(v_template[c][None, :])
        jdirs_pk = jdirs_pk.at[:, c * JBLK:c * JBLK + NUM_JOINTS].set(dirs[c] @ jregT)
        jt_pk = jt_pk.at[:, c * JBLK:c * JBLK + NUM_JOINTS].set((v_template[c] @ jregT)[None, :])

    return {
        's1w': s1w.astype(bf), 's1b': s1b,
        # block-diagonal stem1 weight for the patch-grouped stem2 path (same underlying weights)
        's1w_blk': jnp.kron(jnp.eye(4, dtype=f32), s1w).astype(bf),
        's1b4': jnp.tile(s1b, (1, 4)),
        's2w': s2w.astype(bf), 's2b': s2b,
        'cw': cw.astype(bf), 'cb': cb,
        'hmw': hmw.astype(bf), 'hmb': hmb,
        'fjb': fjb,
        'tf': tf,
        'reg_wp': wp, 'reg_wfj': wfj, 'reg_b': rb,
        'dirs_pk': dirs_pk.astype(bf), 'vt_pk': vt_pk,
        'jdirs_pk': jdirs_pk.astype(bf), 'jt_pk': jt_pk,
    }


# --------------------------------------------------------------------------- forward
def forward(params, img):
    # img: (B, 3, H, W) — NCHW like the PyTorch module
    B, C, Himg, Wimg = img.shape
    H1, W1 = Himg // 2, Wimg // 2
    H2, W2 = H1 // 2, W1 // 2
    HW, HW2 = H1 * W1, H2 * W2

    x = jnp.transpose(img, (0, 2, 3, 1))                                # NHWC (fused by XLA)
    p1 = _nested_patches_from_image(x)                                  # (B, HW, 12)
    p1a = p1.reshape(B * HW, 4 * C).astype(jnp.bfloat16)                # per-pixel stem1 patches
    p1b = p1.reshape(B * HW2, 16 * C).astype(jnp.bfloat16)              # patch-grouped (pure reshape)
    coords = _make_coords_nested(H1, W1)                                # (HW, 2) constant

    pj, blur, geo, meshpk = _fused_call(params, p1a, p1b, coords, B, HW, HW2)

    J = NUM_JOINTS
    feat_joint = pj[:, :, :HIDDEN]                                      # (B, J, 32)
    feat_refine = pj[:, :, HIDDEN:2 * HIDDEN]                           # (B, J, 32)
    joint_img = pj[:, :, 2 * HIDDEN:2 * HIDDEN + 3]                     # (B, J, 3)

    head = geo[:, :HEAD_PAD]
    mano_shape = head[:, :SHAPE_DIM]
    mano_pose = head[:, SHAPE_DIM:SHAPE_DIM + POSE_DIM]
    joint_proj = jnp.stack([geo[:, 128:128 + J], geo[:, 256:256 + J]], axis=-1)       # (B, J, 2)
    joint = jnp.stack([geo[:, 384:384 + J], geo[:, 512:512 + J], geo[:, 640:640 + J]],
                      axis=-1)                                                         # (B, J, 3)
    mesh = jnp.stack([meshpk[:, 0:NUM_VERTS],
                      meshpk[:, VBLK:VBLK + NUM_VERTS],
                      meshpk[:, 2 * VBLK:2 * VBLK + NUM_VERTS]], axis=-1)              # (B, V, 3)

    return {
        'pose': mano_pose,
        'shape': mano_shape,
        'joint_hm': joint_img,
        'joint_proj': joint_proj,
        'joint': joint,
        'mesh': mesh,
        'feats': feat_refine,
        'feats_backbone': {'resnet': blur.reshape(B, H2, W2, C_BLUR),
                           'unfolder': feat_joint},
    }


if __name__ == "__main__":
    key = jax.random.PRNGKey(0)
    pkey, ikey = jax.random.split(key)
    params = init_params(pkey)
    img = jax.random.normal(ikey, (2, 3, 32, 32), dtype=jnp.float32)    # NCHW input
    out = jax.jit(forward)(params, img)
    out = jax.tree_util.tree_map(jax.block_until_ready, out)
    assert out['joint'].shape == (2, NUM_JOINTS, 3)
    assert out['joint_proj'].shape == (2, NUM_JOINTS, 2)
    assert out['mesh'].shape == (2, NUM_VERTS, 3)
    assert out['shape'].shape == (2, SHAPE_DIM)
    assert out['pose'].shape == (2, POSE_DIM)
    assert out['joint_hm'].shape == (2, NUM_JOINTS, 3)
    assert out['feats'].shape == (2, NUM_JOINTS, HIDDEN)
    assert out['feats_backbone']['resnet'].shape == (2, 8, 8, C_BLUR)
    assert out['feats_backbone']['unfolder'].shape == (2, NUM_JOINTS, HIDDEN)
    assert bool(jnp.all(jnp.isfinite(out['mesh']))) and bool(jnp.all(jnp.isfinite(out['joint'])))
    print("KERNEL_OK")
</pallas_src>

<mosaic_0001>
module attributes {stable_mosaic.version = 11 : i64} {
  func.func @kernel(%arg0: memref<512x12xbf16, #tpu.memory_space<vmem>>, %arg1: memref<128x48xbf16, #tpu.memory_space<vmem>>, %arg2: memref<256x2xf32, #tpu.memory_space<vmem>>, %arg3: memref<12x16xbf16, #tpu.memory_space<vmem>>, %arg4: memref<1x16xf32, #tpu.memory_space<vmem>>, %arg5: memref<48x64xbf16, #tpu.memory_space<vmem>>, %arg6: memref<1x64xf32, #tpu.memory_space<vmem>>, %arg7: memref<64x32xbf16, #tpu.memory_space<vmem>>, %arg8: memref<1x32xf32, #tpu.memory_space<vmem>>, %arg9: memref<16x33xbf16, #tpu.memory_space<vmem>>, %arg10: memref<1x33xf32, #tpu.memory_space<vmem>>, %arg11: memref<21x16xbf16, #tpu.memory_space<vmem>>, %arg12: memref<21x1xf32, #tpu.memory_space<vmem>>, %arg13: memref<1x32xf32, #tpu.memory_space<vmem>>, %arg14: memref<32x32xbf16, #tpu.memory_space<vmem>>, %arg15: memref<32x32xbf16, #tpu.memory_space<vmem>>, %arg16: memref<32x32xbf16, #tpu.memory_space<vmem>>, %arg17: memref<32x32xbf16, #tpu.memory_space<vmem>>, %arg18: memref<32x128xbf16, #tpu.memory_space<vmem>>, %arg19: memref<128x32xbf16, #tpu.memory_space<vmem>>, %arg20: memref<1x32xf32, #tpu.memory_space<vmem>>, %arg21: memref<1x32xf32, #tpu.memory_space<vmem>>, %arg22: memref<1x32xf32, #tpu.memory_space<vmem>>, %arg23: memref<1x32xf32, #tpu.memory_space<vmem>>, %arg24: memref<32x128xbf16, #tpu.memory_space<vmem>>, %arg25: memref<735x128xbf16, #tpu.memory_space<vmem>>, %arg26: memref<1x128xf32, #tpu.memory_space<vmem>>, %arg27: memref<58x384xbf16, #tpu.memory_space<vmem>>, %arg28: memref<1x384xf32, #tpu.memory_space<vmem>>, %arg29: memref<58x2688xbf16, #tpu.memory_space<vmem>>, %arg30: memref<1x2688xf32, #tpu.memory_space<vmem>>, %arg31: memref<2x21x128xf32, #tpu.memory_space<vmem>>, %arg32: memref<128x32xf32, #tpu.memory_space<vmem>>, %arg33: memref<2x768xf32, #tpu.memory_space<vmem>>, %arg34: memref<2x2688xf32, #tpu.memory_space<vmem>>) attributes {dimension_semantics = [], scalar_prefetch = 0 : i64, scratch_operands = 0 : i64, tpu.core_type = #tpu.core_type<tc>} {
    %c0 = arith.constant 0 : index
    %c0_0 = arith.constant 0 : index
    %0 = vector.load %arg0[%c0, %c0_0] : memref<512x12xbf16, #tpu.memory_space<vmem>>, vector<512x12xbf16>
    %c0_1 = arith.constant 0 : index
    %c0_2 = arith.constant 0 : index
    %1 = vector.load %arg3[%c0_1, %c0_2] : memref<12x16xbf16, #tpu.memory_space<vmem>>, vector<12x16xbf16>
    %cst = arith.constant dense<0.000000e+00> : vector<512x16xf32>
    %2 = tpu.matmul %0, %1, %cst {dimension_numbers = #tpu.dot_dimension_numbers<[1], [0], [0], [1], [0, 0, 1, 1], [], []>} : vector<512x12xbf16>, vector<12x16xbf16>, vector<512x16xf32> -> vector<512x16xf32>
    %c0_3 = arith.constant 0 : index
    %c0_4 = arith.constant 0 : index
    %3 = vector.load %arg4[%c0_3, %c0_4] : memref<1x16xf32, #tpu.memory_space<vmem>>, vector<1x16xf32>
    %4 = vector.broadcast %3 : vector<1x16xf32> to vector<512x16xf32>
    %5 = arith.addf %2, %4 : vector<512x16xf32>
    %cst_5 = arith.constant 0.000000e+00 : f32
    %6 = vector.broadcast %cst_5 : f32 to vector<512x16xf32>
    %7 = arith.maximumf %5, %6 : vector<512x16xf32>
    %8 = arith.truncf %7 : vector<512x16xf32> to vector<512x16xbf16>
    %c0_6 = arith.constant 0 : index
    %c0_7 = arith.constant 0 : index
    %9 = vector.load %arg1[%c0_6, %c0_7] : memref<128x48xbf16, #tpu.memory_space<vmem>>, vector<128x48xbf16>
    %c0_8 = arith.constant 0 : index
    %c0_9 = arith.constant 0 : index
    %10 = vector.load %arg5[%c0_8, %c0_9] : memref<48x64xbf16, #tpu.memory_space<vmem>>, vector<48x64xbf16>
    %cst_10 = arith.constant dense<0.000000e+00> : vector<128x64xf32>
    %11 = tpu.matmul %9, %10, %cst_10 {dimension_numbers = #tpu.dot_dimension_numbers<[1], [0], [0], [1], [0, 0, 1, 1], [], []>} : vector<128x48xbf16>, vector<48x64xbf16>, vector<128x64xf32> -> vector<128x64xf32>
    %c0_11 = arith.constant 0 : index
    %c0_12 = arith.constant 0 : index
    %12 = vector.load %arg6[%c0_11, %c0_12] : memref<1x64xf32, #tpu.memory_space<vmem>>, vector<1x64xf32>
    %13 = vector.broadcast %12 : vector<1x64xf32> to vector<128x64xf32>
    %14 = arith.addf %11, %13 : vector<128x64xf32>
    %cst_13 = arith.constant 0.000000e+00 : f32
    %15 = vector.broadcast %cst_13 : f32 to vector<128x64xf32>
    %16 = arith.maximumf %14, %15 : vector<128x64xf32>
    %17 = arith.truncf %16 : vector<128x64xf32> to vector<128x64xbf16>
    %c0_14 = arith.constant 0 : index
    %c0_15 = arith.constant 0 : index
    %18 = vector.load %arg7[%c0_14, %c0_15] : memref<64x32xbf16, #tpu.memory_space<vmem>>, vector<64x32xbf16>
    %cst_16 = arith.constant dense<0.000000e+00> : vector<128x32xf32>
    %19 = tpu.matmul %17, %18, %cst_16 {dimension_numbers = #tpu.dot_dimension_numbers<[1], [0], [0], [1], [0, 0, 1, 1], [], []>} : vector<128x64xbf16>, vector<64x32xbf16>, vector<128x32xf32> -> vector<128x32xf32>
    %c0_17 = arith.constant 0 : index
    %c0_18 = arith.constant 0 : index
    %20 = vector.load %arg8[%c0_17, %c0_18] : memref<1x32xf32, #tpu.memory_space<vmem>>, vector<1x32xf32>
    %21 = vector.broadcast %20 : vector<1x32xf32> to vector<128x32xf32>
    %22 = arith.addf %19, %21 : vector<128x32xf32>
    %cst_19 = arith.constant 0.000000e+00 : f32
    %23 = vector.broadcast %cst_19 : f32 to vector<128x32xf32>
    %24 = arith.maximumf %22, %23 : vector<128x32xf32>
    %c0_20 = arith.constant 0 : index
    %c0_21 = arith.constant 0 : index
    %25 = vector.load %arg32[%c0_20, %c0_21] : memref<128x32xf32, #tpu.memory_space<vmem>>, vector<128x32xf32>
    tpu.vector_store %arg32[%c0_20, %c0_21], %24 {strides = array<i32>} : memref<128x32xf32, #tpu.memory_space<vmem>>, vector<128x32xf32>,
    %c0_22 = arith.constant 0 : index
    %c0_23 = arith.constant 0 : index
    %26 = vector.load %arg9[%c0_22, %c0_23] : memref<16x33xbf16, #tpu.memory_space<vmem>>, vector<16x33xbf16>
    %cst_24 = arith.constant dense<0.000000e+00> : vector<512x33xf32>
    %27 = tpu.matmul %8, %26, %cst_24 {dimension_numbers = #tpu.dot_dimension_numbers<[1], [0], [0], [1], [0, 0, 1, 1], [], []>} : vector<512x16xbf16>, vector<16x33xbf16>, vector<512x33xf32> -> vector<512x33xf32>
    %c0_25 = arith.constant 0 : index
    %c0_26 = arith.constant 0 : index
    %28 = vector.load %arg10[%c0_25, %c0_26] : memref<1x33xf32, #tpu.memory_space<vmem>>, vector<1x33xf32>
    %29 = vector.broadcast %28 : vector<1x33xf32> to vector<512x33xf32>
    %30 = arith.addf %27, %29 : vector<512x33xf32>
    %c0_27 = arith.constant 0 : index
    %c0_28 = arith.constant 0 : index
    %31 = vector.load %arg11[%c0_27, %c0_28] : memref<21x16xbf16, #tpu.memory_space<vmem>>, vector<21x16xbf16>
    %cst_29 = arith.constant dense<0.000000e+00> : vector<21x512xf32>
    %32 = tpu.matmul %31, %8, %cst_29 {dimension_numbers = #tpu.dot_dimension_numbers<[1], [1], [0], [0], [0, 0, 1, 0], [], []>} : vector<21x16xbf16>, vector<512x16xbf16>, vector<21x512xf32> -> vector<21x512xf32>
    %c0_30 = arith.constant 0 : index
    %c0_31 = arith.constant 0 : index
    %33 = vector.load %arg12[%c0_30, %c0_31] : memref<21x1xf32, #tpu.memory_space<vmem>>, vector<21x1xf32>
    %34 = vector.broadcast %33 : vector<21x1xf32> to vector<21x512xf32>
    %35 = arith.addf %32, %34 : vector<21x512xf32>
    %c0_32 = arith.constant 0 : index
    %c0_33 = arith.constant 0 : index
    %36 = vector.load %arg2[%c0_32, %c0_33] : memref<256x2xf32, #tpu.memory_space<vmem>>, vector<256x2xf32>
    %c0_34 = arith.constant 0 : index
    %c0_35 = arith.constant 0 : index
    %37 = vector.load %arg13[%c0_34, %c0_35] : memref<1x32xf32, #tpu.memory_space<vmem>>, vector<1x32xf32>
    %c0_36 = arith.constant 0 : index
    %c0_37 = arith.constant 0 : index
    %38 = vector.load %arg20[%c0_36, %c0_37] : memref<1x32xf32, #tpu.memory_space<vmem>>, vector<1x32xf32>
    %c0_38 = arith.constant 0 : index
    %c0_39 = arith.constant 0 : index
    %39 = vector.load %arg21[%c0_38, %c0_39] : memref<1x32xf32, #tpu.memory_space<vmem>>, vector<1x32xf32>
    %c0_40 = arith.constant 0 : index
    %c0_41 = arith.constant 0 : index
    %40 = vector.load %arg22[%c0_40, %c0_41] : memref<1x32xf32, #tpu.memory_space<vmem>>, vector<1x32xf32>
    %c0_42 = arith.constant 0 : index
    %c0_43 = arith.constant 0 : index
    %41 = vector.load %arg23[%c0_42, %c0_43] : memref<1x32xf32, #tpu.memory_space<vmem>>, vector<1x32xf32>
    %c0_44 = arith.constant 0 : index
    %c0_45 = arith.constant 0 : index
    %42 = vector.load %arg14[%c0_44, %c0_45] : memref<32x32xbf16, #tpu.memory_space<vmem>>, vector<32x32xbf16>
    %c0_46 = arith.constant 0 : index
    %c0_47 = arith.constant 0 : index
    %43 = vector.load %arg15[%c0_46, %c0_47] : memref<32x32xbf16, #tpu.memory_space<vmem>>, vector<32x32xbf16>
    %c0_48 = arith.constant 0 : index
    %c0_49 = arith.constant 0 : index
    %44 = vector.load %arg16[%c0_48, %c0_49] : memref<32x32xbf16, #tpu.memory_space<vmem>>, vector<32x32xbf16>
    %c0_50 = arith.constant 0 : index
    %c0_51 = arith.constant 0 : index
    %45 = vector.load %arg17[%c0_50, %c0_51] : memref<32x32xbf16, #tpu.memory_space<vmem>>, vector<32x32xbf16>
    %c0_52 = arith.constant 0 : index
    %c0_53 = arith.constant 0 : index
    %46 = vector.load %arg18[%c0_52, %c0_53] : memref<32x128xbf16, #tpu.memory_space<vmem>>, vector<32x128xbf16>
    %c0_54 = arith.constant 0 : index
    %c0_55 = arith.constant 0 : index
    %47 = vector.load %arg19[%c0_54, %c0_55] : memref<128x32xbf16, #tpu.memory_space<vmem>>, vector<128x32xbf16>
    %cst_56 = arith.constant 0.000000e+00 : f32
    %48 = vector.broadcast %cst_56 : f32 to vector<21x61xf32>
    %49 = vector.extract_strided_slice %35 {offsets = [0, 0], sizes = [21, 256], strides = [1, 1]} : vector<21x512xf32> to vector<21x256xf32>
    %cst_57 = arith.constant dense<0xFF800000> : vector<21xf32>
    %50 = vector.multi_reduction <maximumf>, %49, %cst_57 [1] : vector<21x256xf32> to vector<21xf32>
    %51 = vector.shape_cast %50 : vector<21xf32> to vector<21x1xf32>
    %52 = vector.broadcast %51 : vector<21x1xf32> to vector<21x256xf32>
    %53 = arith.subf %49, %52 : vector<21x256xf32>
    %54 = math.exp %53 : vector<21x256xf32>
    %cst_58 = arith.constant dense<0.000000e+00> : vector<21xf32>
    %55 = vector.multi_reduction <add>, %54, %cst_58 [1] : vector<21x256xf32> to vector<21xf32>
    %56 = vector.shape_cast %55 : vector<21xf32> to vector<21x1xf32>
    %57 = vector.broadcast %56 : vector<21x1xf32> to vector<21x256xf32>
    %58 = arith.divf %54, %57 : vector<21x256xf32>
    %59 = vector.extract_strided_slice %30 {offsets = [0, 0], sizes = [256, 33], strides = [1, 1]} : vector<512x33xf32> to vector<256x33xf32>
    %cst_59 = arith.constant dense<0.000000e+00> : vector<21x33xf32>
    %60 = tpu.matmul %58, %59, %cst_59 {dimension_numbers = #tpu.dot_dimension_numbers<[1], [0], [0], [1], [0, 0, 1, 1], [], []>} : vector<21x256xf32>, vector<256x33xf32>, vector<21x33xf32> -> vector<21x33xf32>
    %cst_60 = arith.constant dense<0.000000e+00> : vector<21x2xf32>
    %61 = tpu.matmul %58, %36, %cst_60 {dimension_numbers = #tpu.dot_dimension_numbers<[1], [0], [0], [1], [0, 0, 1, 1], [], []>} : vector<21x256xf32>, vector<256x2xf32>, vector<21x2xf32> -> vector<21x2xf32>
    %62 = vector.extract_strided_slice %60 {offsets = [0, 0], sizes = [21, 32], strides = [1, 1]} : vector<21x33xf32> to vector<21x32xf32>
    %63 = vector.broadcast %37 : vector<1x32xf32> to vector<21x32xf32>
    %64 = arith.addf %62, %63 : vector<21x32xf32>
    %cst_61 = arith.constant 0.000000e+00 : f32
    %65 = vector.broadcast %cst_61 : f32 to vector<21x32xf32>
    %66 = arith.maximumf %64, %65 : vector<21x32xf32>
    %67 = vector.extract_strided_slice %60 {offsets = [0, 32], sizes = [21, 1], strides = [1, 1]} : vector<21x33xf32> to vector<21x1xf32>
    %68 = tpu.concatenate %61, %67 in 1 : vector<21x2xf32>, vector<21x1xf32> -> vector<21x3xf32>
    %cst_62 = arith.constant dense<0.000000e+00> : vector<21xf32>
    %69 = vector.multi_reduction <add>, %66, %cst_62 [1] : vector<21x32xf32> to vector<21xf32>
    %70 = vector.shape_cast %69 : vector<21xf32> to vector<21x1xf32>
    %cst_63 = arith.constant 3.200000e+01 : f32
    %71 = vector.broadcast %cst_63 : f32 to vector<21x1xf32>
    %72 = arith.divf %70, %71 : vector<21x1xf32>
    %73 = vector.broadcast %72 : vector<21x1xf32> to vector<21x32xf32>
    %74 = arith.subf %66, %73 : vector<21x32xf32>
    %75 = arith.mulf %74, %74 : vector<21x32xf32>
    %cst_64 = arith.constant dense<0.000000e+00> : vector<21xf32>
    %76 = vector.multi_reduction <add>, %75, %cst_64 [1] : vector<21x32xf32> to vector<21xf32>
    %77 = vector.shape_cast %76 : vector<21xf32> to vector<21x1xf32>
    %cst_65 = arith.constant 3.200000e+01 : f32
    %78 = vector.broadcast %cst_65 : f32 to vector<21x1xf32>
    %79 = arith.divf %77, %78 : vector<21x1xf32>
    %80 = vector.broadcast %72 : vector<21x1xf32> to vector<21x32xf32>
    %81 = arith.subf %66, %80 : vector<21x32xf32>
    %cst_66 = arith.constant 9.99999974E-6 : f32
    %82 = vector.broadcast %cst_66 : f32 to vector<21x1xf32>
    %83 = arith.addf %79, %82 : vector<21x1xf32>
    %84 = math.rsqrt %83 : vector<21x1xf32>
    %85 = vector.broadcast %84 : vector<21x1xf32> to vector<21x32xf32>
    %86 = arith.mulf %81, %85 : vector<21x32xf32>
    %87 = vector.broadcast %38 : vector<1x32xf32> to vector<21x32xf32>
    %88 = arith.mulf %86, %87 : vector<21x32xf32>
    %89 = vector.broadcast %39 : vector<1x32xf32> to vector<21x32xf32>
    %90 = arith.addf %88, %89 : vector<21x32xf32>
    %91 = arith.truncf %90 : vector<21x32xf32> to vector<21x32xbf16>
    %cst_67 = arith.constant dense<0.000000e+00> : vector<21x32xf32>
    %92 = tpu.matmul %91, %42, %cst_67 {dimension_numbers = #tpu.dot_dimension_numbers<[1], [0], [0], [1], [0, 0, 1, 1], [], []>} : vector<21x32xbf16>, vector<32x32xbf16>, vector<21x32xf32> -> vector<21x32xf32>
    %cst_68 = arith.constant dense<0.000000e+00> : vector<21x32xf32>
    %93 = tpu.matmul %91, %43, %cst_68 {dimension_numbers = #tpu.dot_dimension_numbers<[1], [0], [0], [1], [0, 0, 1, 1], [], []>} : vector<21x32xbf16>, vector<32x32xbf16>, vector<21x32xf32> -> vector<21x32xf32>
    %cst_69 = arith.constant dense<0.000000e+00> : vector<21x32xf32>
    %94 = tpu.matmul %91, %44, %cst_69 {dimension_numbers = #tpu.dot_dimension_numbers<[1], [0], [0], [1], [0, 0, 1, 1], [], []>} : vector<21x32xbf16>, vector<32x32xbf16>, vector<21x32xf32> -> vector<21x32xf32>
    %95 = arith.truncf %92 : vector<21x32xf32> to vector<21x32xbf16>
    %96 = arith.truncf %93 : vector<21x32xf32> to vector<21x32xbf16>
    %cst_70 = arith.constant dense<0.000000e+00> : vector<21x21xf32>
    %97 = tpu.matmul %95, %96, %cst_70 {dimension_numbers = #tpu.dot_dimension_numbers<[1], [1], [0], [0], [0, 0, 1, 0], [], []>} : vector<21x32xbf16>, vector<21x32xbf16>, vector<21x21xf32> -> vector<21x21xf32>
    %cst_71 = arith.constant 0.176776692 : f32
    %98 = vector.broadcast %cst_71 : f32 to vector<21x21xf32>
    %99 = arith.mulf %97, %98 : vector<21x21xf32>
    %cst_72 = arith.constant dense<0xFF800000> : vector<21xf32>
    %100 = vector.multi_reduction <maximumf>, %99, %cst_72 [1] : vector<21x21xf32> to vector<21xf32>
    %101 = vector.shape_cast %100 : vector<21xf32> to vector<21x1xf32>
    %102 = vector.broadcast %101 : vector<21x1xf32> to vector<21x21xf32>
    %103 = arith.subf %99, %102 : vector<21x21xf32>
    %104 = math.exp %103 : vector<21x21xf32>
    %cst_73 = arith.constant dense<0.000000e+00> : vector<21xf32>
    %105 = vector.multi_reduction <add>, %104, %cst_73 [1] : vector<21x21xf32> to vector<21xf32>
    %106 = vector.shape_cast %105 : vector<21xf32> to vector<21x1xf32>
    %107 = tpu.reciprocal %106 {approx = true} : vector<21x1xf32> -> vector<21x1xf32>
    %108 = vector.broadcast %107 : vector<21x1xf32> to vector<21x21xf32>
    %109 = arith.mulf %104, %108 : vector<21x21xf32>
    %110 = arith.truncf %109 : vector<21x21xf32> to vector<21x21xbf16>
    %111 = arith.truncf %94 : vector<21x32xf32> to vector<21x32xbf16>
    %cst_74 = arith.constant dense<0.000000e+00> : vector<21x32xf32>
    %112 = tpu.matmul %110, %111, %cst_74 {dimension_numbers = #tpu.dot_dimension_numbers<[1], [0], [0], [1], [0, 0, 1, 1], [], []>} : vector<21x21xbf16>, vector<21x32xbf16>, vector<21x32xf32> -> vector<21x32xf32>
    %113 = arith.truncf %112 : vector<21x32xf32> to vector<21x32xbf16>
    %cst_75 = arith.constant dense<0.000000e+00> : vector<21x32xf32>
    %114 = tpu.matmul %113, %45, %cst_75 {dimension_numbers = #tpu.dot_dimension_numbers<[1], [0], [0], [1], [0, 0, 1, 1], [], []>} : vector<21x32xbf16>, vector<32x32xbf16>, vector<21x32xf32> -> vector<21x32xf32>
    %115 = arith.addf %66, %114 : vector<21x32xf32>
    %cst_76 = arith.constant dense<0.000000e+00> : vector<21xf32>
    %116 = vector.multi_reduction <add>, %115, %cst_76 [1] : vector<21x32xf32> to vector<21xf32>
    %117 = vector.shape_cast %116 : vector<21xf32> to vector<21x1xf32>
    %cst_77 = arith.constant 3.200000e+01 : f32
    %118 = vector.broadcast %cst_77 : f32 to vector<21x1xf32>
    %119 = arith.divf %117, %118 : vector<21x1xf32>
    %120 = vector.broadcast %119 : vector<21x1xf32> to vector<21x32xf32>
    %121 = arith.subf %115, %120 : vector<21x32xf32>
    %122 = arith.mulf %121, %121 : vector<21x32xf32>
    %cst_78 = arith.constant dense<0.000000e+00> : vector<21xf32>
    %123 = vector.multi_reduction <add>, %122, %cst_78 [1] : vector<21x32xf32> to vector<21xf32>
    %124 = vector.shape_cast %123 : vector<21xf32> to vector<21x1xf32>
    %cst_79 = arith.constant 3.200000e+01 : f32
    %125 = vector.broadcast %cst_79 : f32 to vector<21x1xf32>
    %126 = arith.divf %124, %125 : vector<21x1xf32>
    %127 = vector.broadcast %119 : vector<21x1xf32> to vector<21x32xf32>
    %128 = arith.subf %115, %127 : vector<21x32xf32>
    %cst_80 = arith.constant 9.99999974E-6 : f32
    %129 = vector.broadcast %cst_80 : f32 to vector<21x1xf32>
    %130 = arith.addf %126, %129 : vector<21x1xf32>
    %131 = math.rsqrt %130 : vector<21x1xf32>
    %132 = vector.broadcast %131 : vector<21x1xf32> to vector<21x32xf32>
    %133 = arith.mulf %128, %132 : vector<21x32xf32>
    %134 = vector.broadcast %40 : vector<1x32xf32> to vector<21x32xf32>
    %135 = arith.mulf %133, %134 : vector<21x32xf32>
    %136 = vector.broadcast %41 : vector<1x32xf32> to vector<21x32xf32>
    %137 = arith.addf %135, %136 : vector<21x32xf32>
    %138 = arith.truncf %137 : vector<21x32xf32> to vector<21x32xbf16>
    %cst_81 = arith.constant dense<0.000000e+00> : vector<21x128xf32>
    %139 = tpu.matmul %138, %46, %cst_81 {dimension_numbers = #tpu.dot_dimension_numbers<[1], [0], [0], [1], [0, 0, 1, 1], [], []>} : vector<21x32xbf16>, vector<32x128xbf16>, vector<21x128xf32> -> vector<21x128xf32>
    %cst_82 = arith.constant 0.000000e+00 : f32
    %140 = vector.broadcast %cst_82 : f32 to vector<21x128xf32>
    %141 = arith.maximumf %139, %140 : vector<21x128xf32>
    %142 = arith.truncf %141 : vector<21x128xf32> to vector<21x128xbf16>
    %cst_83 = arith.constant dense<0.000000e+00> : vector<21x32xf32>
    %143 = tpu.matmul %142, %47, %cst_83 {dimension_numbers = #tpu.dot_dimension_numbers<[1], [0], [0], [1], [0, 0, 1, 1], [], []>} : vector<21x128xbf16>, vector<128x32xbf16>, vector<21x32xf32> -> vector<21x32xf32>
    %144 = arith.addf %115, %143 : vector<21x32xf32>
    %145 = tpu.concatenate %66, %144, %68, %48 in 1 : vector<21x32xf32>, vector<21x32xf32>, vector<21x3xf32>, vector<21x61xf32> -> vector<21x128xf32>
    %c0_84 = arith.constant 0 : index
    %c0_85 = arith.constant 0 : index
    %c0_86 = arith.constant 0 : index
    %146 = vector.load %arg31[%c0_84, %c0_85, %c0_86] : memref<2x21x128xf32, #tpu.memory_space<vmem>>, vector<1x21x128xf32>
    %147 = vector.shape_cast %146 : vector<1x21x128xf32> to vector<21x128xf32>
    %148 = vector.shape_cast %145 : vector<21x128xf32> to vector<1x21x128xf32>
    tpu.vector_store %arg31[%c0_84, %c0_85, %c0_86], %148 {strides = array<i32>} : memref<2x21x128xf32, #tpu.memory_space<vmem>>, vector<1x21x128xf32>,
    %149 = tpu.concatenate %144, %68 in 1 : vector<21x32xf32>, vector<21x3xf32> -> vector<21x35xf32>
    %150 = vector.extract_strided_slice %149 {offsets = [0, 0], sizes = [1, 35], strides = [1, 1]} : vector<21x35xf32> to vector<1x35xf32>
    %151 = vector.extract_strided_slice %149 {offsets = [1, 0], sizes = [1, 35], strides = [1, 1]} : vector<21x35xf32> to vector<1x35xf32>
    %152 = vector.extract_strided_slice %149 {offsets = [2, 0], sizes = [1, 35], strides = [1, 1]} : vector<21x35xf32> to vector<1x35xf32>
    %153 = vector.extract_strided_slice %149 {offsets = [3, 0], sizes = [1, 35], strides = [1, 1]} : vector<21x35xf32> to vector<1x35xf32>
    %154 = vector.extract_strided_slice %149 {offsets = [4, 0], sizes = [1, 35], strides = [1, 1]} : vector<21x35xf32> to vector<1x35xf32>
    %155 = vector.extract_strided_slice %149 {offsets = [5, 0], sizes = [1, 35], strides = [1, 1]} : vector<21x35xf32> to vector<1x35xf32>
    %156 = vector.extract_strided_slice %149 {offsets = [6, 0], sizes = [1, 35], strides = [1, 1]} : vector<21x35xf32> to vector<1x35xf32>
    %157 = vector.extract_strided_slice %149 {offsets = [7, 0], sizes = [1, 35], strides = [1, 1]} : vector<21x35xf32> to vector<1x35xf32>
    %158 = vector.extract_strided_slice %149 {offsets = [8, 0], sizes = [1, 35], strides = [1, 1]} : vector<21x35xf32> to vector<1x35xf32>
    %159 = vector.extract_strided_slice %149 {offsets = [9, 0], sizes = [1, 35], strides = [1, 1]} : vector<21x35xf32> to vector<1x35xf32>
    %160 = vector.extract_strided_slice %149 {offsets = [10, 0], sizes = [1, 35], strides = [1, 1]} : vector<21x35xf32> to vector<1x35xf32>
    %161 = vector.extract_strided_slice %149 {offsets = [11, 0], sizes = [1, 35], strides = [1, 1]} : vector<21x35xf32> to vector<1x35xf32>
    %162 = vector.extract_strided_slice %149 {offsets = [12, 0], sizes = [1, 35], strides = [1, 1]} : vector<21x35xf32> to vector<1x35xf32>
    %163 = vector.extract_strided_slice %149 {offsets = [13, 0], sizes = [1, 35], strides = [1, 1]} : vector<21x35xf32> to vector<1x35xf32>
    %164 = vector.extract_strided_slice %149 {offsets = [14, 0], sizes = [1, 35], strides = [1, 1]} : vector<21x35xf32> to vector<1x35xf32>
    %165 = vector.extract_strided_slice %149 {offsets = [15, 0], sizes = [1, 35], strides = [1, 1]} : vector<21x35xf32> to vector<1x35xf32>
    %166 = vector.extract_strided_slice %149 {offsets = [16, 0], sizes = [1, 35], strides = [1, 1]} : vector<21x35xf32> to vector<1x35xf32>
    %167 = vector.extract_strided_slice %149 {offsets = [17, 0], sizes = [1, 35], strides = [1, 1]} : vector<21x35xf32> to vector<1x35xf32>
    %168 = vector.extract_strided_slice %149 {offsets = [18, 0], sizes = [1, 35], strides = [1, 1]} : vector<21x35xf32> to vector<1x35xf32>
    %169 = vector.extract_strided_slice %149 {offsets = [19, 0], sizes = [1, 35], strides = [1, 1]} : vector<21x35xf32> to vector<1x35xf32>
    %170 = vector.extract_strided_slice %149 {offsets = [20, 0], sizes = [1, 35], strides = [1, 1]} : vector<21x35xf32> to vector<1x35xf32>
    %171 = tpu.concatenate %150, %151, %152, %153, %154, %155, %156, %157, %158, %159, %160, %161, %162, %163, %164, %165 in 1 : vector<1x35xf32>, vector<1x35xf32>, vector<1x35xf32>, vector<1x35xf32>, vector<1x35xf32>, vector<1x35xf32>, vector<1x35xf32>, vector<1x35xf32>, vector<1x35xf32>, vector<1x35xf32>, vector<1x35xf32>, vector<1x35xf32>, vector<1x35xf32>, vector<1x35xf32>, vector<1x35xf32>, vector<1x35xf32> -> vector<1x560xf32>
    %172 = tpu.concatenate %166, %167, %168, %169, %170 in 1 : vector<1x35xf32>, vector<1x35xf32>, vector<1x35xf32>, vector<1x35xf32>, vector<1x35xf32> -> vector<1x175xf32>
    %173 = tpu.concatenate %171, %172 in 1 : vector<1x560xf32>, vector<1x175xf32> -> vector<1x735xf32>
    %174 = vector.extract_strided_slice %24 {offsets = [0, 0], sizes = [64, 32], strides = [1, 1]} : vector<128x32xf32> to vector<64x32xf32>
    %cst_87 = arith.constant dense<0.000000e+00> : vector<32xf32>
    %175 = vector.multi_reduction <add>, %174, %cst_87 [0] : vector<64x32xf32> to vector<32xf32>
    %176 = vector.shape_cast %175 : vector<32xf32> to vector<1x32xf32>
    %cst_88 = arith.constant 6.400000e+01 : f32
    %177 = vector.broadcast %cst_88 : f32 to vector<1x32xf32>
    %178 = arith.divf %176, %177 : vector<1x32xf32>
    %179 = vector.extract_strided_slice %35 {offsets = [0, 256], sizes = [21, 256], strides = [1, 1]} : vector<21x512xf32> to vector<21x256xf32>
    %cst_89 = arith.constant dense<0xFF800000> : vector<21xf32>
    %180 = vector.multi_reduction <maximumf>, %179, %cst_89 [1] : vector<21x256xf32> to vector<21xf32>
    %181 = vector.shape_cast %180 : vector<21xf32> to vector<21x1xf32>
    %182 = vector.broadcast %181 : vector<21x1xf32> to vector<21x256xf32>
    %183 = arith.subf %179, %182 : vector<21x256xf32>
    %184 = math.exp %183 : vector<21x256xf32>
    %cst_90 = arith.constant dense<0.000000e+00> : vector<21xf32>
    %185 = vector.multi_reduction <add>, %184, %cst_90 [1] : vector<21x256xf32> to vector<21xf32>
    %186 = vector.shape_cast %185 : vector<21xf32> to vector<21x1xf32>
    %187 = vector.broadcast %186 : vector<21x1xf32> to vector<21x256xf32>
    %188 = arith.divf %184, %187 : vector<21x256xf32>
    %189 = vector.extract_strided_slice %30 {offsets = [256, 0], sizes = [256, 33], strides = [1, 1]} : vector<512x33xf32> to vector<256x33xf32>
    %cst_91 = arith.constant dense<0.000000e+00> : vector<21x33xf32>
    %190 = tpu.matmul %188, %189, %cst_91 {dimension_numbers = #tpu.dot_dimension_numbers<[1], [0], [0], [1], [0, 0, 1, 1], [], []>} : vector<21x256xf32>, vector<256x33xf32>, vector<21x33xf32> -> vector<21x33xf32>
    %cst_92 = arith.constant dense<0.000000e+00> : vector<21x2xf32>
    %191 = tpu.matmul %188, %36, %cst_92 {dimension_numbers = #tpu.dot_dimension_numbers<[1], [0], [0], [1], [0, 0, 1, 1], [], []>} : vector<21x256xf32>, vector<256x2xf32>, vector<21x2xf32> -> vector<21x2xf32>
    %192 = vector.extract_strided_slice %190 {offsets = [0, 0], sizes = [21, 32], strides = [1, 1]} : vector<21x33xf32> to vector<21x32xf32>
    %193 = vector.broadcast %37 : vector<1x32xf32> to vector<21x32xf32>
    %194 = arith.addf %192, %193 : vector<21x32xf32>
    %cst_93 = arith.constant 0.000000e+00 : f32
    %195 = vector.broadcast %cst_93 : f32 to vector<21x32xf32>
    %196 = arith.maximumf %194, %195 : vector<21x32xf32>
    %197 = vector.extract_strided_slice %190 {offsets = [0, 32], sizes = [21, 1], strides = [1, 1]} : vector<21x33xf32> to vector<21x1xf32>
    %198 = tpu.concatenate %191, %197 in 1 : vector<21x2xf32>, vector<21x1xf32> -> vector<21x3xf32>
    %cst_94 = arith.constant dense<0.000000e+00> : vector<21xf32>
    %199 = vector.multi_reduction <add>, %196, %cst_94 [1] : vector<21x32xf32> to vector<21xf32>
    %200 = vector.shape_cast %199 : vector<21xf32> to vector<21x1xf32>
    %cst_95 = arith.constant 3.200000e+01 : f32
    %201 = vector.broadcast %cst_95 : f32 to vector<21x1xf32>
    %202 = arith.divf %200, %201 : vector<21x1xf32>
    %203 = vector.broadcast %202 : vector<21x1xf32> to vector<21x32xf32>
    %204 = arith.subf %196, %203 : vector<21x32xf32>
    %205 = arith.mulf %204, %204 : vector<21x32xf32>
    %cst_96 = arith.constant dense<0.000000e+00> : vector<21xf32>
    %206 = vector.multi_reduction <add>, %205, %cst_96 [1] : vector<21x32xf32> to vector<21xf32>
    %207 = vector.shape_cast %206 : vector<21xf32> to vector<21x1xf32>
    %cst_97 = arith.constant 3.200000e+01 : f32
    %208 = vector.broadcast %cst_97 : f32 to vector<21x1xf32>
    %209 = arith.divf %207, %208 : vector<21x1xf32>
    %210 = vector.broadcast %202 : vector<21x1xf32> to vector<21x32xf32>
    %211 = arith.subf %196, %210 : vector<21x32xf32>
    %cst_98 = arith.constant 9.99999974E-6 : f32
    %212 = vector.broadcast %cst_98 : f32 to vector<21x1xf32>
    %213 = arith.addf %209, %212 : vector<21x1xf32>
    %214 = math.rsqrt %213 : vector<21x1xf32>
    %215 = vector.broadcast %214 : vector<21x1xf32> to vector<21x32xf32>
    %216 = arith.mulf %211, %215 : vector<21x32xf32>
    %217 = vector.broadcast %38 : vector<1x32xf32> to vector<21x32xf32>
    %218 = arith.mulf %216, %217 : vector<21x32xf32>
    %219 = vector.broadcast %39 : vector<1x32xf32> to vector<21x32xf32>
    %220 = arith.addf %218, %219 : vector<21x32xf32>
    %221 = arith.truncf %220 : vector<21x32xf32> to vector<21x32xbf16>
    %cst_99 = arith.constant dense<0.000000e+00> : vector<21x32xf32>
    %222 = tpu.matmul %221, %42, %cst_99 {dimension_numbers = #tpu.dot_dimension_numbers<[1], [0], [0], [1], [0, 0, 1, 1], [], []>} : vector<21x32xbf16>, vector<32x32xbf16>, vector<21x32xf32> -> vector<21x32xf32>
    %cst_100 = arith.constant dense<0.000000e+00> : vector<21x32xf32>
    %223 = tpu.matmul %221, %43, %cst_100 {dimension_numbers = #tpu.dot_dimension_numbers<[1], [0], [0], [1], [0, 0, 1, 1], [], []>} : vector<21x32xbf16>, vector<32x32xbf16>, vector<21x32xf32> -> vector<21x32xf32>
    %cst_101 = arith.constant dense<0.000000e+00> : vector<21x32xf32>
    %224 = tpu.matmul %221, %44, %cst_101 {dimension_numbers = #tpu.dot_dimension_numbers<[1], [0], [0], [1], [0, 0, 1, 1], [], []>} : vector<21x32xbf16>, vector<32x32xbf16>, vector<21x32xf32> -> vector<21x32xf32>
    %225 = arith.truncf %222 : vector<21x32xf32> to vector<21x32xbf16>
    %226 = arith.truncf %223 : vector<21x32xf32> to vector<21x32xbf16>
    %cst_102 = arith.constant dense<0.000000e+00> : vector<21x21xf32>
    %227 = tpu.matmul %225, %226, %cst_102 {dimension_numbers = #tpu.dot_dimension_numbers<[1], [1], [0], [0], [0, 0, 1, 0], [], []>} : vector<21x32xbf16>, vector<21x32xbf16>, vector<21x21xf32> -> vector<21x21xf32>
    %cst_103 = arith.constant 0.176776692 : f32
    %228 = vector.broadcast %cst_103 : f32 to vector<21x21xf32>
    %229 = arith.mulf %227, %228 : vector<21x21xf32>
    %cst_104 = arith.constant dense<0xFF800000> : vector<21xf32>
    %230 = vector.multi_reduction <maximumf>, %229, %cst_104 [1] : vector<21x21xf32> to vector<21xf32>
    %231 = vector.shape_cast %230 : vector<21xf32> to vector<21x1xf32>
    %232 = vector.broadcast %231 : vector<21x1xf32> to vector<21x21xf32>
    %233 = arith.subf %229, %232 : vector<21x21xf32>
    %234 = math.exp %233 : vector<21x21xf32>
    %cst_105 = arith.constant dense<0.000000e+00> : vector<21xf32>
    %235 = vector.multi_reduction <add>, %234, %cst_105 [1] : vector<21x21xf32> to vector<21xf32>
    %236 = vector.shape_cast %235 : vector<21xf32> to vector<21x1xf32>
    %237 = tpu.reciprocal %236 {approx = true} : vector<21x1xf32> -> vector<21x1xf32>
    %238 = vector.broadcast %237 : vector<21x1xf32> to vector<21x21xf32>
    %239 = arith.mulf %234, %238 : vector<21x21xf32>
    %240 = arith.truncf %239 : vector<21x21xf32> to vector<21x21xbf16>
    %241 = arith.truncf %224 : vector<21x32xf32> to vector<21x32xbf16>
    %cst_106 = arith.constant dense<0.000000e+00> : vector<21x32xf32>
    %242 = tpu.matmul %240, %241, %cst_106 {dimension_numbers = #tpu.dot_dimension_numbers<[1], [0], [0], [1], [0, 0, 1, 1], [], []>} : vector<21x21xbf16>, vector<21x32xbf16>, vector<21x32xf32> -> vector<21x32xf32>
    %243 = arith.truncf %242 : vector<21x32xf32> to vector<21x32xbf16>
    %cst_107 = arith.constant dense<0.000000e+00> : vector<21x32xf32>
    %244 = tpu.matmul %243, %45, %cst_107 {dimension_numbers = #tpu.dot_dimension_numbers<[1], [0], [0], [1], [0, 0, 1, 1], [], []>} : vector<21x32xbf16>, vector<32x32xbf16>, vector<21x32xf32> -> vector<21x32xf32>
    %245 = arith.addf %196, %244 : vector<21x32xf32>
    %cst_108 = arith.constant dense<0.000000e+00> : vector<21xf32>
    %246 = vector.multi_reduction <add>, %245, %cst_108 [1] : vector<21x32xf32> to vector<21xf32>
    %247 = vector.shape_cast %246 : vector<21xf32> to vector<21x1xf32>
    %cst_109 = arith.constant 3.200000e+01 : f32
    %248 = vector.broadcast %cst_109 : f32 to vector<21x1xf32>
    %249 = arith.divf %247, %248 : vector<21x1xf32>
    %250 = vector.broadcast %249 : vector<21x1xf32> to vector<21x32xf32>
    %251 = arith.subf %245, %250 : vector<21x32xf32>
    %252 = arith.mulf %251, %251 : vector<21x32xf32>
    %cst_110 = arith.constant dense<0.000000e+00> : vector<21xf32>
    %253 = vector.multi_reduction <add>, %252, %cst_110 [1] : vector<21x32xf32> to vector<21xf32>
    %254 = vector.shape_cast %253 : vector<21xf32> to vector<21x1xf32>
    %cst_111 = arith.constant 3.200000e+01 : f32
    %255 = vector.broadcast %cst_111 : f32 to vector<21x1xf32>
    %256 = arith.divf %254, %255 : vector<21x1xf32>
    %257 = vector.broadcast %249 : vector<21x1xf32> to vector<21x32xf32>
    %258 = arith.subf %245, %257 : vector<21x32xf32>
    %cst_112 = arith.constant 9.99999974E-6 : f32
    %259 = vector.broadcast %cst_112 : f32 to vector<21x1xf32>
    %260 = arith.addf %256, %259 : vector<21x1xf32>
    %261 = math.rsqrt %260 : vector<21x1xf32>
    %262 = vector.broadcast %261 : vector<21x1xf32> to vector<21x32xf32>
    %263 = arith.mulf %258, %262 : vector<21x32xf32>
    %264 = vector.broadcast %40 : vector<1x32xf32> to vector<21x32xf32>
    %265 = arith.mulf %263, %264 : vector<21x32xf32>
    %266 = vector.broadcast %41 : vector<1x32xf32> to vector<21x32xf32>
    %267 = arith.addf %265, %266 : vector<21x32xf32>
    %268 = arith.truncf %267 : vector<21x32xf32> to vector<21x32xbf16>
    %cst_113 = arith.constant dense<0.000000e+00> : vector<21x128xf32>
    %269 = tpu.matmul %268, %46, %cst_113 {dimension_numbers = #tpu.dot_dimension_numbers<[1], [0], [0], [1], [0, 0, 1, 1], [], []>} : vector<21x32xbf16>, vector<32x128xbf16>, vector<21x128xf32> -> vector<21x128xf32>
    %cst_114 = arith.constant 0.000000e+00 : f32
    %270 = vector.broadcast %cst_114 : f32 to vector<21x128xf32>
    %271 = arith.maximumf %269, %270 : vector<21x128xf32>
    %272 = arith.truncf %271 : vector<21x128xf32> to vector<21x128xbf16>
    %cst_115 = arith.constant dense<0.000000e+00> : vector<21x32xf32>
    %273 = tpu.matmul %272, %47, %cst_115 {dimension_numbers = #tpu.dot_dimension_numbers<[1], [0], [0], [1], [0, 0, 1, 1], [], []>} : vector<21x128xbf16>, vector<128x32xbf16>, vector<21x32xf32> -> vector<21x32xf32>
    %274 = arith.addf %245, %273 : vector<21x32xf32>
    %275 = tpu.concatenate %196, %274, %198, %48 in 1 : vector<21x32xf32>, vector<21x32xf32>, vector<21x3xf32>, vector<21x61xf32> -> vector<21x128xf32>
    %c1 = arith.constant 1 : index
    %c0_116 = arith.constant 0 : index
    %c0_117 = arith.constant 0 : index
    %276 = vector.load %arg31[%c1, %c0_116, %c0_117] : memref<2x21x128xf32, #tpu.memory_space<vmem>>, vector<1x21x128xf32>
    %277 = vector.shape_cast %276 : vector<1x21x128xf32> to vector<21x128xf32>
    %278 = vector.shape_cast %275 : vector<21x128xf32> to vector<1x21x128xf32>
    tpu.vector_store %arg31[%c1, %c0_116, %c0_117], %278 {strides = array<i32>} : memref<2x21x128xf32, #tpu.memory_space<vmem>>, vector<1x21x128xf32>,
    %279 = tpu.concatenate %274, %198 in 1 : vector<21x32xf32>, vector<21x3xf32> -> vector<21x35xf32>
    %280 = vector.extract_strided_slice %279 {offsets = [0, 0], sizes = [1, 35], strides = [1, 1]} : vector<21x35xf32> to vector<1x35xf32>
    %281 = vector.extract_strided_slice %279 {offsets = [1, 0], sizes = [1, 35], strides = [1, 1]} : vector<21x35xf32> to vector<1x35xf32>
    %282 = vector.extract_strided_slice %279 {offsets = [2, 0], sizes = [1, 35], strides = [1, 1]} : vector<21x35xf32> to vector<1x35xf32>
    %283 = vector.extract_strided_slice %279 {offsets = [3, 0], sizes = [1, 35], strides = [1, 1]} : vector<21x35xf32> to vector<1x35xf32>
    %284 = vector.extract_strided_slice %279 {offsets = [4, 0], sizes = [1, 35], strides = [1, 1]} : vector<21x35xf32> to vector<1x35xf32>
    %285 = vector.extract_strided_slice %279 {offsets = [5, 0], sizes = [1, 35], strides = [1, 1]} : vector<21x35xf32> to vector<1x35xf32>
    %286 = vector.extract_strided_slice %279 {offsets = [6, 0], sizes = [1, 35], strides = [1, 1]} : vector<21x35xf32> to vector<1x35xf32>
    %287 = vector.extract_strided_slice %279 {offsets = [7, 0], sizes = [1, 35], strides = [1, 1]} : vector<21x35xf32> to vector<1x35xf32>
    %288 = vector.extract_strided_slice %279 {offsets = [8, 0], sizes = [1, 35], strides = [1, 1]} : vector<21x35xf32> to vector<1x35xf32>
    %289 = vector.extract_strided_slice %279 {offsets = [9, 0], sizes = [1, 35], strides = [1, 1]} : vector<21x35xf32> to vector<1x35xf32>
    %290 = vector.extract_strided_slice %279 {offsets = [10, 0], sizes = [1, 35], strides = [1, 1]} : vector<21x35xf32> to vector<1x35xf32>
    %291 = vector.extract_strided_slice %279 {offsets = [11, 0], sizes = [1, 35], strides = [1, 1]} : vector<21x35xf32> to vector<1x35xf32>
    %292 = vector.extract_strided_slice %279 {offsets = [12, 0], sizes = [1, 35], strides = [1, 1]} : vector<21x35xf32> to vector<1x35xf32>
    %293 = vector.extract_strided_slice %279 {offsets = [13, 0], sizes = [1, 35], strides = [1, 1]} : vector<21x35xf32> to vector<1x35xf32>
    %294 = vector.extract_strided_slice %279 {offsets = [14, 0], sizes = [1, 35], strides = [1, 1]} : vector<21x35xf32> to vector<1x35xf32>
    %295 = vector.extract_strided_slice %279 {offsets = [15, 0], sizes = [1, 35], strides = [1, 1]} : vector<21x35xf32> to vector<1x35xf32>
    %296 = vector.extract_strided_slice %279 {offsets = [16, 0], sizes = [1, 35], strides = [1, 1]} : vector<21x35xf32> to vector<1x35xf32>
    %297 = vector.extract_strided_slice %279 {offsets = [17, 0], sizes = [1, 35], strides = [1, 1]} : vector<21x35xf32> to vector<1x35xf32>
    %298 = vector.extract_strided_slice %279 {offsets = [18, 0], sizes = [1, 35], strides = [1, 1]} : vector<21x35xf32> to vector<1x35xf32>
    %299 = vector.extract_strided_slice %279 {offsets = [19, 0], sizes = [1, 35], strides = [1, 1]} : vector<21x35xf32> to vector<1x35xf32>
    %300 = vector.extract_strided_slice %279 {offsets = [20, 0], sizes = [1, 35], strides = [1, 1]} : vector<21x35xf32> to vector<1x35xf32>
    %301 = tpu.concatenate %280, %281, %282, %283, %284, %285, %286, %287, %288, %289, %290, %291, %292, %293, %294, %295 in 1 : vector<1x35xf32>, vector<1x35xf32>, vector<1x35xf32>, vector<1x35xf32>, vector<1x35xf32>, vector<1x35xf32>, vector<1x35xf32>, vector<1x35xf32>, vector<1x35xf32>, vector<1x35xf32>, vector<1x35xf32>, vector<1x35xf32>, vector<1x35xf32>, vector<1x35xf32>, vector<1x35xf32>, vector<1x35xf32> -> vector<1x560xf32>
    %302 = tpu.concatenate %296, %297, %298, %299, %300 in 1 : vector<1x35xf32>, vector<1x35xf32>, vector<1x35xf32>, vector<1x35xf32>, vector<1x35xf32> -> vector<1x175xf32>
    %303 = tpu.concatenate %301, %302 in 1 : vector<1x560xf32>, vector<1x175xf32> -> vector<1x735xf32>
    %304 = vector.extract_strided_slice %24 {offsets = [64, 0], sizes = [64, 32], strides = [1, 1]} : vector<128x32xf32> to vector<64x32xf32>
    %cst_118 = arith.constant dense<0.000000e+00> : vector<32xf32>
    %305 = vector.multi_reduction <add>, %304, %cst_118 [0] : vector<64x32xf32> to vector<32xf32>
    %306 = vector.shape_cast %305 : vector<32xf32> to vector<1x32xf32>
    %cst_119 = arith.constant 6.400000e+01 : f32
    %307 = vector.broadcast %cst_119 : f32 to vector<1x32xf32>
    %308 = arith.divf %306, %307 : vector<1x32xf32>
    %309 = tpu.concatenate %173, %303 in 0 : vector<1x735xf32>, vector<1x735xf32> -> vector<2x735xf32>
    %310 = tpu.concatenate %178, %308 in 0 : vector<1x32xf32>, vector<1x32xf32> -> vector<2x32xf32>
    %311 = arith.truncf %310 : vector<2x32xf32> to vector<2x32xbf16>
    %c0_120 = arith.constant 0 : index
    %c0_121 = arith.constant 0 : index
    %312 = vector.load %arg24[%c0_120, %c0_121] : memref<32x128xbf16, #tpu.memory_space<vmem>>, vector<32x128xbf16>
    %cst_122 = arith.constant dense<0.000000e+00> : vector<2x128xf32>
    %313 = tpu.matmul %311, %312, %cst_122 {dimension_numbers = #tpu.dot_dimension_numbers<[1], [0], [0], [1], [0, 0, 1, 1], [], []>} : vector<2x32xbf16>, vector<32x128xbf16>, vector<2x128xf32> -> vector<2x128xf32>
    %314 = arith.truncf %309 : vector<2x735xf32> to vector<2x735xbf16>
    %c0_123 = arith.constant 0 : index
    %c0_124 = arith.constant 0 : index
    %315 = vector.load %arg25[%c0_123, %c0_124] : memref<735x128xbf16, #tpu.memory_space<vmem>>, vector<735x128xbf16>
    %cst_125 = arith.constant dense<0.000000e+00> : vector<2x128xf32>
    %316 = tpu.matmul %314, %315, %cst_125 {dimension_numbers = #tpu.dot_dimension_numbers<[1], [0], [0], [1], [0, 0, 1, 1], [], []>} : vector<2x735xbf16>, vector<735x128xbf16>, vector<2x128xf32> -> vector<2x128xf32>
    %317 = arith.addf %313, %316 : vector<2x128xf32>
    %c0_126 = arith.constant 0 : index
    %c0_127 = arith.constant 0 : index
    %318 = vector.load %arg26[%c0_126, %c0_127] : memref<1x128xf32, #tpu.memory_space<vmem>>, vector<1x128xf32>
    %319 = vector.broadcast %318 : vector<1x128xf32> to vector<2x128xf32>
    %320 = arith.addf %317, %319 : vector<2x128xf32>
    %321 = vector.extract_strided_slice %320 {offsets = [0, 0], sizes = [2, 58], strides = [1, 1]} : vector<2x128xf32> to vector<2x58xf32>
    %322 = arith.truncf %321 : vector<2x58xf32> to vector<2x58xbf16>
    %c0_128 = arith.constant 0 : index
    %c0_129 = arith.constant 0 : index
    %323 = vector.load %arg27[%c0_128, %c0_129] : memref<58x384xbf16, #tpu.memory_space<vmem>>, vector<58x384xbf16>
    %cst_130 = arith.constant dense<0.000000e+00> : vector<2x384xf32>
    %324 = tpu.matmul %322, %323, %cst_130 {dimension_numbers = #tpu.dot_dimension_numbers<[1], [0], [0], [1], [0, 0, 1, 1], [], []>} : vector<2x58xbf16>, vector<58x384xbf16>, vector<2x384xf32> -> vector<2x384xf32>
    %c0_131 = arith.constant 0 : index
    %c0_132 = arith.constant 0 : index
    %325 = vector.load %arg28[%c0_131, %c0_132] : memref<1x384xf32, #tpu.memory_space<vmem>>, vector<1x384xf32>
    %326 = vector.broadcast %325 : vector<1x384xf32> to vector<2x384xf32>
    %327 = arith.addf %324, %326 : vector<2x384xf32>
    %c0_133 = arith.constant 0 : index
    %c0_134 = arith.constant 0 : index
    %328 = vector.load %arg29[%c0_133, %c0_134] : memref<58x2688xbf16, #tpu.memory_space<vmem>>, vector<58x2688xbf16>
    %cst_135 = arith.constant dense<0.000000e+00> : vector<2x2688xf32>
    %329 = tpu.matmul %322, %328, %cst_135 {dimension_numbers = #tpu.dot_dimension_numbers<[1], [0], [0], [1], [0, 0, 1, 1], [], []>} : vector<2x58xbf16>, vector<58x2688xbf16>, vector<2x2688xf32> -> vector<2x2688xf32>
    %c0_136 = arith.constant 0 : index
    %c0_137 = arith.constant 0 : index
    %330 = vector.load %arg30[%c0_136, %c0_137] : memref<1x2688xf32, #tpu.memory_space<vmem>>, vector<1x2688xf32>
    %331 = vector.broadcast %330 : vector<1x2688xf32> to vector<2x2688xf32>
    %332 = arith.addf %329, %331 : vector<2x2688xf32>
    %333 = vector.extract_strided_slice %320 {offsets = [0, 58], sizes = [2, 1], strides = [1, 1]} : vector<2x128xf32> to vector<2x1xf32>
    %334 = vector.extract_strided_slice %320 {offsets = [0, 59], sizes = [2, 1], strides = [1, 1]} : vector<2x128xf32> to vector<2x1xf32>
    %335 = vector.extract_strided_slice %320 {offsets = [0, 60], sizes = [2, 1], strides = [1, 1]} : vector<2x128xf32> to vector<2x1xf32>
    %336 = arith.negf %335 : vector<2x1xf32>
    %337 = math.exp %336 : vector<2x1xf32>
    %cst_138 = arith.constant 1.000000e+00 : f32
    %338 = vector.broadcast %cst_138 : f32 to vector<2x1xf32>
    %339 = arith.addf %338, %337 : vector<2x1xf32>
    %340 = arith.divf %338, %339 : vector<2x1xf32>
    %cst_139 = arith.constant 117.1875 : f32
    %341 = vector.broadcast %cst_139 : f32 to vector<2x1xf32>
    %342 = arith.mulf %341, %340 : vector<2x1xf32>
    %343 = vector.extract_strided_slice %327 {offsets = [0, 0], sizes = [2, 128], strides = [1, 1]} : vector<2x384xf32> to vector<2x128xf32>
    %344 = vector.extract_strided_slice %327 {offsets = [0, 128], sizes = [2, 128], strides = [1, 1]} : vector<2x384xf32> to vector<2x128xf32>
    %345 = vector.extract_strided_slice %327 {offsets = [0, 256], sizes = [2, 128], strides = [1, 1]} : vector<2x384xf32> to vector<2x128xf32>
    %346 = vector.broadcast %342 : vector<2x1xf32> to vector<2x128xf32>
    %347 = arith.addf %345, %346 : vector<2x128xf32>
    %cst_140 = arith.constant 9.99999974E-5 : f32
    %348 = vector.broadcast %cst_140 : f32 to vector<2x128xf32>
    %349 = arith.addf %347, %348 : vector<2x128xf32>
    %cst_141 = arith.constant 1.000000e+00 : f32
    %350 = vector.broadcast %cst_141 : f32 to vector<2x128xf32>
    %351 = arith.divf %350, %349 : vector<2x128xf32>
    %352 = vector.broadcast %333 : vector<2x1xf32> to vector<2x128xf32>
    %353 = arith.addf %343, %352 : vector<2x128xf32>
    %354 = arith.mulf %353, %351 : vector<2x128xf32>
    %cst_142 = arith.constant 1.500000e+03 : f32
    %355 = vector.broadcast %cst_142 : f32 to vector<2x128xf32>
    %356 = arith.mulf %354, %355 : vector<2x128xf32>
    %cst_143 = arith.constant 1.600000e+01 : f32
    %357 = vector.broadcast %cst_143 : f32 to vector<2x128xf32>
    %358 = arith.addf %356, %357 : vector<2x128xf32>
    %cst_144 = arith.constant 3.125000e-02 : f32
    %359 = vector.broadcast %cst_144 : f32 to vector<2x128xf32>
    %360 = arith.mulf %358, %359 : vector<2x128xf32>
    %361 = vector.broadcast %334 : vector<2x1xf32> to vector<2x128xf32>
    %362 = arith.addf %344, %361 : vector<2x128xf32>
    %363 = arith.mulf %362, %351 : vector<2x128xf32>
    %cst_145 = arith.constant 1.500000e+03 : f32
    %364 = vector.broadcast %cst_145 : f32 to vector<2x128xf32>
    %365 = arith.mulf %363, %364 : vector<2x128xf32>
    %cst_146 = arith.constant 1.600000e+01 : f32
    %366 = vector.broadcast %cst_146 : f32 to vector<2x128xf32>
    %367 = arith.addf %365, %366 : vector<2x128xf32>
    %cst_147 = arith.constant 3.125000e-02 : f32
    %368 = vector.broadcast %cst_147 : f32 to vector<2x128xf32>
    %369 = arith.mulf %367, %368 : vector<2x128xf32>
    %370 = vector.extract_strided_slice %343 {offsets = [0, 0], sizes = [2, 1], strides = [1, 1]} : vector<2x128xf32> to vector<2x1xf32>
    %371 = vector.broadcast %370 : vector<2x1xf32> to vector<2x128xf32>
    %372 = arith.subf %343, %371 : vector<2x128xf32>
    %373 = vector.extract_strided_slice %344 {offsets = [0, 0], sizes = [2, 1], strides = [1, 1]} : vector<2x128xf32> to vector<2x1xf32>
    %374 = vector.broadcast %373 : vector<2x1xf32> to vector<2x128xf32>
    %375 = arith.subf %344, %374 : vector<2x128xf32>
    %376 = vector.extract_strided_slice %345 {offsets = [0, 0], sizes = [2, 1], strides = [1, 1]} : vector<2x128xf32> to vector<2x1xf32>
    %377 = vector.broadcast %376 : vector<2x1xf32> to vector<2x128xf32>
    %378 = arith.subf %345, %377 : vector<2x128xf32>
    %379 = tpu.concatenate %320, %360, %369, %372, %375, %378 in 1 : vector<2x128xf32>, vector<2x128xf32>, vector<2x128xf32>, vector<2x128xf32>, vector<2x128xf32>, vector<2x128xf32> -> vector<2x768xf32>
    %c0_148 = arith.constant 0 : index
    %c0_149 = arith.constant 0 : index
    %380 = vector.load %arg33[%c0_148, %c0_149] : memref<2x768xf32, #tpu.memory_space<vmem>>, vector<2x768xf32>
    tpu.vector_store %arg33[%c0_148, %c0_149], %379 {strides = array<i32>} : memref<2x768xf32, #tpu.memory_space<vmem>>, vector<2x768xf32>,
    %381 = vector.shape_cast %333 : vector<2x1xf32> to vector<2x1xf32>
    %382 = vector.broadcast %381 : vector<2x1xf32> to vector<2x896xf32>
    %383 = vector.shape_cast %334 : vector<2x1xf32> to vector<2x1xf32>
    %384 = vector.broadcast %383 : vector<2x1xf32> to vector<2x896xf32>
    %385 = vector.shape_cast %342 : vector<2x1xf32> to vector<2x1xf32>
    %386 = vector.broadcast %385 : vector<2x1xf32> to vector<2x896xf32>
    %387 = tpu.concatenate %382, %384, %386 in 1 : vector<2x896xf32>, vector<2x896xf32>, vector<2x896xf32> -> vector<2x2688xf32>
    %388 = arith.addf %332, %387 : vector<2x2688xf32>
    %c0_150 = arith.constant 0 : index
    %c0_151 = arith.constant 0 : index
    %389 = vector.load %arg34[%c0_150, %c0_151] : memref<2x2688xf32, #tpu.memory_space<vmem>>, vector<2x2688xf32>
    tpu.vector_store %arg34[%c0_150, %c0_151], %388 {strides = array<i32>} : memref<2x2688xf32, #tpu.memory_space<vmem>>, vector<2x2688xf32>,
    return
  }
}

</mosaic_0001>

<bundles_post_ra>
// kernel: forward.1
= control target key start
LH: loop header
LB: loop body
LE: loop exit
PB: predicated region body
PF: predicated region fallthrough
CT: control target
= control target key end

     0   :  { %s8079_s6 = smov 1   ;;  %s8080_s10 = smov 2   ;;  %s10212_s0 = inlined_call_operand.smem [shape: u32[35], index: -1, kind: input, shape index: {}] }
   0x1   :  { %s8151_s5 = sld [smem:[%s10212_s0]]   ;;  %s8081_s14 = smov 3  }
   0x2   :  { %s8156_s9 = sld [smem:[%s10212_s0 + %s8079_s6]]   ;;  %s8082_s18 = smov 4  }
   0x3   :  { %s8161_s13 = sld [smem:[%s10212_s0 + %s8080_s10]]   ;;  %s8083_s22 = smov 5  }
   0x4   :  { %s8166_s17 = sld [smem:[%s10212_s0 + %s8081_s14]]   ;;  %s8084_s26 = smov 6  }
   0x5   :  { %s8171_s21 = sld [smem:[%s10212_s0 + %s8082_s18]]   ;;  %s8085_s30 = smov 7  }
   0x6   :  { %s8176_s25 = sld [smem:[%s10212_s0 + %s8083_s22]]   ;;  %s8086_s4 = smov 8  }
   0x7   :  { %s8181_s29 = sld [smem:[%s10212_s0 + %s8084_s26]]   ;;  %s8087_s10 = smov 9  }
   0x8   :  { %s8186_s3 = sld [smem:[%s10212_s0 + %s8085_s30]]   ;;  %s8088_s15 = smov 10  }
   0x9   :  { %s8191_s8 = sld [smem:[%s10212_s0 + %s8086_s4]]   ;;  %s8089_s20 = smov 11  }
   0xa   :  { %s8196_s14 = sld [smem:[%s10212_s0 + %s8087_s10]]   ;;  %s8090_s26 = smov 12  }
   0xb   :  { %s8201_s19 = sld [smem:[%s10212_s0 + %s8088_s15]]   ;;  %s8091_s1 = smov 13  }
   0xc   :  { %s8206_s24 = sld [smem:[%s10212_s0 + %s8089_s20]]   ;;  %s8092_s7 = smov 14  }
   0xd   :  { %s8211_s30 = sld [smem:[%s10212_s0 + %s8090_s26]]   ;;  %s8093_s15 = smov 15  }
   0xe   :  { %s8216_s6 = sld [smem:[%s10212_s0 + %s8091_s1]]   ;;  %s8094_s22 = smov 16  }
   0xf   :  { %s8221_s12 = sld [smem:[%s10212_s0 + %s8092_s7]]   ;;  %s8095_s28 = smov 17  }
  0x10   :  { %s8226_s20 = sld [smem:[%s10212_s0 + %s8093_s15]]   ;;  %s8096_s7 = smov 18  }
  0x11   :  { %s8231_s27 = sld [smem:[%s10212_s0 + %s8094_s22]]   ;;  %s8097_s15 = smov 19  }
  0x12   :  { %s8236_s4 = sld [smem:[%s10212_s0 + %s8095_s28]]   ;;  %s8098_s22 = smov 20  }
  0x13   :  { %s8099_s28 = smov 21  }
  0x15   :  { %10269 = sst [smem:[#allocation5_spill]] %s8221_s12 }
  0x16   :  { %10270 = sst [smem:[#allocation6_spill]] %s8226_s20 }
  0x17   :  { %10271 = sst [smem:[#allocation7_spill]] %s8231_s27 }
  0x18   :  { %10272 = sst [smem:[#allocation8_spill]] %s8236_s4 }
  0x19   :  { %s8241_s12 = sld [smem:[%s10212_s0 + %s8096_s7]]   ;;  %s8100_s7 = smov 22  }
  0x1a   :  { %s8246_s20 = sld [smem:[%s10212_s0 + %s8097_s15]]   ;;  %s8101_s15 = smov 23  }
  0x1b   :  { %s8251_s27 = sld [smem:[%s10212_s0 + %s8098_s22]]   ;;  %s8102_s22 = smov 24  }
  0x1c   :  { %s8256_s4 = sld [smem:[%s10212_s0 + %s8099_s28]]   ;;  %s8103_s28 = smov 25  }
  0x1f   :  { %10273 = sst [smem:[#allocation9_spill]] %s8241_s12 }
  0x20   :  { %10274 = sst [smem:[#allocation10_spill]] %s8246_s20 }
  0x21   :  { %10275 = sst [smem:[#allocation11_spill]] %s8251_s27 }
  0x22   :  { %10276 = sst [smem:[#allocation12_spill]] %s8256_s4 }
  0x23   :  { %s8261_s12 = sld [smem:[%s10212_s0 + %s8100_s7]]   ;;  %s8104_s7 = smov 26  }
  0x24   :  { %s8266_s20 = sld [smem:[%s10212_s0 + %s8101_s15]]   ;;  %s8105_s15 = smov 27  }
  0x25   :  { %s8271_s27 = sld [smem:[%s10212_s0 + %s8102_s22]]   ;;  %s8106_s22 = smov 28  }
  0x26   :  { %s8276_s4 = sld [smem:[%s10212_s0 + %s8103_s28]]   ;;  %s8107_s28 = smov 29  }
  0x29   :  { %10277 = sst [smem:[#allocation13_spill]] %s8261_s12 }
  0x2a   :  { %10278 = sst [smem:[#allocation14_spill]] %s8266_s20 }
  0x2b   :  { %10279 = sst [smem:[#allocation15_spill]] %s8271_s27 }
  0x2c   :  { %10280 = sst [smem:[#allocation16_spill]] %s8276_s4 }
  0x2d   :  { %s8281_s12 = sld [smem:[%s10212_s0 + %s8104_s7]]   ;;  %s8108_s7 = smov 30  }
  0x2e   :  { %s8286_s20 = sld [smem:[%s10212_s0 + %s8105_s15]]   ;;  %s8109_s15 = smov 31  }
  0x2f   :  { %s8291_s27 = sld [smem:[%s10212_s0 + %s8106_s22]]   ;;  %s8110_s22 = smov 32  }
  0x30   :  { %s8296_s4 = sld [smem:[%s10212_s0 + %s8107_s28]]   ;;  %s8111_s28 = smov 33  }
  0x33   :  { %10281 = sst [smem:[#allocation17_spill]] %s8281_s12 }
  0x34   :  { %10282 = sst [smem:[#allocation18_spill]] %s8286_s20 }
  0x35   :  { %10283 = sst [smem:[#allocation19_spill]] %s8291_s27 }
  0x36   :  { %10284 = sst [smem:[#allocation20_spill]] %s8296_s4 }
  0x37   :  { %s8301_s12 = sld [smem:[%s10212_s0 + %s8108_s7]]   ;;  %s8112_s7 = smov 34  }
  0x38   :  { %s8306_s20 = sld [smem:[%s10212_s0 + %s8109_s15]]  }
  0x39   :  { %s8311_s27 = sld [smem:[%s10212_s0 + %s8110_s22]]  }
  0x3a   :  { %s8316_s4 = sld [smem:[%s10212_s0 + %s8111_s28]]  }
  0x3d   :  { %10285 = sst [smem:[#allocation21_spill]] %s8301_s12 }
  0x3e   :  { %s8321_s12 = sld [smem:[%s10212_s0 + %s8112_s7]]  }
  0x3f   :  { %v7708_v0 = vld [vmem:[%s8166_s17] sm:$0x3f]   ;;  %vm474_vm0 = vcmask 1045504   ;;  %vm377_vm1 = vcmask 97280   ;;  %v7711_v4 = vld [vmem:[%s8151_s5 + $0x8] sm:$0xff]   ;;  %v7713_v6 = vld [vmem:[%s8176_s25 + $0x10] sm:$0xff]  }
  0x40   :  { %v7709_v1 = vld [vmem:[%s8176_s25] sm:$0xff]   ;;  %7506 = vmatprep.subr.msk.bf16.mxu0 %vm474_vm0, %v7708_v0  ;;  %v476_v2 = vsel %vm474_vm0, %v7708_v0, 0  ;;  %v7712_v5 = vld [vmem:[%s8176_s25 + $0x8] sm:$0xff]   ;;  %v7714_v7 = vld [vmem:[%s8151_s5 + $0x10] sm:$0xff]   ;;  %vm950_vm2 = vcmask 392192  }
  0x41   :  { %v7710_v3 = vld [vmem:[%s8151_s5] sm:$0xff]   ;;  %7082 = vmatprep.subr.bf16.mxu1 %v7709_v1  ;;  %7017 = vmatpush3.bf16.msra.mxu0 %v476_v2  ;;  %v7716_v9 = vld [vmem:[%s8151_s5 + $0x18] sm:$0xff]   ;;  %v7717_v10 = vld [vmem:[%s8156_s9 + $0x8] sm:$0xff]  }
  0x42   :  { %7083 = vmatpush3.bf16.msra.mxu1 %v7709_v1  ;;  %7018 = vmatprep.mubr.msk.bf16.mxu0 %vm377_vm1, %v7710_v3  ;;  %v7715_v8 = vld [vmem:[%s8156_s9] sm:$0xff]   ;;  %v7719_v12 = vld [vmem:[%s8156_s9 + $0x10] sm:$0xff]   ;;  %v7720_v13 = vld [vmem:[%s8151_s5 + $0x28] sm:$0xff]  }
  0x43   :  { %7084 = vmatprep.subr.bf16.mxu1 %v7712_v5  ;;  %7088 = vmatprep.mubr.msk.bf16.mxu1 %vm950_vm2, %v7715_v8  ;;  %v7718_v11 = vld [vmem:[%s8151_s5 + $0x20] sm:$0xff]   ;;  %v7721_v14 = vld [vmem:[%s8156_s9 + $0x18] sm:$0xff]   ;;  %v7722_v15 = vld [vmem:[%s8151_s5 + $0x30] sm:$0xff]  }
  0x44   :  { %7019 = vmatmul.mubr.msk.bf16.vlgmr.msra.gmra.mrb[0].mxu0 %vm377_vm1, %v7711_v4  ;;  %v7723_v16 = vld [vmem:[%s8156_s9 + $0x20] sm:$0xff]   ;;  %v7724_v17 = vld [vmem:[%s8151_s5 + $0x38] sm:$0xff]   ;;  %v7725_v18 = vld [vmem:[%s8156_s9 + $0x28] sm:$0xff]  }
  0x45   :  { %7022 = vmatprep.mubr.msk.bf16.mxu0 %vm377_vm1, %v7714_v7  ;;  %v7726_v19 = vld [vmem:[%s8151_s5 + $0x40] sm:$0xff]   ;;  %v7727_v20 = vld [vmem:[%s8156_s9 + $0x30] sm:$0xff]   ;;  %v7728_v21 = vld [vmem:[%s8151_s5 + $0x48] sm:$0xff]  }
  0x46   :  { %7085 = vmatpush3.bf16.msra.mxu1 %v7712_v5  ;;  %v7729_v22 = vld [vmem:[%s8156_s9 + $0x38] sm:$0xff]   ;;  %v7730_v23 = vld [vmem:[%s8151_s5 + $0x50] sm:$0xff]   ;;  %v7732_v25 = vld [vmem:[%s8151_s5 + $0x60] sm:$0xff]  }
  0x47   :  { %7086 = vmatprep.subr.bf16.mxu1 %v7713_v6  ;;  %v7731_v24 = vld [vmem:[%s8151_s5 + $0x58] sm:$0xff]   ;;  %v7733_v26 = vld [vmem:[%s8151_s5 + $0x68] sm:$0xff]   ;;  %v7734_v27 = vld [vmem:[%s8151_s5 + $0x70] sm:$0xff]  }
  0x48   :  { %v7735_v28 = vld [vmem:[%s8151_s5 + $0x78] sm:$0xff]   ;;  %v7736_v29 = vld [vmem:[%s8151_s5 + $0x80] sm:$0xff]   ;;  %v7737_v30 = vld [vmem:[%s8151_s5 + $0x88] sm:$0xff]  }
  0x49   :  { %v7738_v31 = vld [vmem:[%s8151_s5 + $0x90] sm:$0xff]   ;;  %v7739_v32 = vld [vmem:[%s8151_s5 + $0x98] sm:$0xff]   ;;  %v7740_v33 = vld [vmem:[%s8151_s5 + $0xa0] sm:$0xff]  }
  0x4a   :  { %7087 = vmatpush3.bf16.msra.mxu1 %v7713_v6  ;;  %v7741_v34 = vld [vmem:[%s8151_s5 + $0xa8] sm:$0xff]   ;;  %v7742_v35 = vld [vmem:[%s8151_s5 + $0xb0] sm:$0xff]   ;;  %v7743_v36 = vld [vmem:[%s8151_s5 + $0xb8] sm:$0xff]  }
  0x4b   :  { %v7744_v37 = vld [vmem:[%s8151_s5 + $0xc0] sm:$0xff]   ;;  %v7753_v39 = vld [vmem:[%s8186_s3 + $0x8] sm:$0xff]   ;;  %v7746_v41 = vld [vmem:[%s8151_s5 + $0xd0] sm:$0xff]  }
  0x4c   :  { %7023 = vmatmul.mubr.msk.bf16.gmra.mrb[4].mxu0 %vm377_vm1, %v7716_v9  ;;  %v7752_v38 = vld [vmem:[%s8186_s3] sm:$0xff]   ;;  %v7745_v40 = vld [vmem:[%s8151_s5 + $0xc8] sm:$0xff]   ;;  %v7754_v42 = vld [vmem:[%s8186_s3 + $0x10] sm:$0xff]  }
  0x4d   :  { %7089 = vmatmul.mubr.msk.bf16.vlgmr.msra.gmra.mrb[0].mxu1 %vm950_vm2, %v7717_v10  ;;  %7026 = vmatprep.mubr.msk.bf16.mxu0 %vm377_vm1, %v7718_v11  ;;  %v7755_v43 = vld [vmem:[%s8186_s3 + $0x18] sm:$0xff]   ;;  %v7748_v45 = vld [vmem:[%s8151_s5 + $0xe0] sm:$0xff]   ;;  %v7749_v46 = vld [vmem:[%s8151_s5 + $0xe8] sm:$0xff]  }
  0x4e   :  { %7092 = vmatprep.mubr.msk.bf16.mxu1 %vm950_vm2, %v7719_v12  ;;  %7104 = vmatprep.subr.bf16.mxu1 %v7752_v38  ;;  %v7747_v44 = vld [vmem:[%s8151_s5 + $0xd8] sm:$0xff]   ;;  %v7750_v47 = vld [vmem:[%s8151_s5 + $0xf0] sm:$0xff]  }
  0x4f   :  { %7105 = vmatpush3.bf16.msra.mxu1 %v7752_v38  ;;  %v7751_v48 = vld [vmem:[%s8151_s5 + $0xf8] sm:$0xff]  }
  0x50   :  { %7106 = vmatprep.subr.bf16.mxu1 %v7753_v39 }
  0x53   :  { %7107 = vmatpush3.bf16.msra.mxu1 %v7753_v39 }
  0x54   :  { %7027 = vmatmul.mubr.msk.bf16.gmra.mrb[8].mxu0 %vm377_vm1, %v7720_v13  ;;  %7108 = vmatprep.subr.bf16.mxu1 %v7754_v42 }
  0x55   :  { %7093 = vmatmul.mubr.msk.bf16.gmra.mrb[4].mxu1 %vm950_vm2, %v7721_v14  ;;  %7030 = vmatprep.mubr.msk.bf16.mxu0 %vm377_vm1, %v7722_v15 }
  0x56   :  { %7096 = vmatprep.mubr.msk.bf16.mxu1 %vm950_vm2, %v7723_v16 }
  0x57   :  { %7109 = vmatpush3.bf16.msra.mxu1 %v7754_v42 }
  0x58   :  { %7110 = vmatprep.subr.bf16.mxu1 %v7755_v43 }
  0x5b   :  { %7111 = vmatpush3.bf16.msra.mxu1 %v7755_v43 }
  0x5c   :  { %7031 = vmatmul.mubr.msk.bf16.gmra.mrb[12].mxu0 %vm377_vm1, %v7724_v17 }
  0x5d   :  { %7097 = vmatmul.mubr.msk.bf16.gmra.mrb[8].mxu1 %vm950_vm2, %v7725_v18  ;;  %7034 = vmatprep.mubr.msk.bf16.mxu0 %vm377_vm1, %v7726_v19 }
  0x5e   :  { %7100 = vmatprep.mubr.msk.bf16.mxu1 %vm950_vm2, %v7727_v20 }
  0x64   :  { %7035 = vmatmul.mubr.msk.bf16.gmra.mrb[16].mxu0 %vm377_vm1, %v7728_v21 }
  0x65   :  { %7101 = vmatmul.mubr.msk.bf16.gmra.mrb[12].mxu1 %vm950_vm2, %v7729_v22  ;;  %7038 = vmatprep.mubr.msk.bf16.mxu0 %vm377_vm1, %v7730_v23 }
  0x6c   :  { %7039 = vmatmul.mubr.msk.bf16.gmra.mrb[20].mxu0 %vm377_vm1, %v7731_v24 }
  0x6d   :  { %7042 = vmatprep.mubr.msk.bf16.mxu0 %vm377_vm1, %v7732_v25 }
  0x74   :  { %7043 = vmatmul.mubr.msk.bf16.gmra.mrb[24].mxu0 %vm377_vm1, %v7733_v26 }
  0x75   :  { %7046 = vmatprep.mubr.msk.bf16.mxu0 %vm377_vm1, %v7734_v27 }
  0x7c   :  { %7047 = vmatmul.mubr.msk.bf16.gmra.mrb[28].mxu0 %vm377_vm1, %v7735_v28 }
  0x7d   :  { %7050 = vmatprep.mubr.msk.bf16.mxu0 %vm377_vm1, %v7736_v29 }
  0x84   :  { %7051 = vmatmul.mubr.msk.bf16.gmra.mrb[32].mxu0 %vm377_vm1, %v7737_v30 }
  0x85   :  { %7054 = vmatprep.mubr.msk.bf16.mxu0 %vm377_vm1, %v7738_v31 }
  0x8c   :  { %7055 = vmatmul.mubr.msk.bf16.gmra.mrb[36].mxu0 %vm377_vm1, %v7739_v32 }
  0x8d   :  { %7058 = vmatprep.mubr.msk.bf16.mxu0 %vm377_vm1, %v7740_v33 }
  0x94   :  { %7059 = vmatmul.mubr.msk.bf16.gmra.mrb[40].mxu0 %vm377_vm1, %v7741_v34 }
  0x95   :  { %7062 = vmatprep.mubr.msk.bf16.mxu0 %vm377_vm1, %v7742_v35 }
  0x9c   :  { %7063 = vmatmul.mubr.msk.bf16.gmra.mrb[44].mxu0 %vm377_vm1, %v7743_v36 }
  0x9d   :  { %7066 = vmatprep.mubr.msk.bf16.mxu0 %vm377_vm1, %v7744_v37 }
  0xa4   :  { %7067 = vmatmul.mubr.msk.bf16.gmra.mrb[48].mxu0 %vm377_vm1, %v7745_v40 }
  0xa5   :  { %7070 = vmatprep.mubr.msk.bf16.mxu0 %vm377_vm1, %v7746_v41 }
  0xac   :  { %7071 = vmatmul.mubr.msk.bf16.gmra.mrb[52].mxu0 %vm377_vm1, %v7747_v44 }
  0xad   :  { %7074 = vmatprep.mubr.msk.bf16.mxu0 %vm377_vm1, %v7748_v45 }
  0xb4   :  { %7075 = vmatmul.mubr.msk.bf16.gmra.mrb[56].mxu0 %vm377_vm1, %v7749_v46 }
  0xb5   :  { %7078 = vmatprep.mubr.msk.bf16.mxu0 %vm377_vm1, %v7750_v47 }
  0xbc   :  { %7079 = vmatmul.mubr.msk.bf16.gmra.mrb[60].mxu0 %vm377_vm1, %v7751_v48 }
  0xbd   :  { %75 = vsyncpa [#allocation3], 0  ;;  %v8412_v49 = vld [vmem:[%s8196_s14] sm:$0xff]   ;;  %vm1305_vm3 = vcmask 130048   ;;  %vm1135_vm4 = vcmask 523264   ;;  %vm1273_vm5 = vcmask 261120  }
  0xbe   :  { %7128 = vmatprep.subr.bf16.mxu1 %v8412_v49  ;;  %v8416_v50 = vld [vmem:[%s8206_s24] sm:$0xff]   ;;  %vm1907_vm6 = vcmask 1044480   ;;  %vm4044_vm7 = vcmask 1040384   ;;  %vm2145_vm8 = vcmask 258048   ;;  %s10313_s0 = sld [smem:[#allocation5_spill]]  ;;  %s10314_s5 = sld [smem:[#allocation6_spill]] }
  0xbf   :  { %6695 = vmatprep.mubr.msk.bf16.mxu0 %vm1305_vm3, %v8416_v50  ;;  %v8421_v51 = vld [vmem:[%s8171_s21] ss:$0 sm:$0xff]  ;;  %s10315_s9 = sld [smem:[#allocation11_spill]]  ;;  %s10317_s17 = sld [smem:[#allocation7_spill]]  ;;  %vm2498_vm9 = vcmask 1041408   ;;  %vm2499_vm10 = vcmask 1042432  }
  0xc0   :  { %v8430_v1 = vld [vmem:[%s8181_s29] ss:$0 sm:$0xff]  ;;  %s10321_s21 = sld [smem:[#allocation9_spill]]  ;;  %vm2453_vm11 = vcmask 171008   ;;  %vm2460_vm12 = vcmask 167936   ;;  %s10326_s25 = sld [smem:[#allocation8_spill]] }
  0xc1   :  { %s10330_s29 = sld [smem:[#allocation10_spill]]  ;;  %s10333_s3 = sld [smem:[#allocation13_spill]]  ;;  %vm2135_vm13 = vcmask 15360   ;;  %vm2963_vm14 = vcmask 285696   ;;  %vm2965_vm15 = vcmask 572416   ;;  %vm2967_vm0 = vcmask 859136  }
  0xc2   :  { %s8115_s14 = smov 98   ;;  %s8119_s15 = smov 70  }
  0xc3   :  { %s8120_s16 = smov 35   ;;  %s8121_s18 = smov 47  }
  0xc4   :  { %s8122_s22 = smov 82   ;;  %s8123_s23 = smov 117  }
  0xc5   :  { %s8124_s26 = smov 24   ;;  %s8125_s28 = smov 94  }
  0xc6   :  { %s8126_s1 = smov 1   ;;  %s8127_s2 = smov 36  }
  0xc7   :  { %s8128_s7 = smov 59   ;;  %s8129_s10 = smov 71  }
  0xc8   :  { %s8131_s11 = smov 13  }
 0x117   :  { %v7020_v52 = vpop.f32.mrb[0].mxu0 }
 0x118   :  { %v521_v53 = vadd.f32 %v7020_v52, %v8421_v51  ;;  %v512_v54 = vpop.f32.mrb[1].mxu0 }
 0x119   :  { %v513_v55 = vadd.f32 %v8421_v51, %v512_v54  ;;  %v7021_v56 = vpop.f32.mrb[2].mxu0 }
 0x11a   :  { %v524_v57 = vadd.f32 %v7021_v56, %v8421_v51  ;;  %v515_v58 = vpop.f32.mrb[3].mxu0  ;;  %v769_v60 = vmax.f32 %v521_v53, 0.0 }
 0x11b   :  { %v516_v59 = vadd.f32 %v8421_v51, %v515_v58  ;;  %v767_v62 = vmax.f32 %v513_v55, 0.0 }
 0x11c   :  { %v770_v61 = vmax.f32 %v524_v57, 0.0 }
 0x11d   :  { %v768_v63 = vmax.f32 %v516_v59, 0.0 }
 0x11e   :  { %v8427_v0 = vpack.c.bf16 %v770_v61, %v769_v60 }
 0x11f   :  { %v8432_v2 = vpack.c.bf16 %v768_v63, %v767_v62  ;;  %v7024_v3 = vpop.f32.mrb[4].mxu0 }
 0x120   :  { %v537_v4 = vadd.f32 %v7024_v3, %v8421_v51  ;;  %v7090_v5 = vpop.f32.mrb[0].mxu1  ;;  %v528_v6 = vpop.f32.mrb[5].mxu0 }
 0x121   :  { %v1018_v7 = vadd.f32 %v7090_v5, %v8430_v1  ;;  %v529_v8 = vadd.f32 %v8421_v51, %v528_v6  ;;  %v1009_v9 = vpop.f32.mrb[1].mxu1  ;;  %v7025_v10 = vpop.f32.mrb[6].mxu0 }
 0x122   :  { %v1010_v11 = vadd.f32 %v8430_v1, %v1009_v9  ;;  %v540_v12 = vadd.f32 %v7025_v10, %v8421_v51  ;;  %v7091_v13 = vpop.f32.mrb[2].mxu1  ;;  %v531_v14 = vpop.f32.mrb[7].mxu0  ;;  %v773_v19 = vmax.f32 %v537_v4, 0.0 }
 0x123   :  { %v1074_v15 = vmax.f32 %v1018_v7, 0.0  ;;  %v1021_v16 = vadd.f32 %v7091_v13, %v8430_v1  ;;  %v532_v17 = vadd.f32 %v8421_v51, %v531_v14  ;;  %v1012_v18 = vpop.f32.mrb[3].mxu1  ;;  %v771_v23 = vmax.f32 %v529_v8, 0.0 }
 0x124   :  { %v1072_v20 = vmax.f32 %v1010_v11, 0.0  ;;  %v774_v21 = vmax.f32 %v540_v12, 0.0  ;;  %v1013_v22 = vadd.f32 %v8430_v1, %v1012_v18 }
 0x125   :  { %v1075_v24 = vmax.f32 %v1021_v16, 0.0  ;;  %v772_v25 = vmax.f32 %v532_v17, 0.0 }
 0x126   :  { %v8442_v26 = vpack.c.bf16 %v774_v21, %v773_v19  ;;  %v1073_v27 = vmax.f32 %v1013_v22, 0.0 }
 0x127   :  { %v1089_v28 = vpack.c.bf16 %v1075_v24, %v1074_v15  ;;  %v8444_v29 = vpack.c.bf16 %v772_v25, %v771_v23  ;;  %v7028_v30 = vpop.f32.mrb[8].mxu0 }
 0x128   :  { %v1088_v31 = vpack.c.bf16 %v1073_v27, %v1072_v20  ;;  %v553_v32 = vadd.f32 %v7028_v30, %v8421_v51  ;;  %v7094_v33 = vpop.f32.mrb[4].mxu1  ;;  %v544_v34 = vpop.f32.mrb[9].mxu0 }
 0x129   :  { %v1034_v35 = vadd.f32 %v7094_v33, %v8430_v1  ;;  %v545_v36 = vadd.f32 %v8421_v51, %v544_v34  ;;  %v1025_v37 = vpop.f32.mrb[5].mxu1  ;;  %v7029_v38 = vpop.f32.mrb[10].mxu0 }
 0x12a   :  { %v1026_v39 = vadd.f32 %v8430_v1, %v1025_v37  ;;  %v556_v40 = vadd.f32 %v7029_v38, %v8421_v51  ;;  %v7095_v41 = vpop.f32.mrb[6].mxu1  ;;  %7112 = vmatprep.mubr.msk.bf16.mxu1 %vm1135_vm4, %v1088_v31  ;;  %v547_v42 = vpop.f32.mrb[11].mxu0  ;;  %v777_v47 = vmax.f32 %v553_v32, 0.0 }
 0x12b   :  { %v1078_v43 = vmax.f32 %v1034_v35, 0.0  ;;  %v1037_v44 = vadd.f32 %v7095_v41, %v8430_v1  ;;  %v548_v45 = vadd.f32 %v8421_v51, %v547_v42  ;;  %v1028_v46 = vpop.f32.mrb[7].mxu1  ;;  %7113 = vmatmul.mubr.msk.bf16.vlgmr.msra.gmra.mrb[16].mxu1 %vm1135_vm4, %v1089_v28  ;;  %v775_v54 = vmax.f32 %v545_v36, 0.0 }
 0x12c   :  { %v1076_v48 = vmax.f32 %v1026_v39, 0.0  ;;  %v778_v52 = vmax.f32 %v556_v40, 0.0  ;;  %v1029_v53 = vadd.f32 %v8430_v1, %v1028_v46  ;;  %7129 = vmatpush3.bf16.msra.mxu1 %v8412_v49 }
 0x12d   :  { %v1079_v55 = vmax.f32 %v1037_v44, 0.0  ;;  %v776_v56 = vmax.f32 %v548_v45, 0.0 }
 0x12e   :  { %v8457_v57 = vpack.c.bf16 %v778_v52, %v777_v47  ;;  %v1077_v58 = vmax.f32 %v1029_v53, 0.0 }
 0x12f   :  { %v1091_v59 = vpack.c.bf16 %v1079_v55, %v1078_v43  ;;  %v8459_v60 = vpack.c.bf16 %v776_v56, %v775_v54  ;;  %v7032_v61 = vpop.f32.mrb[12].mxu0 }
 0x130   :  { %v1090_v62 = vpack.c.bf16 %v1077_v58, %v1076_v48  ;;  %v569_v63 = vadd.f32 %v7032_v61, %v8421_v51  ;;  %v7098_v3 = vpop.f32.mrb[8].mxu1  ;;  %v560_v4 = vpop.f32.mrb[13].mxu0 }
 0x131   :  { %v1050_v5 = vadd.f32 %v7098_v3, %v8430_v1  ;;  %v561_v6 = vadd.f32 %v8421_v51, %v560_v4  ;;  %v1041_v49 = vpop.f32.mrb[9].mxu1  ;;  %v7033_v7 = vpop.f32.mrb[14].mxu0 }
 0x132   :  { %v1042_v8 = vadd.f32 %v8430_v1, %v1041_v49  ;;  %v572_v9 = vadd.f32 %v7033_v7, %v8421_v51  ;;  %v7099_v10 = vpop.f32.mrb[10].mxu1  ;;  %7116 = vmatprep.mubr.msk.bf16.mxu1 %vm1135_vm4, %v1090_v62  ;;  %v563_v11 = vpop.f32.mrb[15].mxu0  ;;  %v781_v16 = vmax.f32 %v569_v63, 0.0 }
 0x133   :  { %v1082_v12 = vmax.f32 %v1050_v5, 0.0  ;;  %v1053_v13 = vadd.f32 %v7099_v10, %v8430_v1  ;;  %v564_v14 = vadd.f32 %v8421_v51, %v563_v11  ;;  %v1044_v15 = vpop.f32.mrb[11].mxu1  ;;  %7117 = vmatmul.mubr.msk.bf16.gmra.mrb[20].mxu1 %vm1135_vm4, %v1091_v59  ;;  %v779_v20 = vmax.f32 %v561_v6, 0.0 }
 0x134   :  { %v1080_v17 = vmax.f32 %v1042_v8, 0.0  ;;  %v782_v18 = vmax.f32 %v572_v9, 0.0  ;;  %v1045_v19 = vadd.f32 %v8430_v1, %v1044_v15 }
 0x135   :  { %v1083_v21 = vmax.f32 %v1053_v13, 0.0  ;;  %v780_v22 = vmax.f32 %v564_v14, 0.0 }
 0x136   :  { %v8471_v23 = vpack.c.bf16 %v782_v18, %v781_v16  ;;  %v1081_v24 = vmax.f32 %v1045_v19, 0.0  ;;  %v1310_v18 = vsel %vm1305_vm3, %v8427_v0, 0 }
 0x137   :  { %v1093_v25 = vpack.c.bf16 %v1083_v21, %v1082_v12  ;;  %v8473_v27 = vpack.c.bf16 %v780_v22, %v779_v20  ;;  %v7036_v28 = vpop.f32.mrb[16].mxu0  ;;  %v1694_v21 = vld [vmem:[%s8211_s30] sm:$0xff] }
 0x138   :  { %v1092_v30 = vpack.c.bf16 %v1081_v24, %v1080_v17  ;;  %v585_v31 = vadd.f32 %v7036_v28, %v8421_v51  ;;  %v7102_v32 = vpop.f32.mrb[12].mxu1  ;;  %v576_v33 = vpop.f32.mrb[17].mxu0 }
 0x139   :  { %v1066_v34 = vadd.f32 %v7102_v32, %v8430_v1  ;;  %v577_v35 = vadd.f32 %v8421_v51, %v576_v33  ;;  %v1057_v36 = vpop.f32.mrb[13].mxu1  ;;  %v7037_v37 = vpop.f32.mrb[18].mxu0 }
 0x13a   :  { %v1058_v38 = vadd.f32 %v8430_v1, %v1057_v36  ;;  %v588_v39 = vadd.f32 %v7037_v37, %v8421_v51  ;;  %v7103_v40 = vpop.f32.mrb[14].mxu1  ;;  %7120 = vmatprep.mubr.msk.bf16.mxu1 %vm1135_vm4, %v1092_v30  ;;  %v579_v41 = vpop.f32.mrb[19].mxu0  ;;  %v785_v46 = vmax.f32 %v585_v31, 0.0  ;;  %v1696_v31 = vld [vmem:[%s8211_s30 + $0x10] sm:$0x1f] }
 0x13b   :  { %v1086_v42 = vmax.f32 %v1066_v34, 0.0  ;;  %v1069_v43 = vadd.f32 %v7103_v40, %v8430_v1  ;;  %v580_v44 = vadd.f32 %v8421_v51, %v579_v41  ;;  %v1060_v45 = vpop.f32.mrb[15].mxu1  ;;  %7121 = vmatmul.mubr.msk.bf16.gmra.mrb[24].mxu1 %vm1135_vm4, %v1093_v25  ;;  %v783_v53 = vmax.f32 %v577_v35, 0.0  ;;  %v1695_v34 = vld [vmem:[%s8211_s30 + $0x8] sm:$0xff]  ;;  %s8117_s30 = smov 12  }
 0x13c   :  { %v1084_v47 = vmax.f32 %v1058_v38, 0.0  ;;  %v786_v48 = vmax.f32 %v588_v39, 0.0  ;;  %v1061_v52 = vadd.f32 %v8430_v1, %v1060_v45  ;;  %v1307_v1 = vsel %vm1305_vm3, %v8432_v2, 0 }
 0x13d   :  { %v1087_v54 = vmax.f32 %v1069_v43, 0.0  ;;  %v784_v55 = vmax.f32 %v580_v44, 0.0  ;;  %v10224_v25 = vmov 0   ;;  %v1313_v39 = vsel %vm1305_vm3, %v8444_v29, 0 }
 0x13e   :  { %v8485_v56 = vpack.c.bf16 %v786_v48, %v785_v46  ;;  %v1085_v58 = vmax.f32 %v1061_v52, 0.0  ;;  %7591 = vset.pattern.permute.xlu0 %v10224_v25  ;;  %7592 = vset.pattern.permute.xlu1 %v10224_v25 }
 0x13f   :  { %v1095_v59 = vpack.c.bf16 %v1087_v54, %v1086_v42  ;;  %v8487_v61 = vpack.c.bf16 %v784_v55, %v783_v53  ;;  %v7040_v62 = vpop.f32.mrb[20].mxu0  ;;  %1699 = vperm.xlu0 %7591, %v1694_v21   ;;  %1709 = vperm.xlu1 %7592, %v1696_v31   ;;  %v1322_v31 = vsel %vm1305_vm3, %v8457_v57, 0 }
 0x140   :  { %v1094_v63 = vpack.c.bf16 %v1085_v58, %v1084_v47  ;;  %v601_v3 = vadd.f32 %v7040_v62, %v8421_v51  ;;  %v592_v4 = vpop.f32.mrb[21].mxu0  ;;  %v1316_v58 = vsel %vm1305_vm3, %v8442_v26, 0 }
 0x141   :  { %7507 = vmatprep.subr.msk.bf16.mxu0 %vm1305_vm3, %v8487_v61  ;;  %v593_v5 = vadd.f32 %v8421_v51, %v592_v4  ;;  %v7041_v6 = vpop.f32.mrb[22].mxu0 }
 0x142   :  { %7124 = vmatprep.mubr.msk.bf16.mxu1 %vm1135_vm4, %v1094_v63  ;;  %6680 = vmatpush3.bf16.xpose.msra.mxu0 %v1307_v1  ;;  %v789_v49 = vmax.f32 %v601_v3, 0.0  ;;  %v604_v7 = vadd.f32 %v7041_v6, %v8421_v51  ;;  %v595_v8 = vpop.f32.mrb[23].mxu0 }
 0x143   :  { %7125 = vmatmul.mubr.msk.bf16.gmra.mrb[28].mxu1 %vm1135_vm4, %v1095_v59  ;;  %7508 = vmatprep.subr.msk.bf16.mxu0 %vm1305_vm3, %v8485_v56  ;;  %v787_v9 = vmax.f32 %v593_v5, 0.0  ;;  %v596_v10 = vadd.f32 %v8421_v51, %v595_v8 }
 0x144   :  { %7130 = vmatprep.mubr.msk.bf16.mxu1 %vm1305_vm3, %v8432_v2  ;;  %v790_v11 = vmax.f32 %v604_v7, 0.0  ;;  %1704 = vperm.xlu0 %7591, %v1695_v34  }
 0x145   :  { %v788_v12 = vmax.f32 %v596_v10, 0.0 }
 0x146   :  { %v8503_v13 = vpack.c.bf16 %v790_v11, %v789_v49  ;;  %v1319_v11 = vsel %vm1305_vm3, %v8459_v60, 0 }
 0x147   :  { %v8505_v14 = vpack.c.bf16 %v788_v12, %v787_v9  ;;  %v7044_v15 = vpop.f32.mrb[24].mxu0 }
 0x148   :  { %v617_v16 = vadd.f32 %v7044_v15, %v8421_v51  ;;  %v608_v17 = vpop.f32.mrb[25].mxu0 }
 0x149   :  { %v609_v19 = vadd.f32 %v8421_v51, %v608_v17  ;;  %v7045_v20 = vpop.f32.mrb[26].mxu0 }
 0x14a   :  { %6682 = vmatpush3.bf16.xpose.msra.mxu0 %v1310_v18  ;;  %v793_v2 = vmax.f32 %v617_v16, 0.0  ;;  %v620_v22 = vadd.f32 %v7045_v20, %v8421_v51  ;;  %v611_v24 = vpop.f32.mrb[27].mxu0 }
 0x14b   :  { %7131 = vmatmul.mubr.msk.bf16.vlgmr.msra.gmra.mrb[32].mxu1 %vm1305_vm3, %v8427_v0  ;;  %7509 = vmatprep.subr.msk.bf16.mxu0 %vm1305_vm3, %v8505_v14  ;;  %v791_v28 = vmax.f32 %v609_v19, 0.0  ;;  %v612_v30 = vadd.f32 %v8421_v51, %v611_v24 }
 0x14c   :  { %7134 = vmatprep.mubr.msk.bf16.mxu1 %vm1305_vm3, %v8444_v29  ;;  %v794_v32 = vmax.f32 %v620_v22, 0.0 }
 0x14d   :  { %v792_v33 = vmax.f32 %v612_v30, 0.0 }
 0x14e   :  { %v8524_v35 = vpack.c.bf16 %v794_v32, %v793_v2 }
 0x14f   :  { %v8526_v0 = vpack.c.bf16 %v792_v33, %v791_v28  ;;  %v7048_v36 = vpop.f32.mrb[28].mxu0 }
 0x150   :  { %v633_v37 = vadd.f32 %v7048_v36, %v8421_v51  ;;  %v624_v38 = vpop.f32.mrb[29].mxu0 }
 0x151   :  { %v625_v40 = vadd.f32 %v8421_v51, %v624_v38  ;;  %v7049_v41 = vpop.f32.mrb[30].mxu0 }
 0x152   :  { %6684 = vmatpush3.bf16.xpose.msra.mxu0 %v1313_v39  ;;  %v797_v42 = vmax.f32 %v633_v37, 0.0  ;;  %v636_v43 = vadd.f32 %v7049_v41, %v8421_v51  ;;  %v627_v44 = vpop.f32.mrb[31].mxu0 }
 0x153   :  { %7135 = vmatmul.mubr.msk.bf16.gmra.mrb[36].mxu1 %vm1305_vm3, %v8442_v26  ;;  %7510 = vmatprep.subr.msk.bf16.mxu0 %vm1305_vm3, %v8503_v13  ;;  %v795_v45 = vmax.f32 %v625_v40, 0.0  ;;  %v628_v46 = vadd.f32 %v8421_v51, %v627_v44 }
 0x154   :  { %7138 = vmatprep.mubr.msk.bf16.mxu1 %vm1305_vm3, %v8459_v60  ;;  %v798_v29 = vmax.f32 %v636_v43, 0.0 }
 0x155   :  { %v796_v47 = vmax.f32 %v628_v46, 0.0 }
 0x156   :  { %v8540_v48 = vpack.c.bf16 %v798_v29, %v797_v42 }
 0x157   :  { %v8542_v52 = vpack.c.bf16 %v796_v47, %v795_v45  ;;  %v7052_v53 = vpop.f32.mrb[32].mxu0 }
 0x158   :  { %v649_v54 = vadd.f32 %v7052_v53, %v8421_v51  ;;  %v640_v55 = vpop.f32.mrb[33].mxu0 }
 0x159   :  { %v641_v59 = vadd.f32 %v8421_v51, %v640_v55  ;;  %v7053_v62 = vpop.f32.mrb[34].mxu0 }
 0x15a   :  { %6686 = vmatpush3.bf16.xpose.msra.mxu0 %v1316_v58  ;;  %v801_v63 = vmax.f32 %v649_v54, 0.0  ;;  %v652_v3 = vadd.f32 %v7053_v62, %v8421_v51  ;;  %v643_v4 = vpop.f32.mrb[35].mxu0 }
 0x15b   :  { %7139 = vmatmul.mubr.msk.bf16.gmra.mrb[40].mxu1 %vm1305_vm3, %v8457_v57  ;;  %7511 = vmatprep.subr.msk.bf16.mxu0 %vm1305_vm3, %v8526_v0  ;;  %v799_v1 = vmax.f32 %v641_v59, 0.0  ;;  %v644_v5 = vadd.f32 %v8421_v51, %v643_v4 }
 0x15c   :  { %7142 = vmatprep.mubr.msk.bf16.mxu1 %vm1305_vm3, %v8473_v27  ;;  %v802_v26 = vmax.f32 %v652_v3, 0.0 }
 0x15d   :  { %v800_v6 = vmax.f32 %v644_v5, 0.0 }
 0x15e   :  { %v8556_v49 = vpack.c.bf16 %v802_v26, %v801_v63 }
 0x15f   :  { %v8558_v7 = vpack.c.bf16 %v800_v6, %v799_v1  ;;  %v7056_v8 = vpop.f32.mrb[36].mxu0  ;;  %v1328_v1 = vsel %vm1305_vm3, %v8471_v23, 0 }
 0x160   :  { %v665_v9 = vadd.f32 %v7056_v8, %v8421_v51  ;;  %v656_v10 = vpop.f32.mrb[37].mxu0 }
 0x161   :  { %v657_v12 = vadd.f32 %v8421_v51, %v656_v10  ;;  %v7057_v15 = vpop.f32.mrb[38].mxu0 }
 0x162   :  { %6688 = vmatpush3.bf16.xpose.msra.mxu0 %v1319_v11  ;;  %v805_v16 = vmax.f32 %v665_v9, 0.0  ;;  %v668_v17 = vadd.f32 %v7057_v15, %v8421_v51  ;;  %v659_v18 = vpop.f32.mrb[39].mxu0  ;;  %v1355_v15 = vsel %vm1305_vm3, %v8558_v7, 0 }
 0x163   :  { %7143 = vmatmul.mubr.msk.bf16.gmra.mrb[44].mxu1 %vm1305_vm3, %v8471_v23  ;;  %7512 = vmatprep.subr.msk.bf16.mxu0 %vm1305_vm3, %v8524_v35  ;;  %v803_v19 = vmax.f32 %v657_v12, 0.0  ;;  %v660_v20 = vadd.f32 %v8421_v51, %v659_v18  ;;  %v8621_v12 = vld [vmem:[%s8206_s24 + $0x8] ss:$0 sps:$4 sm:$0x77]   ;;  %s10383_s24 = sld [smem:[#allocation16_spill]] }
 0x164   :  { %7146 = vmatprep.mubr.msk.bf16.mxu1 %vm1305_vm3, %v8487_v61  ;;  %v806_v60 = vmax.f32 %v668_v17, 0.0 }
 0x165   :  { %v804_v21 = vmax.f32 %v660_v20, 0.0 }
 0x166   :  { %v8572_v2 = vpack.c.bf16 %v806_v60, %v805_v16 }
 0x167   :  { %v8574_v22 = vpack.c.bf16 %v804_v21, %v803_v19  ;;  %v7060_v24 = vpop.f32.mrb[40].mxu0 }
 0x168   :  { %v681_v28 = vadd.f32 %v7060_v24, %v8421_v51  ;;  %v672_v30 = vpop.f32.mrb[41].mxu0 }
 0x169   :  { %v673_v32 = vadd.f32 %v8421_v51, %v672_v30  ;;  %v7061_v33 = vpop.f32.mrb[42].mxu0 }
 0x16a   :  { %6690 = vmatpush3.bf16.xpose.msra.mxu0 %v1322_v31  ;;  %v809_v34 = vmax.f32 %v681_v28, 0.0  ;;  %v684_v61 = vadd.f32 %v7061_v33, %v8421_v51  ;;  %v675_v36 = vpop.f32.mrb[43].mxu0  ;;  %v1358_v33 = vsel %vm1305_vm3, %v8556_v49, 0 }
 0x16b   :  { %7147 = vmatmul.mubr.msk.bf16.gmra.mrb[48].mxu1 %vm1305_vm3, %v8485_v56  ;;  %v807_v37 = vmax.f32 %v673_v32, 0.0  ;;  %7513 = vmatprep.subr.msk.bf16.mxu0 %vm1305_vm3, %v8542_v52  ;;  %v676_v38 = vadd.f32 %v8421_v51, %v675_v36  ;;  %v1325_v56 = vsel %vm1305_vm3, %v8473_v27, 0 }
 0x16c   :  { %7150 = vmatprep.mubr.msk.bf16.mxu1 %vm1305_vm3, %v8505_v14  ;;  %v810_v57 = vmax.f32 %v684_v61, 0.0 }
 0x16d   :  { %v808_v39 = vmax.f32 %v676_v38, 0.0 }
 0x16e   :  { %v8588_v40 = vpack.c.bf16 %v810_v57, %v809_v34 }
 0x16f   :  { %v8590_v41 = vpack.c.bf16 %v808_v39, %v807_v37  ;;  %v7064_v42 = vpop.f32.mrb[44].mxu0 }
 0x170   :  { %v697_v43 = vadd.f32 %v7064_v42, %v8421_v51  ;;  %v688_v44 = vpop.f32.mrb[45].mxu0 }
 0x171   :  { %v689_v45 = vadd.f32 %v8421_v51, %v688_v44  ;;  %v7065_v46 = vpop.f32.mrb[46].mxu0 }
 0x172   :  { %6692 = vmatpush3.bf16.xpose.msra.mxu0 %v1325_v56  ;;  %v813_v29 = vmax.f32 %v697_v43, 0.0  ;;  %v700_v14 = vadd.f32 %v7065_v46, %v8421_v51  ;;  %v691_v47 = vpop.f32.mrb[47].mxu0 }
 0x173   :  { %7151 = vmatmul.mubr.msk.bf16.gmra.mrb[52].mxu1 %vm1305_vm3, %v8503_v13  ;;  %v811_v53 = vmax.f32 %v689_v45, 0.0  ;;  %v692_v54 = vadd.f32 %v8421_v51, %v691_v47  ;;  %7514 = vmatprep.subr.msk.bf16.mxu0 %vm1305_vm3, %v8540_v48  ;;  %v1361_v45 = vsel %vm1305_vm3, %v8574_v22, 0 }
 0x174   :  { %v814_v55 = vmax.f32 %v700_v14, 0.0  ;;  %7154 = vmatprep.mubr.msk.bf16.mxu1 %vm1305_vm3, %v8526_v0 }
 0x175   :  { %v812_v27 = vmax.f32 %v692_v54, 0.0 }
 0x176   :  { %v8604_v58 = vpack.c.bf16 %v814_v55, %v813_v29 }
 0x177   :  { %v8606_v59 = vpack.c.bf16 %v812_v27, %v811_v53  ;;  %v7068_v62 = vpop.f32.mrb[48].mxu0 }
 0x178   :  { %v713_v63 = vadd.f32 %v7068_v62, %v8421_v51  ;;  %v704_v13 = vpop.f32.mrb[49].mxu0 }
 0x179   :  { %v705_v3 = vadd.f32 %v8421_v51, %v704_v13  ;;  %v7069_v4 = vpop.f32.mrb[50].mxu0 }
 0x17a   :  { %v817_v5 = vmax.f32 %v713_v63, 0.0  ;;  %v716_v26 = vadd.f32 %v7069_v4, %v8421_v51  ;;  %v707_v0 = vpop.f32.mrb[51].mxu0  ;;  %6694 = vmatpush3.bf16.xpose.msra.mxu0 %v1328_v1  ;;  %v1364_v4 = vsel %vm1305_vm3, %v8572_v2, 0 }
 0x17b   :  { %v815_v6 = vmax.f32 %v705_v3, 0.0  ;;  %v708_v8 = vadd.f32 %v8421_v51, %v707_v0  ;;  %7155 = vmatmul.mubr.msk.bf16.gmra.mrb[56].mxu1 %vm1305_vm3, %v8524_v35 }
 0x17c   :  { %v818_v9 = vmax.f32 %v716_v26, 0.0  ;;  %7158 = vmatprep.mubr.msk.bf16.mxu1 %vm1305_vm3, %v8542_v52 }
 0x17d   :  { %v816_v10 = vmax.f32 %v708_v8, 0.0 }
 0x17e   :  { %v8618_v11 = vpack.c.bf16 %v818_v9, %v817_v5 }
 0x17f   :  { %v8623_v23 = vpack.c.bf16 %v816_v10, %v815_v6  ;;  %v7072_v16 = vpop.f32.mrb[52].mxu0 }
 0x180   :  { %v729_v17 = vadd.f32 %v7072_v16, %v8421_v51  ;;  %v720_v18 = vpop.f32.mrb[53].mxu0 }
 0x181   :  { %6696 = vmatmul.mubr.msk.bf16.vlgmr.msra.gmra.mrb[64].mxu0 %vm1305_vm3, %v8416_v50  ;;  %7515 = vmatprep.subr.msk.bf16.mxu0 %vm1305_vm3, %v8623_v23  ;;  %v721_v35 = vadd.f32 %v8421_v51, %v720_v18  ;;  %v7073_v52 = vpop.f32.mrb[54].mxu0 }
 0x182   :  { %6700 = vmatpush3.bf16.xpose.msra.mxu0 %v1355_v15  ;;  %v821_v19 = vmax.f32 %v729_v17, 0.0  ;;  %6697 = vmatprep.mubr.msk.bf16.mxu0 %vm1305_vm3, %v8621_v12  ;;  %v732_v20 = vadd.f32 %v7073_v52, %v8421_v51  ;;  %v723_v60 = vpop.f32.mrb[55].mxu0 }
 0x183   :  { %7159 = vmatmul.mubr.msk.bf16.gmra.mrb[60].mxu1 %vm1305_vm3, %v8540_v48  ;;  %v819_v21 = vmax.f32 %v721_v35, 0.0  ;;  %7516 = vmatprep.subr.msk.bf16.mxu0 %vm1305_vm3, %v8618_v11  ;;  %v724_v24 = vadd.f32 %v8421_v51, %v723_v60 }
 0x184   :  { %v822_v28 = vmax.f32 %v732_v20, 0.0  ;;  %7162 = vmatprep.mubr.msk.bf16.mxu1 %vm1305_vm3, %v8558_v7 }
 0x185   :  { %v820_v30 = vmax.f32 %v724_v24, 0.0 }
 0x186   :  { %v858_v31 = vpack.c.bf16 %v822_v28, %v821_v19 }
 0x187   :  { %v857_v32 = vpack.c.bf16 %v820_v30, %v819_v21  ;;  %v7076_v34 = vpop.f32.mrb[56].mxu0 }
 0x188   :  { %v745_v61 = vadd.f32 %v7076_v34, %v8421_v51  ;;  %v736_v48 = vpop.f32.mrb[57].mxu0 }
 0x189   :  { %6698 = vmatmul.mubr.msk.bf16.gmra.mrb[68].mxu0 %vm1305_vm3, %v8621_v12  ;;  %v737_v36 = vadd.f32 %v8421_v51, %v736_v48  ;;  %v7077_v37 = vpop.f32.mrb[58].mxu0 }
 0x18a   :  { %6702 = vmatpush3.bf16.xpose.msra.mxu0 %v1358_v33  ;;  %v825_v38 = vmax.f32 %v745_v61, 0.0  ;;  %v748_v7 = vadd.f32 %v7077_v37, %v8421_v51  ;;  %v739_v57 = vpop.f32.mrb[59].mxu0  ;;  %6715 = vmatprep.mubr.msk.bf16.mxu0 %vm1305_vm3, %v8416_v50 }
 0x18b   :  { %7517 = vmatprep.subr.msk.bf16.mxu0 %vm1305_vm3, %v857_v32  ;;  %v823_v39 = vmax.f32 %v737_v36, 0.0  ;;  %v740_v42 = vadd.f32 %v8421_v51, %v739_v57  ;;  %7163 = vmatmul.mubr.msk.bf16.gmra.mrb[64].mxu1 %vm1305_vm3, %v8556_v49 }
 0x18c   :  { %v826_v43 = vmax.f32 %v748_v7, 0.0  ;;  %7166 = vmatprep.mubr.msk.bf16.mxu1 %vm1305_vm3, %v8574_v22 }
 0x18d   :  { %v824_v44 = vmax.f32 %v740_v42, 0.0 }
 0x18e   :  { %v860_v56 = vpack.c.bf16 %v826_v43, %v825_v38 }
 0x18f   :  { %v859_v46 = vpack.c.bf16 %v824_v44, %v823_v39  ;;  %v7080_v29 = vpop.f32.mrb[60].mxu0 }
 0x190   :  { %v761_v14 = vadd.f32 %v7080_v29, %v8421_v51  ;;  %v752_v47 = vpop.f32.mrb[61].mxu0 }
 0x191   :  { %v753_v53 = vadd.f32 %v8421_v51, %v752_v47  ;;  %v7081_v54 = vpop.f32.mrb[62].mxu0 }
 0x192   :  { %6704 = vmatpush3.bf16.xpose.msra.mxu0 %v1361_v45  ;;  %v829_v55 = vmax.f32 %v761_v14, 0.0  ;;  %v764_v49 = vadd.f32 %v7081_v54, %v8421_v51  ;;  %v755_v27 = vpop.f32.mrb[63].mxu0 }
 0x193   :  { %7518 = vmatprep.subr.msk.bf16.mxu0 %vm1305_vm3, %v858_v31  ;;  %v827_v62 = vmax.f32 %v753_v53, 0.0  ;;  %v756_v63 = vadd.f32 %v8421_v51, %v755_v27  ;;  %7167 = vmatmul.mubr.msk.bf16.gmra.mrb[68].mxu1 %vm1305_vm3, %v8572_v2  ;;  %v1367_v51 = vsel %vm1305_vm3, %v8590_v41, 0  ;;  %v1370_v2 = vsel %vm1305_vm3, %v8588_v40, 0 }
 0x194   :  { %v830_v22 = vmax.f32 %v764_v49, 0.0  ;;  %7170 = vmatprep.mubr.msk.bf16.mxu1 %vm1305_vm3, %v8590_v41  ;;  %v1373_v41 = vsel %vm1305_vm3, %v8606_v59, 0 }
 0x195   :  { %v828_v13 = vmax.f32 %v756_v63, 0.0 }
 0x196   :  { %v862_v3 = vpack.c.bf16 %v830_v22, %v829_v55 }
 0x197   :  { %v861_v1 = vpack.c.bf16 %v828_v13, %v827_v62 }
 0x19a   :  { %6706 = vmatpush3.bf16.xpose.msra.mxu0 %v1364_v4 }
 0x19b   :  { %7519 = vmatprep.subr.msk.bf16.mxu0 %vm1305_vm3, %v859_v46  ;;  %7171 = vmatmul.mubr.msk.bf16.gmra.mrb[72].mxu1 %vm1305_vm3, %v8588_v40  ;;  %v1376_v40 = vsel %vm1305_vm3, %v8604_v58, 0 }
 0x19c   :  { %7174 = vmatprep.mubr.msk.bf16.mxu1 %vm1305_vm3, %v8606_v59  ;;  %v8706_v59 = vld [vmem:[%s8191_s8] ss:$0 sm:$0xff]  ;;  %s10334_s8 = sld [smem:[#allocation14_spill]] }
 0x1a2   :  { %6708 = vmatpush3.bf16.xpose.msra.mxu0 %v1367_v51 }
 0x1a3   :  { %7520 = vmatprep.subr.msk.bf16.mxu0 %vm1305_vm3, %v860_v56  ;;  %7175 = vmatmul.mubr.msk.bf16.gmra.mrb[76].mxu1 %vm1305_vm3, %v8604_v58 }
 0x1a4   :  { %7178 = vmatprep.mubr.msk.bf16.mxu1 %vm1305_vm3, %v8623_v23 }
 0x1aa   :  { %6710 = vmatpush3.bf16.xpose.msra.mxu0 %v1370_v2 }
 0x1ab   :  { %7521 = vmatprep.subr.msk.bf16.mxu0 %vm1305_vm3, %v861_v1  ;;  %7179 = vmatmul.mubr.msk.bf16.gmra.mrb[80].mxu1 %vm1305_vm3, %v8618_v11 }
 0x1ac   :  { %7182 = vmatprep.mubr.msk.bf16.mxu1 %vm1305_vm3, %v857_v32 }
 0x1b2   :  { %6712 = vmatpush3.bf16.xpose.msra.mxu0 %v1373_v41 }
 0x1b3   :  { %7522 = vmatprep.subr.msk.bf16.mxu0 %vm1305_vm3, %v862_v3  ;;  %7183 = vmatmul.mubr.msk.bf16.gmra.mrb[84].mxu1 %vm1305_vm3, %v858_v31 }
 0x1b4   :  { %7186 = vmatprep.mubr.msk.bf16.mxu1 %vm1305_vm3, %v859_v46 }
 0x1ba   :  { %6714 = vmatpush3.bf16.xpose.msra.mxu0 %v1376_v40 }
 0x1bb   :  { %7187 = vmatmul.mubr.msk.bf16.gmra.mrb[88].mxu1 %vm1305_vm3, %v860_v56 }
 0x1bc   :  { %7190 = vmatprep.mubr.msk.bf16.mxu1 %vm1305_vm3, %v861_v1 }
 0x1c1   :  { %6716 = vmatmul.mubr.msk.bf16.vlgmr.msra.gmra.mrb[72].mxu0 %vm1305_vm3, %v8416_v50 }
 0x1c2   :  { %6717 = vmatprep.mubr.msk.bf16.mxu0 %vm1305_vm3, %v8621_v12 }
 0x1c3   :  { %7191 = vmatmul.mubr.msk.bf16.gmra.mrb[92].mxu1 %vm1305_vm3, %v862_v3 }
 0x1c9   :  { %6718 = vmatmul.mubr.msk.bf16.gmra.mrb[76].mxu0 %vm1305_vm3, %v8621_v12  ;;  %vm2970_vm3 = vcmask 384000  }
 0x1fe   :  { %v7114_v5 = vpop.f32.mrb[16].mxu1 }
 0x1ff   :  { %v1203_v58 = vadd.f32 %v7114_v5, %v8706_v59  ;;  %v1194_v26 = vpop.f32.mrb[17].mxu1 }
 0x200   :  { %v1195_v0 = vadd.f32 %v8706_v59, %v1194_v26  ;;  %v7115_v6 = vpop.f32.mrb[18].mxu1 }
 0x201   :  { %v1259_v8 = vmax.f32 %v1203_v58, 0.0  ;;  %v1206_v50 = vadd.f32 %v7115_v6, %v8706_v59  ;;  %v1197_v9 = vpop.f32.mrb[19].mxu1 }
 0x202   :  { %v1257_v10 = vmax.f32 %v1195_v0, 0.0  ;;  %v1198_v11 = vadd.f32 %v8706_v59, %v1197_v9 }
 0x203   :  { %1276 = vst.msk [vmem:[#allocation2 + $0x10] sm:$0xff] %vm1273_vm5, %v1259_v8  ;;  %v1260_v12 = vmax.f32 %v1206_v50, 0.0  ;;  %v3026_v16 = vsel %vm1273_vm5, %v1259_v8, 0.0 }
 0x204   :  { %1274 = vst.msk [vmem:[#allocation2] sm:$0xff] %vm1273_vm5, %v1257_v10  ;;  %v3023_v23 = vsel %vm1273_vm5, %v1257_v10, 0.0  ;;  %v1258_v15 = vmax.f32 %v1198_v11, 0.0 }
 0x205   :  { %1277 = vst.msk [vmem:[#allocation2 + $0x18] sm:$0xff] %vm1273_vm5, %v1260_v12  ;;  %v3028_v20 = vsel %vm1273_vm5, %v1260_v12, 0.0 }
 0x206   :  { %1275 = vst.msk [vmem:[#allocation2 + $0x8] sm:$0xff] %vm1273_vm5, %v1258_v15  ;;  %v3024_v17 = vsel %vm1273_vm5, %v1258_v15, 0.0  ;;  %v7118_v18 = vpop.f32.mrb[20].mxu1 }
 0x207   :  { %v3025_v35 = vadd.f32 %v3024_v17, %v3023_v23  ;;  %v1219_v52 = vadd.f32 %v7118_v18, %v8706_v59  ;;  %v1210_v19 = vpop.f32.mrb[21].mxu1 }
 0x208   :  { %v1211_v60 = vadd.f32 %v8706_v59, %v1210_v19  ;;  %v7119_v21 = vpop.f32.mrb[22].mxu1 }
 0x209   :  { %v3027_v24 = vadd.f32 %v3026_v16, %v3025_v35  ;;  %v1263_v28 = vmax.f32 %v1219_v52, 0.0  ;;  %v1222_v30 = vadd.f32 %v7119_v21, %v8706_v59  ;;  %v1213_v31 = vpop.f32.mrb[23].mxu1 }
 0x20a   :  { %v1261_v32 = vmax.f32 %v1211_v60, 0.0  ;;  %v1214_v33 = vadd.f32 %v8706_v59, %v1213_v31 }
 0x20b   :  { %1280 = vst.msk [vmem:[#allocation2 + $0x30] sm:$0xff] %vm1273_vm5, %v1263_v28  ;;  %v3029_v34 = vadd.f32 %v3028_v20, %v3027_v24  ;;  %v1264_v61 = vmax.f32 %v1222_v30, 0.0  ;;  %v3034_v38 = vsel %vm1273_vm5, %v1263_v28, 0.0 }
 0x20c   :  { %1278 = vst.msk [vmem:[#allocation2 + $0x20] sm:$0xff] %vm1273_vm5, %v1261_v32  ;;  %v3030_v48 = vsel %vm1273_vm5, %v1261_v32, 0.0  ;;  %v1262_v36 = vmax.f32 %v1214_v33, 0.0 }
 0x20d   :  { %v3031_v37 = vadd.f32 %v3030_v48, %v3029_v34  ;;  %1281 = vst.msk [vmem:[#allocation2 + $0x38] sm:$0xff] %vm1273_vm5, %v1264_v61  ;;  %v3036_v44 = vsel %vm1273_vm5, %v1264_v61, 0.0 }
 0x20e   :  { %1279 = vst.msk [vmem:[#allocation2 + $0x28] sm:$0xff] %vm1273_vm5, %v1262_v36  ;;  %v3032_v7 = vsel %vm1273_vm5, %v1262_v36, 0.0  ;;  %v7122_v57 = vpop.f32.mrb[24].mxu1 }
 0x20f   :  { %v3033_v39 = vadd.f32 %v3032_v7, %v3031_v37  ;;  %v1235_v42 = vadd.f32 %v7122_v57, %v8706_v59  ;;  %v1226_v43 = vpop.f32.mrb[25].mxu1 }
 0x210   :  { %v1227_v56 = vadd.f32 %v8706_v59, %v1226_v43  ;;  %v7123_v45 = vpop.f32.mrb[26].mxu1 }
 0x211   :  { %v3035_v46 = vadd.f32 %v3034_v38, %v3033_v39  ;;  %v1267_v29 = vmax.f32 %v1235_v42, 0.0  ;;  %v1238_v14 = vadd.f32 %v7123_v45, %v8706_v59  ;;  %v1229_v47 = vpop.f32.mrb[27].mxu1 }
 0x212   :  { %v1265_v53 = vmax.f32 %v1227_v56, 0.0  ;;  %v1230_v54 = vadd.f32 %v8706_v59, %v1229_v47 }
 0x213   :  { %v8736_v55 = vadd.f32 %v3036_v44, %v3035_v46  ;;  %1284 = vst.msk [vmem:[#allocation2 + $0x50] sm:$0xff] %vm1273_vm5, %v1267_v29  ;;  %v1268_v49 = vmax.f32 %v1238_v14, 0.0  ;;  %v4008_v63 = vsel %vm1273_vm5, %v1267_v29, 0.0 }
 0x214   :  { %1282 = vst.msk [vmem:[#allocation2 + $0x40] sm:$0xff] %vm1273_vm5, %v1265_v53  ;;  %v4005_v27 = vsel %vm1273_vm5, %v1265_v53, 0.0  ;;  %v1266_v62 = vmax.f32 %v1230_v54, 0.0 }
 0x215   :  { %1285 = vst.msk [vmem:[#allocation2 + $0x58] sm:$0xff] %vm1273_vm5, %v1268_v49  ;;  %v4010_v51 = vsel %vm1273_vm5, %v1268_v49, 0.0 }
 0x216   :  { %1283 = vst.msk [vmem:[#allocation2 + $0x48] sm:$0xff] %vm1273_vm5, %v1266_v62  ;;  %v4006_v22 = vsel %vm1273_vm5, %v1266_v62, 0.0  ;;  %v7126_v13 = vpop.f32.mrb[28].mxu1 }
 0x217   :  { %v4007_v3 = vadd.f32 %v4006_v22, %v4005_v27  ;;  %v1251_v4 = vadd.f32 %v7126_v13, %v8706_v59  ;;  %v1242_v1 = vpop.f32.mrb[29].mxu1 }
 0x218   :  { %v1243_v2 = vadd.f32 %v8706_v59, %v1242_v1  ;;  %v7127_v41 = vpop.f32.mrb[30].mxu1 }
 0x219   :  { %v4009_v40 = vadd.f32 %v4008_v63, %v4007_v3  ;;  %v1271_v5 = vmax.f32 %v1251_v4, 0.0  ;;  %v1254_v58 = vadd.f32 %v7127_v41, %v8706_v59  ;;  %v1245_v26 = vpop.f32.mrb[31].mxu1 }
 0x21a   :  { %v1269_v0 = vmax.f32 %v1243_v2, 0.0  ;;  %v1246_v6 = vadd.f32 %v8706_v59, %v1245_v26  ;;  %v8758_v59 = vld [vmem:[%s8201_s19] ss:$0 sm:$0xff]  ;;  %s8116_s19 = smov 32  }
 0x21b   :  { %1288 = vst.msk [vmem:[#allocation2 + $0x70] sm:$0xff] %vm1273_vm5, %v1271_v5  ;;  %v4011_v8 = vadd.f32 %v4010_v51, %v4009_v40  ;;  %v1272_v50 = vmax.f32 %v1254_v58, 0.0  ;;  %v4016_v12 = vsel %vm1273_vm5, %v1271_v5, 0.0 }
 0x21c   :  { %1286 = vst.msk [vmem:[#allocation2 + $0x60] sm:$0xff] %vm1273_vm5, %v1269_v0  ;;  %v4012_v9 = vsel %vm1273_vm5, %v1269_v0, 0.0  ;;  %v1270_v10 = vmax.f32 %v1246_v6, 0.0 }
 0x21d   :  { %v4013_v11 = vadd.f32 %v4012_v9, %v4011_v8  ;;  %1289 = vst.msk [vmem:[#allocation2 + $0x78] sm:$0xff] %vm1273_vm5, %v1272_v50  ;;  %v4018_v18 = vsel %vm1273_vm5, %v1272_v50, 0.0 }
 0x21e   :  { %1287 = vst.msk [vmem:[#allocation2 + $0x68] sm:$0xff] %vm1273_vm5, %v1270_v10  ;;  %v4014_v23 = vsel %vm1273_vm5, %v1270_v10, 0.0  ;;  %v7132_v15 = vpop.f32.mrb[32].mxu1 }
 0x21f   :  { %v4015_v16 = vadd.f32 %v4014_v23, %v4013_v11  ;;  %v1436_v17 = vpop.f32.mrb[33].mxu1  ;;  %v1445_v19 = vadd.f32 %v7132_v15, %v8758_v59 }
 0x220   :  { %v7133_v35 = vpop.f32.mrb[34].mxu1  ;;  %v1437_v21 = vadd.f32 %v8758_v59, %v1436_v17 }
 0x221   :  { %v4017_v52 = vadd.f32 %v4016_v12, %v4015_v16  ;;  %v1448_v20 = vadd.f32 %v7133_v35, %v8758_v59  ;;  %v1439_v60 = vpop.f32.mrb[35].mxu1  ;;  %v8811_v35 = vpop.permute.xlu0 %1699 }
 0x222   :  { %v1440_v24 = vadd.f32 %v8758_v59, %v1439_v60 }
 0x223   :  { %v8765_v28 = vadd.f32 %v4018_v18, %v4017_v52  ;;  %v7384_v30 = vpack.c.bf16 %v1448_v20, %v1445_v19 }
 0x224   :  { %v7380_v31 = vpack.c.bf16 %v1440_v24, %v1437_v21 }
 0x226   :  { %v7136_v32 = vpop.f32.mrb[36].mxu1 }
 0x227   :  { %v1452_v33 = vpop.f32.mrb[37].mxu1  ;;  %v8768_v61 = vadd.f32 %v7136_v32, %v8758_v59 }
 0x228   :  { %v7137_v34 = vpop.f32.mrb[38].mxu1  ;;  %v1453_v37 = vadd.f32 %v8758_v59, %v1452_v33 }
 0x229   :  { %v8771_v48 = vadd.f32 %v7137_v34, %v8758_v59  ;;  %v1455_v36 = vpop.f32.mrb[39].mxu1  ;;  %v8817_v34 = vpop.permute.xlu0 %1704 }
 0x22a   :  { %v1456_v38 = vadd.f32 %v8758_v59, %v1455_v36 }
 0x22b   :  { %v7392_v7 = vpack.c.bf16 %v8771_v48, %v8768_v61 }
 0x22c   :  { %v7388_v57 = vpack.c.bf16 %v1456_v38, %v1453_v37 }
 0x22e   :  { %v7140_v39 = vpop.f32.mrb[40].mxu1 }
 0x22f   :  { %v1468_v42 = vpop.f32.mrb[41].mxu1  ;;  %v8778_v44 = vadd.f32 %v7140_v39, %v8758_v59 }
 0x230   :  { %v7141_v43 = vpop.f32.mrb[42].mxu1  ;;  %v1469_v46 = vadd.f32 %v8758_v59, %v1468_v42 }
 0x231   :  { %v8781_v56 = vadd.f32 %v7141_v43, %v8758_v59  ;;  %v1471_v45 = vpop.f32.mrb[43].mxu1 }
 0x232   :  { %v1472_v29 = vadd.f32 %v8758_v59, %v1471_v45 }
 0x233   :  { %v7400_v14 = vpack.c.bf16 %v8781_v56, %v8778_v44 }
 0x234   :  { %v7396_v47 = vpack.c.bf16 %v1472_v29, %v1469_v46 }
 0x236   :  { %v7144_v53 = vpop.f32.mrb[44].mxu1 }
 0x237   :  { %v1484_v54 = vpop.f32.mrb[45].mxu1  ;;  %v8788_v27 = vadd.f32 %v7144_v53, %v8758_v59 }
 0x238   :  { %v7145_v49 = vpop.f32.mrb[46].mxu1  ;;  %v8794_v22 = vadd.f32 %v8758_v59, %v1484_v54 }
 0x239   :  { %v8791_v62 = vadd.f32 %v7145_v49, %v8758_v59  ;;  %v1487_v63 = vpop.f32.mrb[47].mxu1 }
 0x23a   :  { %v8797_v13 = vadd.f32 %v8758_v59, %v1487_v63  ;;  %v8839_v63 = vpop.permute.xlu1 %1709 }
 0x23b   :  { %v7408_v3 = vpack.c.bf16 %v8791_v62, %v8788_v27 }
 0x23c   :  { %v7404_v4 = vpack.c.bf16 %v8797_v13, %v8794_v22 }
 0x23e   :  { %v7148_v1 = vpop.f32.mrb[48].mxu1 }
 0x23f   :  { %v1500_v51 = vpop.f32.mrb[49].mxu1  ;;  %v1509_v41 = vadd.f32 %v7148_v1, %v8758_v59 }
 0x240   :  { %v7149_v2 = vpop.f32.mrb[50].mxu1  ;;  %v1501_v58 = vadd.f32 %v8758_v59, %v1500_v51 }
 0x241   :  { %v1512_v40 = vadd.f32 %v7149_v2, %v8758_v59  ;;  %v1503_v5 = vpop.f32.mrb[51].mxu1 }
 0x242   :  { %v1504_v26 = vadd.f32 %v8758_v59, %v1503_v5 }
 0x243   :  { %v7382_v0 = vpack.c.bf16 %v1512_v40, %v1509_v41 }
 0x244   :  { %v7378_v6 = vpack.c.bf16 %v1504_v26, %v1501_v58 }
 0x246   :  { %v7152_v8 = vpop.f32.mrb[52].mxu1  ;;  %7379 = vmatprep.subr.bf16.mxu1 %v7378_v6 }
 0x247   :  { %v1516_v50 = vpop.f32.mrb[53].mxu1  ;;  %7381 = vmatpush3.bf16.msra.mxu1 %v7380_v31  ;;  %v1525_v10 = vadd.f32 %v7152_v8, %v8758_v59 }
 0x248   :  { %v7153_v9 = vpop.f32.mrb[54].mxu1  ;;  %7383 = vmatprep.subr.bf16.mxu1 %v7382_v0  ;;  %v1517_v23 = vadd.f32 %v8758_v59, %v1516_v50 }
 0x249   :  { %v1528_v11 = vadd.f32 %v7153_v9, %v8758_v59  ;;  %v1519_v12 = vpop.f32.mrb[55].mxu1 }
 0x24a   :  { %v1520_v15 = vadd.f32 %v8758_v59, %v1519_v12 }
 0x24b   :  { %v7390_v16 = vpack.c.bf16 %v1528_v11, %v1525_v10  ;;  %7385 = vmatpush3.bf16.msra.mxu1 %v7384_v30 }
 0x24c   :  { %v7386_v17 = vpack.c.bf16 %v1520_v15, %v1517_v23 }
 0x24e   :  { %v7156_v18 = vpop.f32.mrb[56].mxu1  ;;  %7387 = vmatprep.subr.bf16.mxu1 %v7386_v17 }
 0x24f   :  { %v1532_v52 = vpop.f32.mrb[57].mxu1  ;;  %7389 = vmatpush3.bf16.msra.mxu1 %v7388_v57  ;;  %v1541_v20 = vadd.f32 %v7156_v18, %v8758_v59 }
 0x250   :  { %v7157_v19 = vpop.f32.mrb[58].mxu1  ;;  %7391 = vmatprep.subr.bf16.mxu1 %v7390_v16  ;;  %v1533_v24 = vadd.f32 %v8758_v59, %v1532_v52 }
 0x251   :  { %v1544_v60 = vadd.f32 %v7157_v19, %v8758_v59  ;;  %v1535_v21 = vpop.f32.mrb[59].mxu1 }
 0x252   :  { %v1536_v31 = vadd.f32 %v8758_v59, %v1535_v21 }
 0x253   :  { %v7398_v32 = vpack.c.bf16 %v1544_v60, %v1541_v20  ;;  %7393 = vmatpush3.bf16.msra.mxu1 %v7392_v7 }
 0x254   :  { %v7394_v30 = vpack.c.bf16 %v1536_v31, %v1533_v24  ;;  %v1760_v33 = vpop.f32.mrb[64].mxu0 }
 0x255   :  { %v8820_v61 = vadd.f32 %v1760_v33, %v8811_v35  ;;  %v1762_v48 = vpop.f32.mrb[65].mxu0 }
 0x256   :  { %v7160_v36 = vpop.f32.mrb[60].mxu1  ;;  %v8823_v37 = vadd.f32 %v1762_v48, %v8811_v35  ;;  %7395 = vmatprep.subr.bf16.mxu1 %v7394_v30  ;;  %v1764_v38 = vpop.f32.mrb[66].mxu0 }
 0x257   :  { %v1548_v57 = vpop.f32.mrb[61].mxu1  ;;  %7397 = vmatpush3.bf16.msra.mxu1 %v7396_v47  ;;  %v1766_v39 = vpop.f32.mrb[67].mxu0  ;;  %v8826_v42 = vadd.f32 %v1764_v38, %v8817_v34  ;;  %v1557_v46 = vadd.f32 %v7160_v36, %v8758_v59  ;;  %v1844_v38 = vld [vmem:[%s8161_s13 + $0x80] sm:$0xff] }
 0x258   :  { %v7161_v7 = vpop.f32.mrb[62].mxu1  ;;  %v8829_v43 = vadd.f32 %v1766_v39, %v8817_v34  ;;  %7399 = vmatprep.subr.bf16.mxu1 %v7398_v32  ;;  %v1901_v45 = vmax.f32 %v8820_v61, %v8823_v37  ;;  %v1549_v54 = vadd.f32 %v8758_v59, %v1548_v57  ;;  %v1845_v57 = vld [vmem:[%s8161_s13 + $0x88] sm:$0xff]  ;;  %v1828_v39 = vld [vmem:[%s8161_s13] sm:$0xff] }
 0x259   :  { %v1560_v29 = vadd.f32 %v7161_v7, %v8758_v59  ;;  %v1551_v53 = vpop.f32.mrb[63].mxu1 }
 0x25a   :  { %v1552_v47 = vadd.f32 %v8758_v59, %v1551_v53  ;;  %1902 = vmax.xlane.f32.xlu1 %v1901_v45  ;;  %v1904_v49 = vmax.f32 %v8826_v42, %v8829_v43  ;;  %v1846_v53 = vld [vmem:[%s8161_s13 + $0x90] sm:$0xff] }
 0x25b   :  { %v7406_v1 = vpack.c.bf16 %v1560_v29, %v1557_v46  ;;  %7401 = vmatpush3.bf16.msra.mxu1 %v7400_v14  ;;  %v8914_v46 = vpack.c.bf16 %v1845_v57, %v1844_v38  ;;  %v1829_v29 = vld [vmem:[%s8161_s13 + $0x8] sm:$0xff] }
 0x25c   :  { %v7402_v51 = vpack.c.bf16 %v1552_v47, %v1549_v54  ;;  %v1770_v2 = vpop.f32.mrb[68].mxu0  ;;  %1905 = vmax.xlane.f32.xlu0 %v1904_v49  ;;  %v1847_v54 = vld [vmem:[%s8161_s13 + $0x98] sm:$0xff] }
 0x25d   :  { %v1772_v41 = vpop.f32.mrb[69].mxu0  ;;  %v8845_v40 = vadd.f32 %v1770_v2, %v8839_v63  ;;  %10287 = vst [vmem:[#allocation23_spill] sm:$0xff] %v8914_v46  ;;  %v1830_v2 = vld [vmem:[%s8161_s13 + $0x10] sm:$0xff]  ;;  %7411 = vmatprep.subr.bf16.mxu0 %v8914_v46 }
 0x25e   :  { %v8848_v5 = vadd.f32 %v1772_v41, %v8839_v63  ;;  %7403 = vmatprep.subr.bf16.mxu1 %v7402_v51  ;;  %v1774_v58 = vpop.f32.mrb[70].mxu0  ;;  %v7164_v0 = vpop.f32.mrb[64].mxu1  ;;  %v8924_v51 = vpack.c.bf16 %v1847_v54, %v1846_v53  ;;  %v1831_v41 = vld [vmem:[%s8161_s13 + $0x18] sm:$0xff] }
 0x25f   :  { %7405 = vmatpush3.bf16.msra.mxu1 %v7404_v4  ;;  %v1908_v44 = vsel %vm1907_vm6, %v8845_v40, -inf  ;;  %v1775_v56 = vpop.f32.mrb[71].mxu0  ;;  %v1564_v6 = vpop.f32.mrb[65].mxu1  ;;  %v8861_v22 = vadd.f32 %v7164_v0, %v8758_v59  ;;  %v1848_v58 = vld [vmem:[%s8161_s13 + $0xa0] sm:$0xff] }
 0x260   :  { %7407 = vmatprep.subr.bf16.mxu1 %v7406_v1  ;;  %v1909_v14 = vsel %vm1907_vm6, %v8848_v5, -inf  ;;  %v7165_v8 = vpop.f32.mrb[66].mxu1  ;;  %v8864_v13 = vadd.f32 %v8758_v59, %v1564_v6  ;;  %v8922_v1 = vpack.c.bf16 %v1829_v29, %v1828_v39  ;;  %10289 = vst [vmem:[#allocation25_spill] sm:$0xff] %v8924_v51  ;;  %v8938_v6 = vpack.c.bf16 %v1831_v41, %v1830_v2  ;;  %v1834_v41 = vld [vmem:[%s8161_s13 + $0x30] sm:$0xff] }
 0x261   :  { %v1910_v26 = vmax.f32 %v1908_v44, %v1909_v14  ;;  %v1567_v50 = vpop.f32.mrb[67].mxu1  ;;  %v8867_v4 = vadd.f32 %v7165_v8, %v8758_v59  ;;  %v1849_v14 = vld [vmem:[%s8161_s13 + $0xa8] sm:$0xff]  ;;  %v1836_v8 = vld [vmem:[%s8161_s13 + $0x40] sm:$0xff] }
 0x262   :  { %v8870_v9 = vadd.f32 %v8758_v59, %v1567_v50  ;;  %10288 = vst [vmem:[#allocation24_spill] sm:$0xff] %v8922_v1  ;;  %7413 = vmatpush3.bf16.msra.mxu0 %v8922_v1  ;;  %10291 = vst [vmem:[#allocation27_spill] sm:$0xff] %v8938_v6 }
 0x263   :  { %7409 = vmatpush3.bf16.msra.mxu1 %v7408_v3  ;;  %1911 = vmax.xlane.f32.xlu0 %v1910_v26 }
 0x264   :  { %7415 = vmatprep.subr.bf16.mxu0 %v8924_v51 }
 0x266   :  { %v7168_v3 = vpop.f32.mrb[68].mxu1  ;;  %7417 = vmatpush3.bf16.msra.mxu0 %v8938_v6 }
 0x267   :  { %v1580_v10 = vpop.f32.mrb[69].mxu1  ;;  %v8877_v23 = vadd.f32 %v7168_v3, %v8758_v59 }
 0x268   :  { %v7169_v11 = vpop.f32.mrb[70].mxu1  ;;  %v8880_v15 = vadd.f32 %v8758_v59, %v1580_v10  ;;  %v8946_v10 = vpack.c.bf16 %v1849_v14, %v1848_v58  ;;  %v1835_v58 = vld [vmem:[%s8161_s13 + $0x38] sm:$0xff] }
 0x269   :  { %v1583_v12 = vpop.f32.mrb[71].mxu1  ;;  %v8883_v16 = vadd.f32 %v7169_v11, %v8758_v59  ;;  %v1832_v11 = vld [vmem:[%s8161_s13 + $0x20] sm:$0xff] }
 0x26a   :  { %v8886_v17 = vadd.f32 %v8758_v59, %v1583_v12  ;;  %10292 = vst [vmem:[#allocation28_spill] sm:$0xff] %v8946_v10  ;;  %v1833_v12 = vld [vmem:[%s8161_s13 + $0x28] sm:$0xff]  ;;  %7419 = vmatprep.subr.bf16.mxu0 %v8946_v10 }
 0x26b   :  { %v8964_v29 = vpack.c.bf16 %v1833_v12, %v1832_v11  ;;  %v1853_v11 = vld [vmem:[%s8161_s13 + $0xc8] sm:$0xff] }
 0x26d   :  { %10293 = vst [vmem:[#allocation29_spill] sm:$0xff] %v8964_v29  ;;  %7421 = vmatpush3.bf16.msra.mxu0 %v8964_v29 }
 0x26e   :  { %v7172_v19 = vpop.f32.mrb[72].mxu1 }
 0x26f   :  { %v1596_v20 = vpop.f32.mrb[73].mxu1  ;;  %v8893_v24 = vadd.f32 %v7172_v19, %v8758_v59  ;;  %v1837_v19 = vld [vmem:[%s8161_s13 + $0x48] sm:$0xff] }
 0x270   :  { %v7173_v60 = vpop.f32.mrb[74].mxu1  ;;  %v8896_v31 = vadd.f32 %v8758_v59, %v1596_v20 }
 0x271   :  { %v1599_v21 = vpop.f32.mrb[75].mxu1  ;;  %v8899_v32 = vadd.f32 %v7173_v60, %v8758_v59 }
 0x272   :  { %v8902_v30 = vadd.f32 %v8758_v59, %v1599_v21  ;;  %v1850_v21 = vld [vmem:[%s8161_s13 + $0xb0] sm:$0xff] }
 0x276   :  { %v7176_v36 = vpop.f32.mrb[76].mxu1 }
 0x277   :  { %v8912_v7 = vadd.f32 %v7176_v36, %v8758_v59  ;;  %v1612_v45 = vpop.f32.mrb[77].mxu1  ;;  %v1851_v36 = vld [vmem:[%s8161_s13 + $0xb8] sm:$0xff] }
 0x278   :  { %v8920_v47 = vadd.f32 %v8758_v59, %v1612_v45  ;;  %v7177_v49 = vpop.f32.mrb[78].mxu1  ;;  %v8972_v2 = vpack.c.bf16 %v1851_v36, %v1850_v21 }
 0x279   :  { %10286 = vst [vmem:[#allocation22_spill] sm:$0xff] %v8912_v7  ;;  %v8930_v44 = vadd.f32 %v7177_v49, %v8758_v59  ;;  %v1615_v56 = vpop.f32.mrb[79].mxu1 }
 0x27a   :  { %v8935_v26 = vadd.f32 %v8758_v59, %v1615_v56  ;;  %10294 = vst [vmem:[#allocation30_spill] sm:$0xff] %v8972_v2  ;;  %7423 = vmatprep.subr.bf16.mxu0 %v8972_v2 }
 0x27b   :  { %10290 = vst [vmem:[#allocation26_spill] sm:$0xff] %v8930_v44 }
 0x27e   :  { %v7180_v0 = vpop.f32.mrb[80].mxu1 }
 0x27f   :  { %v8943_v50 = vadd.f32 %v7180_v0, %v8758_v59  ;;  %v1628_v3 = vpop.f32.mrb[81].mxu1 }
 0x280   :  { %v8953_v20 = vadd.f32 %v8758_v59, %v1628_v3  ;;  %v7181_v60 = vpop.f32.mrb[82].mxu1  ;;  %v1852_v3 = vld [vmem:[%s8161_s13 + $0xc0] sm:$0xff] }
 0x281   :  { %v8958_v38 = vadd.f32 %v7181_v60, %v8758_v59  ;;  %v1631_v57 = vpop.f32.mrb[83].mxu1 }
 0x282   :  { %v8961_v39 = vadd.f32 %v8758_v59, %v1631_v57  ;;  %v8990_v57 = vpack.c.bf16 %v1835_v58, %v1834_v41 }
 0x284   :  { %10295 = vst [vmem:[#allocation31_spill] sm:$0xff] %v8990_v57  ;;  %7425 = vmatpush3.bf16.msra.mxu0 %v8990_v57 }
 0x286   :  { %v7184_v45 = vpop.f32.mrb[84].mxu1 }
 0x287   :  { %v8969_v54 = vadd.f32 %v7184_v45, %v8758_v59  ;;  %v1644_v49 = vpop.f32.mrb[85].mxu1 }
 0x288   :  { %v8979_v14 = vadd.f32 %v8758_v59, %v1644_v49  ;;  %v7185_v0 = vpop.f32.mrb[86].mxu1 }
 0x289   :  { %v8984_v12 = vadd.f32 %v7185_v0, %v8758_v59  ;;  %v1647_v60 = vpop.f32.mrb[87].mxu1  ;;  %v8998_v0 = vpack.c.bf16 %v1853_v11, %v1852_v3  ;;  %v9016_v3 = vpack.c.bf16 %v1837_v19, %v1836_v8 }
 0x28a   :  { %v8987_v21 = vadd.f32 %v8758_v59, %v1647_v60 }
 0x28b   :  { %10296 = vst [vmem:[#allocation32_spill] sm:$0xff] %v8998_v0  ;;  %10297 = vst [vmem:[#allocation33_spill] sm:$0xff] %v9016_v3  ;;  %7427 = vmatprep.subr.bf16.mxu0 %v8998_v0 }
 0x28c   :  { %7429 = vmatpush3.bf16.msra.mxu0 %v9016_v3  ;;  %v3038_v3 = vrot.slane %v8736_v55, 4 }
 0x28e   :  { %v7188_v36 = vpop.f32.mrb[88].mxu1  ;;  %v3039_v2 = vadd.f32 %v3038_v3, %v8736_v55 }
 0x28f   :  { %v8995_v49 = vadd.f32 %v7188_v36, %v8758_v59  ;;  %v1660_v25 = vpop.f32.mrb[89].mxu1 }
 0x290   :  { %v9005_v33 = vadd.f32 %v8758_v59, %v1660_v25  ;;  %v7189_v41 = vpop.f32.mrb[90].mxu1 }
 0x291   :  { %v9008_v58 = vadd.f32 %v7189_v41, %v8758_v59  ;;  %v1663_v48 = vpop.f32.mrb[91].mxu1 }
 0x292   :  { %v9013_v18 = vadd.f32 %v8758_v59, %v1663_v48 }
 0x294   :  { %v9010_v36 = vpop.f32.mrb[72].mxu0 }
 0x295   :  { %v9018_v11 = vpop.f32.mrb[73].mxu0 }
 0x296   :  { %v9023_v45 = vpop.f32.mrb[74].mxu0  ;;  %v7192_v52 = vpop.f32.mrb[92].mxu1 }
 0x297   :  { %v9027_v60 = vpop.f32.mrb[75].mxu0  ;;  %v9030_v48 = vadd.f32 %v7192_v52, %v8758_v59  ;;  %v1676_v8 = vpop.f32.mrb[93].mxu1 }
 0x298   :  { %v9033_v19 = vadd.f32 %v8758_v59, %v1676_v8  ;;  %v7193_v27 = vpop.f32.mrb[94].mxu1 }
 0x299   :  { %v9037_v25 = vadd.f32 %v7193_v27, %v8758_v59  ;;  %v1679_v53 = vpop.f32.mrb[95].mxu1  ;;  %v4020_v27 = vrot.slane %v8765_v28, 4 }
 0x29a   :  { %v9040_v62 = vadd.f32 %v8758_v59, %v1679_v53  ;;  %v3040_v53 = vrot.slane %v3039_v2, 2 }
 0x29b   :  { %v4021_v59 = vadd.f32 %v4020_v27, %v8765_v28 }
 0x29c   :  { %v9044_v56 = vpop.f32.mrb[76].mxu0  ;;  %v3041_v41 = vadd.f32 %v3040_v53, %v3039_v2 }
 0x29d   :  { %v9048_v8 = vpop.f32.mrb[77].mxu0  ;;  %v4022_v29 = vrot.slane %v4021_v59, 2 }
 0x29e   :  { %v1825_v0 = vpop.f32.mrb[78].mxu0  ;;  %v3042_v6 = vrot.slane %v3041_v41, 1 }
 0x29f   :  { %v1826_v57 = vpop.f32.mrb[79].mxu0  ;;  %v4023_v10 = vadd.f32 %v4022_v29, %v4021_v59 }
 0x2a0   :  { %v3043_v1 = vadd.f32 %v3042_v6, %v3041_v41 }
 0x2a1   :  { %v4024_v51 = vrot.slane %v4023_v10, 1 }
 0x2a2   :  { %v3045_v46 = vmul.f32 0.015625, %v3043_v1 }
 0x2a3   :  { %v4025_v52 = vadd.f32 %v4024_v51, %v4023_v10 }
 0x2a5   :  { %v4026_v7 = vmul.f32 0.015625, %v4025_v52 }
 0x2a7   :  { %v9055_v57 = vsel %vm4044_vm7, %v3045_v46, %v4026_v7 }
 0x2a8   :  { %10298 = vst [vmem:[#allocation34_spill] sm:$0xff] %v9055_v57 }
 0x2e7   :  { %v1903_v0 = vpop.xlane.xlu1 %1902 }
 0x2e8   :  { %v1913_v44 = vsub.f32 %v8820_v61, %v1903_v0  ;;  %v1914_v55 = vsub.f32 %v8823_v37, %v1903_v0 }
 0x2e9   :  { %v1906_v28 = vpop.xlane.xlu0 %1905 }
 0x2ea   :  { %v1919_v3 = vmul.f32 1.442695, %v1913_v44  ;;  %v1921_v27 = vmul.f32 1.442695, %v1914_v55  ;;  %v1915_v29 = vsub.f32 %v8826_v42, %v1906_v28  ;;  %v1916_v2 = vsub.f32 %v8829_v43, %v1906_v28  ;;  %v1854_v55 = vld [vmem:[%s8161_s13 + $0xd0] sm:$0xff]  ;;  %v1855_v28 = vld [vmem:[%s8161_s13 + $0xd8] sm:$0xff] }
 0x2ec   :  { %7965 = vpow2.f32 %v1919_v3  ;;  %v1923_v51 = vmul.f32 1.442695, %v1915_v29  ;;  %v1925_v1 = vmul.f32 1.442695, %v1916_v2  ;;  %v9067_v3 = vpack.c.bf16 %v1855_v28, %v1854_v55  ;;  %v1839_v29 = vld [vmem:[%s8161_s13 + $0x58] sm:$0xff] }
 0x2ed   :  { %7967 = vpow2.f32 %v1921_v27  ;;  %v1838_v27 = vld [vmem:[%s8161_s13 + $0x50] sm:$0xff] }
 0x2ee   :  { %7969 = vpow2.f32 %v1923_v51  ;;  %v9071_v2 = vpack.c.bf16 %v1839_v29, %v1838_v27  ;;  %7431 = vmatprep.subr.bf16.mxu0 %v9067_v3  ;;  %v1856_v51 = vld [vmem:[%s8161_s13 + $0xe0] sm:$0xff] }
 0x2ef   :  { %7971 = vpow2.f32 %v1925_v1  ;;  %v1857_v1 = vld [vmem:[%s8161_s13 + $0xe8] sm:$0xff] }
 0x2f0   :  { %v1912_v7 = vpop.xlane.xlu0 %1911  ;;  %7433 = vmatpush3.bf16.msra.mxu0 %v9071_v2 }
 0x2f1   :  { %v1917_v46 = vsub.f32 %v8845_v40, %v1912_v7  ;;  %v1918_v61 = vsub.f32 %v8848_v5, %v1912_v7  ;;  %v9077_v7 = vpack.c.bf16 %v1857_v1, %v1856_v51 }
 0x2f3   :  { %v1927_v6 = vmul.f32 1.442695, %v1917_v46  ;;  %v1929_v37 = vmul.f32 1.442695, %v1918_v61  ;;  %10299 = vst [vmem:[#allocation35_spill] sm:$0xff] %v9077_v7  ;;  %v1840_v46 = vld [vmem:[%s8161_s13 + $0x60] sm:$0xff]  ;;  %7435 = vmatprep.subr.bf16.mxu0 %v9077_v7 }
 0x2f4   :  { %v1841_v61 = vld [vmem:[%s8161_s13 + $0x68] sm:$0xff] }
 0x2f5   :  { %7973 = vpow2.f32 %v1927_v6  ;;  %v9081_v6 = vpack.c.bf16 %v1841_v61, %v1840_v46 }
 0x2f6   :  { %v7966_v44 = vpop.eup %7965  ;;  %7975 = vpow2.f32 %v1929_v37  ;;  %v1858_v37 = vld [vmem:[%s8161_s13 + $0xf0] sm:$0xff] }
 0x2f7   :  { %v7968_v42 = vpop.eup %7967  ;;  %10300 = vst [vmem:[#allocation36_spill] sm:$0xff] %v9081_v6  ;;  %7437 = vmatpush3.bf16.msra.mxu0 %v9081_v6 }
 0x2f8   :  { %v7970_v43 = vpop.eup %7969  ;;  %v1931_v10 = vadd.f32 %v7968_v42, %v7966_v44 }
 0x2f9   :  { %v7972_v41 = vpop.eup %7971 }
 0x2fa   :  { %1932 = vadd.xlane.f32.xlu1 %v1931_v10  ;;  %v1934_v52 = vadd.f32 %v7972_v41, %v7970_v43  ;;  %v1859_v10 = vld [vmem:[%s8161_s13 + $0xf8] sm:$0xff] }
 0x2fc   :  { %1935 = vadd.xlane.f32.xlu0 %v1934_v52  ;;  %v9087_v52 = vpack.c.bf16 %v1859_v10, %v1858_v37 }
 0x2fe   :  { %10301 = vst [vmem:[#allocation37_spill] sm:$0xff] %v9087_v52  ;;  %7439 = vmatprep.subr.bf16.mxu0 %v9087_v52  ;;  %v9149_v52 = vld [vmem:[%s10315_s9] ss:$0 sm:$0xff]  ;;  %s8134_s9 = smov 64  }
 0x2ff   :  { %v7974_v40 = vpop.eup %7973 }
 0x300   :  { %v7976_v5 = vpop.eup %7975  ;;  %v1937_v59 = vsel %vm1907_vm6, %v7974_v40, 0.0 }
 0x301   :  { %v1938_v53 = vsel %vm1907_vm6, %v7976_v5, 0.0 }
 0x302   :  { %v1939_v0 = vadd.f32 %v1938_v53, %v1937_v59  ;;  %v1842_v59 = vld [vmem:[%s8161_s13 + $0x70] sm:$0xff]  ;;  %v1843_v53 = vld [vmem:[%s8161_s13 + $0x78] sm:$0xff]  ;;  %s10316_s13 = sld [smem:[#allocation12_spill]] }
 0x304   :  { %1940 = vadd.xlane.f32.xlu1 %v1939_v0  ;;  %v9091_v0 = vpack.c.bf16 %v1843_v53, %v1842_v59 }
 0x306   :  { %10302 = vst [vmem:[#allocation38_spill] sm:$0xff] %v9091_v0  ;;  %7441 = vmatpush3.bf16.msra.mxu0 %v9091_v0 }
 0x387   :  { %v1933_v55 = vpop.xlane.xlu1 %1932 }
 0x388   :  { %7977 = vrcp.f32 %v1933_v55  ;;  %v9096_v55 = vld [vmem:[%s8216_s6] ss:$0 sm:$0xff]  ;;  %s8118_s6 = smov 105  }
 0x389   :  { %v1936_v28 = vpop.xlane.xlu0 %1935  ;;  %10303 = vst [vmem:[#allocation39_spill] sm:$0xff] %v9096_v55 }
 0x38a   :  { %7979 = vrcp.f32 %v1936_v28 }
 0x391   :  { %v1941_v27 = vpop.xlane.xlu1 %1940 }
 0x392   :  { %v7978_v29 = vpop.eup %7977  ;;  %7981 = vrcp.f32 %v1941_v27 }
 0x393   :  { %v1943_v51 = vmul.f32 %v7978_v29, %v7966_v44  ;;  %v1944_v1 = vmul.f32 %v7978_v29, %v7968_v42 }
 0x394   :  { %v7980_v46 = vpop.eup %7979 }
 0x395   :  { %2015 = vmatprep.mubr.f32.mxu1 %v1944_v1  ;;  %2095 = vmatprep.mubr.f32.mxu0 %v1944_v1  ;;  %v1947_v61 = vmul.f32 %v7980_v46, %v7972_v41  ;;  %v1946_v37 = vmul.f32 %v7980_v46, %v7970_v43 }
 0x396   :  { %2016 = vmatmul.mubr.f32.vlgmr.msra.gmra.mrb[96].mxu1 %v1943_v51  ;;  %2096 = vmatmul.mubr.f32.vlgmr.msra.gmra.mrb[80].mxu0 %v1943_v51 }
 0x397   :  { %2020 = vmatprep.mubr.f32.mxu1 %v1947_v61  ;;  %2100 = vmatprep.mubr.f32.mxu0 %v1947_v61 }
 0x39a   :  { %2021 = vmatmul.mubr.f32.gmra.mrb[98].mxu1 %v1946_v37  ;;  %2101 = vmatmul.mubr.f32.gmra.mrb[82].mxu0 %v1946_v37 }
 0x39c   :  { %v7982_v10 = vpop.eup %7981 }
 0x39d   :  { %v1950_v59 = vmul.f32 %v7982_v10, %v7976_v5  ;;  %v1949_v53 = vmul.f32 %v7982_v10, %v7974_v40 }
 0x39f   :  { %2025 = vmatprep.mubr.f32.mxu1 %v1950_v59  ;;  %2105 = vmatprep.mubr.f32.mxu0 %v1950_v59 }
 0x3a0   :  { %2026 = vmatmul.mubr.f32.gmra.mrb[100].mxu1 %v1949_v53  ;;  %2106 = vmatmul.mubr.f32.gmra.mrb[84].mxu0 %v1949_v53 }
 0x469   :  { %v6751_v44 = vpop.f32.mrb[96].mxu1  ;;  %v6792_v42 = vpop.f32.mrb[80].mxu0 }
 0x46a   :  { %v6752_v41 = vpop.f32.mrb[97].mxu1  ;;  %v6793_v28 = vpop.f32.mrb[81].mxu0 }
 0x46b   :  { %v9098_v27 = vadd.f32 %v6752_v41, %v6751_v44  ;;  %v9100_v29 = vadd.f32 %v6793_v28, %v6792_v42 }
 0x46d   :  { %10304 = vst [vmem:[#allocation40_spill] sm:$0xff] %v9098_v27  ;;  %10305 = vst [vmem:[#allocation41_spill] sm:$0xff] %v9100_v29  ;;  %v2117_v43 = vadd.f32 %v9098_v27, %v9096_v55  ;;  %v6754_v51 = vpop.f32.mrb[98].mxu1  ;;  %v6795_v5 = vpop.f32.mrb[82].mxu0 }
 0x46e   :  { %v6755_v40 = vpop.f32.mrb[99].mxu1  ;;  %v6796_v1 = vpop.f32.mrb[83].mxu0 }
 0x46f   :  { %v9104_v46 = vmax.f32 %v2117_v43, 0.0  ;;  %v9106_v61 = vadd.f32 %v6755_v40, %v6754_v51  ;;  %v9108_v37 = vadd.f32 %v6796_v1, %v6795_v5 }
 0x471   :  { %10306 = vst [vmem:[#allocation42_spill] sm:$0xff] %v9104_v46  ;;  %10307 = vst [vmem:[#allocation43_spill] sm:$0xff] %v9106_v61  ;;  %v2118_v10 = vadd.f32 %v9106_v61, %v9096_v55  ;;  %v2139_v59 = vsel %vm1273_vm5, %v9104_v46, 0.0 }
 0x472   :  { %10308 = vst [vmem:[#allocation44_spill] sm:$0xff] %v9108_v37  ;;  %2140 = vadd.xlane.f32.xlu0 %v2139_v59 }
 0x473   :  { %v9114_v53 = vmax.f32 %v2118_v10, 0.0  ;;  %v6757_v44 = vpop.f32.mrb[100].mxu1  ;;  %v6798_v42 = vpop.f32.mrb[84].mxu0 }
 0x474   :  { %v6758_v41 = vpop.f32.mrb[101].mxu1  ;;  %v6799_v28 = vpop.f32.mrb[85].mxu0 }
 0x475   :  { %10309 = vst [vmem:[#allocation45_spill] sm:$0xff] %v9114_v53  ;;  %v9116_v57 = vadd.f32 %v6758_v41, %v6757_v44  ;;  %v9118_v43 = vadd.f32 %v6799_v28, %v6798_v42  ;;  %v2142_v51 = vsel %vm1273_vm5, %v9114_v53, 0.0 }
 0x476   :  { %2143 = vadd.xlane.f32.xlu1 %v2142_v51 }
 0x477   :  { %10310 = vst [vmem:[#allocation46_spill] sm:$0xff] %v9116_v57  ;;  %10311 = vst [vmem:[#allocation47_spill] sm:$0xff] %v9118_v43  ;;  %v2119_v5 = vadd.f32 %v9116_v57, %v9096_v55 }
 0x479   :  { %v9124_v40 = vmax.f32 %v2119_v5, 0.0 }
 0x47b   :  { %10312 = vst [vmem:[#allocation48_spill] sm:$0xff] %v9124_v40  ;;  %v2146_v1 = vsel %vm2145_vm8, %v9124_v40, 0.0 }
 0x47c   :  { %2147 = vadd.xlane.f32.xlu0 %v2146_v1 }
 0x4ff   :  { %v2141_v10 = vpop.xlane.xlu0 %2140 }
 0x500   :  { %v2150_v59 = vmul.f32 0.03125, %v2141_v10 }
 0x502   :  { %v2153_v44 = vsub.f32 %v9104_v46, %v2150_v59 }
 0x503   :  { %v2144_v42 = vpop.xlane.xlu1 %2143 }
 0x504   :  { %v2151_v41 = vmul.f32 0.03125, %v2144_v42  ;;  %v2156_v28 = vmul.f32 %v2153_v44, %v2153_v44  ;;  %v9135_v42 = vld [vmem:[%s10313_s0] sm:$0xff]  }
 0x505   :  { %7194 = vmatprep.subr.bf16.mxu1 %v9135_v42 }
 0x506   :  { %v2154_v51 = vsub.f32 %v9114_v53, %v2151_v41  ;;  %v2159_v37 = vsel %vm1273_vm5, %v2156_v28, 0.0  ;;  %7195 = vmatpush3.bf16.msra.mxu1 %v9135_v42 }
 0x507   :  { %2160 = vadd.xlane.f32.xlu1 %v2159_v37  ;;  %v9140_v37 = vld [vmem:[%s10313_s0 + $0x8] sm:$0xff]   ;;  %s8132_s0 = smov 106  }
 0x508   :  { %v2157_v5 = vmul.f32 %v2154_v51, %v2154_v51  ;;  %7196 = vmatprep.subr.bf16.mxu1 %v9140_v37 }
 0x509   :  { %v2148_v29 = vpop.xlane.xlu0 %2147 }
 0x50a   :  { %v2152_v43 = vmul.f32 0.03125, %v2148_v29  ;;  %v2162_v1 = vsel %vm1273_vm5, %v2157_v5, 0.0  ;;  %7197 = vmatpush3.bf16.msra.mxu1 %v9140_v37  ;;  %v9145_v29 = vld [vmem:[%s10314_s5] sm:$0xff]  }
 0x50b   :  { %2163 = vadd.xlane.f32.xlu0 %v2162_v1  ;;  %7202 = vmatprep.subr.bf16.mxu1 %v9145_v29 }
 0x50c   :  { %v2155_v10 = vsub.f32 %v9124_v40, %v2152_v43 }
 0x50e   :  { %v2158_v59 = vmul.f32 %v2155_v10, %v2155_v10 }
 0x510   :  { %v2165_v61 = vsel %vm2145_vm8, %v2158_v59, 0.0 }
 0x511   :  { %2166 = vadd.xlane.f32.xlu1 %v2165_v61 }
 0x594   :  { %v2161_v43 = vpop.xlane.xlu1 %2160 }
 0x595   :  { %v2168_v41 = vmul.f32 0.03125, %v2161_v43 }
 0x597   :  { %v2171_v61 = vadd.f32 1e-05, %v2168_v41  ;;  %v9153_v41 = vld [vmem:[%s10316_s13] ss:$0 sm:$0xff]  ;;  %s10386_s13 = sld [smem:[#allocation15_spill]] }
 0x598   :  { %v2164_v28 = vpop.xlane.xlu0 %2163 }
 0x599   :  { %7983 = vrsqrt.f32 %v2171_v61  ;;  %v2169_v5 = vmul.f32 0.03125, %v2164_v28 }
 0x59b   :  { %v2172_v1 = vadd.f32 1e-05, %v2169_v5 }
 0x59d   :  { %7985 = vrsqrt.f32 %v2172_v1 }
 0x59e   :  { %v2167_v59 = vpop.xlane.xlu1 %2166 }
 0x59f   :  { %v2170_v27 = vmul.f32 0.03125, %v2167_v59 }
 0x5a1   :  { %v2173_v57 = vadd.f32 1e-05, %v2170_v27 }
 0x5a3   :  { %v7984_v0 = vpop.eup %7983  ;;  %7987 = vrsqrt.f32 %v2173_v57 }
 0x5a4   :  { %v2177_v55 = vmul.f32 %v7984_v0, %v2153_v44 }
 0x5a6   :  { %v2186_v43 = vmul.f32 %v9149_v52, %v2177_v55 }
 0x5a7   :  { %v7986_v6 = vpop.eup %7985 }
 0x5a8   :  { %v2178_v7 = vmul.f32 %v7986_v6, %v2154_v51  ;;  %v2195_v28 = vadd.f32 %v9153_v41, %v2186_v43  ;;  %v9162_v51 = vld [vmem:[%s10314_s5 + $0x8] sm:$0xff]   ;;  %s8133_s5 = smov 48  }
 0x5a9   :  { %10318 = vst [vmem:[#allocation49_spill] sm:$0xff] %v9162_v51 }
 0x5aa   :  { %v2187_v61 = vmul.f32 %v9149_v52, %v2178_v7  ;;  %v9169_v7 = vld [vmem:[%s10317_s17] sm:$0xff]  }
 0x5ab   :  { %10319 = vst [vmem:[#allocation50_spill] sm:$0xff] %v9169_v7 }
 0x5ac   :  { %v2196_v5 = vadd.f32 %v9153_v41, %v2187_v61 }
 0x5ad   :  { %v7988_v27 = vpop.eup %7987 }
 0x5ae   :  { %v2179_v57 = vmul.f32 %v7988_v27, %v2155_v10  ;;  %v2198_v0 = vpack.c.bf16 %v2196_v5, %v2195_v28  ;;  %v9174_v10 = vld [vmem:[%s10317_s17 + $0x8] sm:$0xff]   ;;  %s10390_s17 = sld [smem:[#allocation18_spill]] }
 0x5af   :  { %10320 = vst [vmem:[#allocation51_spill] sm:$0xff] %v9174_v10 }
 0x5b0   :  { %v2188_v44 = vmul.f32 %v9149_v52, %v2179_v57  ;;  %7198 = vmatprep.mubr.msk.bf16.mxu1 %vm1273_vm5, %v2198_v0 }
 0x5b2   :  { %v2197_v6 = vadd.f32 %v9153_v41, %v2188_v44 }
 0x5b4   :  { %v2199_v55 = vpack.c.bf16 %v2197_v6, %v2197_v6 }
 0x5b6   :  { %7199 = vmatmul.mubr.msk.bf16.vlgmr.msra.gmra.mrb[104].mxu1 %vm1273_vm5, %v2199_v55 }
 0x5b7   :  { %7203 = vmatpush3.bf16.msra.mxu1 %v9145_v29  ;;  %7206 = vmatprep.mubr.msk.bf16.mxu1 %vm1273_vm5, %v2198_v0 }
 0x5b8   :  { %7204 = vmatprep.subr.bf16.mxu1 %v9162_v51 }
 0x5bb   :  { %7205 = vmatpush3.bf16.msra.mxu1 %v9162_v51 }
 0x5bc   :  { %7210 = vmatprep.subr.bf16.mxu1 %v9169_v7 }
 0x5be   :  { %7207 = vmatmul.mubr.msk.bf16.vlgmr.msra.gmra.mrb[108].mxu1 %vm1273_vm5, %v2199_v55 }
 0x5bf   :  { %7211 = vmatpush3.bf16.msra.mxu1 %v9169_v7  ;;  %7214 = vmatprep.mubr.msk.bf16.mxu1 %vm1273_vm5, %v2198_v0 }
 0x5c0   :  { %7212 = vmatprep.subr.bf16.mxu1 %v9174_v10 }
 0x5c3   :  { %7213 = vmatpush3.bf16.msra.mxu1 %v9174_v10  ;;  %v9190_v10 = vld [vmem:[%s10321_s21] sm:$0xff]  }
 0x5c4   :  { %10323 = vst [vmem:[#allocation53_spill] sm:$0xff] %v9190_v10 }
 0x5c6   :  { %7215 = vmatmul.mubr.msk.bf16.vlgmr.msra.gmra.mrb[112].mxu1 %vm1273_vm5, %v2199_v55 }
 0x689   :  { %v7200_v1 = vpop.f32.mrb[104].mxu1 }
 0x68a   :  { %v2252_v59 = vpop.f32.mrb[105].mxu1 }
 0x68b   :  { %v7201_v43 = vpop.f32.mrb[106].mxu1 }
 0x68c   :  { %v2255_v61 = vpop.f32.mrb[107].mxu1  ;;  %v10251_v43 = vmov 65535  }
 0x68d   :  { %v2386_v28 = vpack.c.bf16 %v2255_v61, %v2252_v59  ;;  %v2500_v59 = vsel %vm2498_vm9, 4294967295, %v10251_v43  ;;  %v2387_v43 = vpack.c.bf16 %v7200_v1, %v7200_v1  ;;  %vm2974_vm9 = vcmask 957440  }
 0x68f   :  { %7222 = vmatprep.mubr.msk.bf16.mxu0 %vm1273_vm5, %v2386_v28 }
 0x691   :  { %v7208_v5 = vpop.f32.mrb[108].mxu1 }
 0x692   :  { %v2312_v27 = vpop.f32.mrb[109].mxu1  ;;  %v2389_v0 = vpack.c.bf16 %v7208_v5, %v7208_v5 }
 0x693   :  { %v7209_v57 = vpop.f32.mrb[110].mxu1 }
 0x694   :  { %v2315_v44 = vpop.f32.mrb[111].mxu1 }
 0x695   :  { %v2388_v6 = vpack.c.bf16 %v2315_v44, %v2312_v27  ;;  %v9187_v27 = vsel %vm2499_vm10, %v2500_v59, 0  ;;  %vm2982_vm10 = vcmask 7168  }
 0x696   :  { %10322 = vst [vmem:[#allocation52_spill] sm:$0xff] %v9187_v27 }
 0x697   :  { %v2397_v7 = vsel %vm1273_vm5, %v2388_v6, 0  ;;  %7523 = vmatprep.subr.msk.bf16.mxu0 %vm1273_vm5, %v2388_v6  ;;  %v2400_v6 = vsel %vm1273_vm5, %v2389_v0, 0 }
 0x698   :  { %7219 = vmatpush3.bf16.xpose.msra.mxu0 %v2397_v7 }
 0x699   :  { %v7216_v55 = vpop.f32.mrb[112].mxu1  ;;  %7524 = vmatprep.subr.msk.bf16.mxu0 %vm1273_vm5, %v2389_v0  ;;  %v10325_v0 = vpack.c.bf16 %v8961_v39, %v8953_v20 }
 0x69a   :  { %v2372_v61 = vpop.f32.mrb[113].mxu1  ;;  %v2491_v28 = vpack.c.bf16 %v7216_v55, %v7216_v55  ;;  %v9196_v55 = vld [vmem:[%s10321_s21 + $0x8] sm:$0xff]   ;;  %s10392_s21 = sld [smem:[#allocation20_spill]] }
 0x69b   :  { %v7217_v57 = vpop.f32.mrb[114].mxu1  ;;  %10324 = vst [vmem:[#allocation54_spill] sm:$0xff] %v9196_v55 }
 0x69c   :  { %v2375_v44 = vpop.f32.mrb[115].mxu1  ;;  %v2503_v7 = vand.u32 %v9187_v27, %v2491_v28 }
 0x69d   :  { %v2490_v5 = vpack.c.bf16 %v2375_v44, %v2372_v61 }
 0x69f   :  { %7226 = vmatprep.subr.bf16.mxu1 %v2490_v5 }
 0x6a0   :  { %7221 = vmatpush3.bf16.xpose.msra.mxu0 %v2400_v6  ;;  %7227 = vmatpush3.bf16.msra.mxu1 %v2490_v5 }
 0x6a1   :  { %7228 = vmatprep.subr.bf16.mxu1 %v2503_v7  ;;  %7242 = vmatprep.subr.bf16.mxu0 %v9190_v10 }
 0x6a4   :  { %7229 = vmatpush3.bf16.msra.mxu1 %v2503_v7 }
 0x6a7   :  { %7223 = vmatmul.mubr.msk.bf16.vlgmr.msra.gmra.mrb[88].mxu0 %vm1273_vm5, %v2387_v43 }
 0x6a8   :  { %7243 = vmatpush3.bf16.msra.mxu0 %v9190_v10 }
 0x6a9   :  { %7244 = vmatprep.subr.bf16.mxu0 %v9196_v55 }
 0x6ac   :  { %7245 = vmatpush3.bf16.msra.mxu0 %v9196_v55 }
 0x6ad   :  { %7443 = vmatprep.subr.bf16.mxu0 %v10325_v0 }
 0x77a   :  { %v7224_v59 = vpop.f32.mrb[88].mxu0 }
 0x77b   :  { %v2436_v61 = vpop.f32.mrb[89].mxu0  ;;  %v2452_v44 = vmul.f32 0.17677669, %v7224_v59 }
 0x77c   :  { %v2450_v28 = vmul.f32 0.17677669, %v2436_v61  ;;  %v7225_v57 = vpop.f32.mrb[90].mxu0 }
 0x77d   :  { %v2439_v1 = vpop.f32.mrb[91].mxu0  ;;  %v2461_v7 = vsel %vm2460_vm12, %v2452_v44, -inf }
 0x77e   :  { %v2451_v5 = vmul.f32 0.17677669, %v2439_v1  ;;  %v2454_v43 = vsel %vm2453_vm11, %v2450_v28, -inf }
 0x77f   :  { %2455 = vmax.xlane.f32.xlu0 %v2454_v43 }
 0x780   :  { %v2457_v6 = vsel %vm2453_vm11, %v2451_v5, -inf }
 0x781   :  { %2458 = vmax.xlane.f32.xlu1 %v2457_v6 }
 0x783   :  { %2462 = vmax.xlane.f32.xlu0 %v2461_v7 }
 0x80c   :  { %v2456_v20 = vpop.xlane.xlu0 %2455 }
 0x80d   :  { %v2464_v39 = vsub.f32 %v2450_v28, %v2456_v20 }
 0x80e   :  { %v2459_v0 = vpop.xlane.xlu1 %2458 }
 0x80f   :  { %v2467_v55 = vmul.f32 1.442695, %v2464_v39  ;;  %v2465_v10 = vsub.f32 %v2451_v5, %v2459_v0  ;;  %v9212_v5 = vld [vmem:[%s10326_s25] sm:$0xff]  }
 0x810   :  { %v2463_v61 = vpop.xlane.xlu0 %2462  ;;  %7234 = vmatprep.subr.bf16.mxu1 %v9212_v5 }
 0x811   :  { %7989 = vpow2.f32 %v2467_v55  ;;  %v2469_v59 = vmul.f32 1.442695, %v2465_v10  ;;  %v2466_v57 = vsub.f32 %v2452_v44, %v2463_v61 }
 0x813   :  { %7991 = vpow2.f32 %v2469_v59  ;;  %v2471_v1 = vmul.f32 1.442695, %v2466_v57 }
 0x815   :  { %7993 = vpow2.f32 %v2471_v1 }
 0x81b   :  { %v7990_v43 = vpop.eup %7989 }
 0x81c   :  { %v2473_v27 = vsel %vm2453_vm11, %v7990_v43, 0.0 }
 0x81d   :  { %v7992_v6 = vpop.eup %7991  ;;  %2474 = vadd.xlane.f32.xlu1 %v2473_v27 }
 0x81e   :  { %v2476_v7 = vsel %vm2453_vm11, %v7992_v6, 0.0 }
 0x81f   :  { %v7994_v51 = vpop.eup %7993  ;;  %2477 = vadd.xlane.f32.xlu0 %v2476_v7  ;;  %v9219_v7 = vld [vmem:[%s10326_s25 + $0x8] sm:$0xff]   ;;  %s10395_s25 = sld [smem:[#allocation19_spill]] }
 0x820   :  { %v2479_v28 = vsel %vm2460_vm12, %v7994_v51, 0.0 }
 0x821   :  { %2480 = vadd.xlane.f32.xlu1 %v2479_v28 }
 0x8aa   :  { %v2475_v10 = vpop.xlane.xlu1 %2474 }
 0x8ab   :  { %7995 = vrcp.f32 %v2475_v10 }
 0x8ac   :  { %v2478_v55 = vpop.xlane.xlu0 %2477 }
 0x8ad   :  { %7997 = vrcp.f32 %v2478_v55 }
 0x8ae   :  { %v2481_v44 = vpop.xlane.xlu1 %2480 }
 0x8af   :  { %7999 = vrcp.f32 %v2481_v44 }
 0x8b5   :  { %v7996_v20 = vpop.eup %7995 }
 0x8b6   :  { %v2485_v39 = vmul.f32 %v7996_v20, %v7990_v43 }
 0x8b7   :  { %v7998_v27 = vpop.eup %7997 }
 0x8b8   :  { %v2486_v0 = vmul.f32 %v7998_v27, %v7992_v6 }
 0x8b9   :  { %v8000_v61 = vpop.eup %7999 }
 0x8ba   :  { %v2487_v59 = vmul.f32 %v8000_v61, %v7994_v51  ;;  %v2488_v57 = vpack.c.bf16 %v2486_v0, %v2485_v39 }
 0x8bc   :  { %7230 = vmatprep.mubr.msk.bf16.mxu1 %vm2453_vm11, %v2488_v57  ;;  %v2489_v1 = vpack.c.bf16 %v2487_v59, %v2487_v59 }
 0x8be   :  { %7231 = vmatmul.mubr.msk.bf16.vlgmr.msra.gmra.mrb[116].mxu1 %vm2453_vm11, %v2489_v1  ;;  %v1812_v1 = vadd.f32 %v9010_v36, %v8811_v35 }
 0x8bf   :  { %7235 = vmatpush3.bf16.msra.mxu1 %v9212_v5 }
 0x8c0   :  { %7236 = vmatprep.subr.bf16.mxu1 %v9219_v7 }
 0x8c3   :  { %7237 = vmatpush3.bf16.msra.mxu1 %v9219_v7 }
 0x991   :  { %v7232_v28 = vpop.f32.mrb[116].mxu1 }
 0x992   :  { %v2539_v10 = vpop.f32.mrb[117].mxu1  ;;  %v2554_v51 = vpack.c.bf16 %v7232_v28, %v7232_v28  ;;  %v1814_v28 = vadd.f32 %v9018_v11, %v8811_v35 }
 0x993   :  { %v7233_v43 = vpop.f32.mrb[118].mxu1 }
 0x994   :  { %v2542_v6 = vpop.f32.mrb[119].mxu1  ;;  %v1824_v43 = vadd.f32 %v9048_v8, %v8839_v63  ;;  %v3046_v36 = vmax.f32 %v1812_v1, %v1814_v28 }
 0x995   :  { %v2553_v55 = vpack.c.bf16 %v2542_v6, %v2539_v10  ;;  %v1822_v10 = vadd.f32 %v9044_v56, %v8839_v63 }
 0x996   :  { %v3053_v11 = vsel %vm1907_vm6, %v1824_v43, -inf }
 0x997   :  { %7238 = vmatprep.mubr.msk.bf16.mxu1 %vm1273_vm5, %v2553_v55  ;;  %v1816_v55 = vadd.f32 %v9023_v45, %v8817_v34  ;;  %v3052_v56 = vsel %vm1907_vm6, %v1822_v10, -inf }
 0x998   :  { %7239 = vmatmul.mubr.msk.bf16.vlgmr.msra.gmra.mrb[120].mxu1 %vm1273_vm5, %v2554_v51  ;;  %v1818_v51 = vadd.f32 %v9027_v60, %v8817_v34  ;;  %v3054_v8 = vmax.f32 %v3052_v56, %v3053_v11 }
 0x99a   :  { %v3049_v63 = vmax.f32 %v1816_v55, %v1818_v51 }
 0xa6b   :  { %v7240_v44 = vpop.f32.mrb[120].mxu1 }
 0xa6c   :  { %v2607_v20 = vpop.f32.mrb[121].mxu1  ;;  %v9229_v61 = vadd.f32 %v7240_v44, %v9124_v40 }
 0xa6d   :  { %v9226_v27 = vadd.f32 %v2607_v20, %v9104_v46  ;;  %v7241_v39 = vpop.f32.mrb[122].mxu1 }
 0xa6e   :  { %v2610_v0 = vpop.f32.mrb[123].mxu1  ;;  %10328 = vst [vmem:[#allocation56_spill] sm:$0xff] %v9229_v61  ;;  %v2630_v35 = vsel %vm2145_vm8, %v9229_v61, 0.0 }
 0xa6f   :  { %10327 = vst [vmem:[#allocation55_spill] sm:$0xff] %v9226_v27  ;;  %v9232_v59 = vadd.f32 %v2610_v0, %v9114_v53  ;;  %v2624_v57 = vsel %vm1273_vm5, %v9226_v27, 0.0 }
 0xa70   :  { %2625 = vadd.xlane.f32.xlu0 %v2624_v57 }
 0xa71   :  { %10329 = vst [vmem:[#allocation57_spill] sm:$0xff] %v9232_v59  ;;  %v2627_v6 = vsel %vm1273_vm5, %v9232_v59, 0.0 }
 0xa72   :  { %2628 = vadd.xlane.f32.xlu1 %v2627_v6 }
 0xa74   :  { %2631 = vadd.xlane.f32.xlu0 %v2630_v35 }
 0xa76   :  { %3047 = vmax.xlane.f32.xlu1 %v3046_v36 }
 0xa78   :  { %3050 = vmax.xlane.f32.xlu0 %v3049_v63 }
 0xa7a   :  { %3055 = vmax.xlane.f32.xlu1 %v3054_v8 }
 0xafd   :  { %v2626_v44 = vpop.xlane.xlu0 %2625 }
 0xafe   :  { %v2633_v45 = vmul.f32 0.03125, %v2626_v44 }
 0xaff   :  { %v2629_v20 = vpop.xlane.xlu1 %2628 }
 0xb00   :  { %v9255_v34 = vsub.f32 %v9226_v27, %v2633_v45  ;;  %v2634_v60 = vmul.f32 0.03125, %v2629_v20 }
 0xb01   :  { %v2632_v39 = vpop.xlane.xlu0 %2631 }
 0xb02   :  { %v9258_v0 = vsub.f32 %v9232_v59, %v2634_v60  ;;  %v2635_v57 = vmul.f32 0.03125, %v2632_v39  ;;  %v2639_v6 = vmul.f32 %v9255_v34, %v9255_v34 }
 0xb03   :  { %v3048_v35 = vpop.xlane.xlu1 %3047 }
 0xb04   :  { %v9263_v36 = vsub.f32 %v9229_v61, %v2635_v57  ;;  %v3057_v56 = vsub.f32 %v1812_v1, %v3048_v35  ;;  %v3058_v11 = vsub.f32 %v1814_v28, %v3048_v35  ;;  %v2642_v63 = vsel %vm1273_vm5, %v2639_v6, 0.0  ;;  %v9324_v61 = vld [vmem:[%s10333_s3] ss:$0 sm:$0xff]  ;;  %s8139_s3 = smov [#allocation2]  }
 0xb05   :  { %2643 = vadd.xlane.f32.xlu0 %v2642_v63  ;;  %v3051_v8 = vpop.xlane.xlu0 %3050  ;;  %v2640_v44 = vmul.f32 %v9258_v0, %v9258_v0 }
 0xb06   :  { %v3063_v45 = vmul.f32 1.442695, %v3057_v56  ;;  %v3065_v20 = vmul.f32 1.442695, %v3058_v11  ;;  %v3059_v60 = vsub.f32 %v1816_v55, %v3051_v8  ;;  %v3060_v39 = vsub.f32 %v1818_v51, %v3051_v8 }
 0xb07   :  { %v2645_v53 = vsel %vm1273_vm5, %v2640_v44, 0.0  ;;  %v3056_v40 = vpop.xlane.xlu1 %3055  ;;  %v2641_v57 = vmul.f32 %v9263_v36, %v9263_v36 }
 0xb08   :  { %8001 = vpow2.f32 %v3063_v45  ;;  %v3067_v1 = vmul.f32 1.442695, %v3059_v60  ;;  %v3069_v28 = vmul.f32 1.442695, %v3060_v39  ;;  %2646 = vadd.xlane.f32.xlu1 %v2645_v53  ;;  %v3061_v6 = vsub.f32 %v1822_v10, %v3056_v40  ;;  %v9293_v39 = vld [vmem:[%s10330_s29] sm:$0xff]  }
 0xb09   :  { %8003 = vpow2.f32 %v3065_v20  ;;  %v3062_v35 = vsub.f32 %v1824_v43, %v3056_v40  ;;  %v2648_v63 = vsel %vm2145_vm8, %v2641_v57, 0.0  ;;  %v9296_v57 = vld [vmem:[%s10330_s29 + $0x8] sm:$0xff]   ;;  %7250 = vmatprep.subr.bf16.mxu1 %v9293_v39 }
 0xb0a   :  { %8005 = vpow2.f32 %v3067_v1  ;;  %v3071_v56 = vmul.f32 1.442695, %v3061_v6  ;;  %2649 = vadd.xlane.f32.xlu0 %v2648_v63  ;;  %7251 = vmatpush3.bf16.msra.mxu1 %v9293_v39  ;;  %v9302_v1 = vld [vmem:[%s10330_s29 + $0x10] sm:$0xff]   ;;  %v9312_v6 = vld [vmem:[%s10330_s29 + $0x20] sm:$0xff]  }
 0xb0b   :  { %8007 = vpow2.f32 %v3069_v28  ;;  %v3073_v55 = vmul.f32 1.442695, %v3062_v35  ;;  %7252 = vmatprep.subr.bf16.mxu1 %v9296_v57  ;;  %v9307_v28 = vld [vmem:[%s10330_s29 + $0x18] sm:$0xff]   ;;  %10331 = vst [vmem:[#allocation58_spill] sm:$0xff] %v9312_v6  ;;  %v9317_v35 = vld [vmem:[%s10330_s29 + $0x28] sm:$0xff]  }
 0xb0c   :  { %8009 = vpow2.f32 %v3071_v56  ;;  %10332 = vst [vmem:[#allocation59_spill] sm:$0xff] %v9317_v35 }
 0xb0d   :  { %8011 = vpow2.f32 %v3073_v55 }
 0xb0e   :  { %7253 = vmatpush3.bf16.msra.mxu1 %v9296_v57 }
 0xb0f   :  { %7254 = vmatprep.subr.bf16.mxu1 %v9302_v1 }
 0xb12   :  { %v9272_v51 = vpop.eup %8001  ;;  %7255 = vmatpush3.bf16.msra.mxu1 %v9302_v1 }
 0xb13   :  { %v9274_v11 = vpop.eup %8003  ;;  %7256 = vmatprep.subr.bf16.mxu1 %v9307_v28 }
 0xb14   :  { %v9276_v8 = vpop.eup %8005  ;;  %v3075_v53 = vadd.f32 %v9274_v11, %v9272_v51 }
 0xb15   :  { %v9280_v40 = vpop.eup %8007 }
 0xb16   :  { %v9282_v10 = vpop.eup %8009  ;;  %3076 = vadd.xlane.f32.xlu1 %v3075_v53  ;;  %v3078_v43 = vadd.f32 %v9280_v40, %v9276_v8  ;;  %7257 = vmatpush3.bf16.msra.mxu1 %v9307_v28 }
 0xb17   :  { %v9286_v44 = vpop.eup %8011  ;;  %v3081_v45 = vsel %vm1907_vm6, %v9282_v10, 0.0  ;;  %7258 = vmatprep.subr.bf16.mxu1 %v9312_v6 }
 0xb18   :  { %3079 = vadd.xlane.f32.xlu0 %v3078_v43  ;;  %v3082_v20 = vsel %vm1907_vm6, %v9286_v44, 0.0 }
 0xb19   :  { %v3083_v60 = vadd.f32 %v3082_v20, %v3081_v45 }
 0xb1a   :  { %7259 = vmatpush3.bf16.msra.mxu1 %v9312_v6 }
 0xb1b   :  { %3084 = vadd.xlane.f32.xlu1 %v3083_v60  ;;  %7260 = vmatprep.subr.bf16.mxu1 %v9317_v35 }
 0xb1e   :  { %7261 = vmatpush3.bf16.msra.mxu1 %v9317_v35 }
 0xb92   :  { %v2644_v63 = vpop.xlane.xlu0 %2643 }
 0xb93   :  { %v2651_v56 = vmul.f32 0.03125, %v2644_v63 }
 0xb95   :  { %v2654_v55 = vadd.f32 1e-05, %v2651_v56  ;;  %v2647_v53 = vpop.xlane.xlu1 %2646 }
 0xb96   :  { %v2652_v43 = vmul.f32 0.03125, %v2647_v53  ;;  %v9329_v53 = vld [vmem:[%s10334_s8] ss:$0 sm:$0xff]  ;;  %s6168_s8 = sshll.u32 %s8139_s3, 4  ;;  %s6169_s8 = int_to_ptr.vmem [resolvable:$true] %s6168_s8 }
 0xb97   :  { %8013 = vrsqrt.f32 %v2654_v55  ;;  %v2650_v45 = vpop.xlane.xlu0 %2649  ;;  %p8060_p1 = scmp.lt.s32.totalorder %s6169_s8, %s6169_s8 }
 0xb98   :  { %v2655_v20 = vadd.f32 1e-05, %v2652_v43  ;;  %v2653_v60 = vmul.f32 0.03125, %v2650_v45 }
 0xb9a   :  { %8015 = vrsqrt.f32 %v2655_v20  ;;  %v2656_v46 = vadd.f32 1e-05, %v2653_v60  ;;  %v10336_v60 = vpack.c.bf16 %v8958_v38, %v8943_v50  ;;  %v10343_v50 = vpack.c.bf16 %v8902_v30, %v8896_v31  ;;  %v10349_v30 = vld [vmem:[#allocation26_spill] sm:$0xff] }
 0xb9b   :  { %v10345_v38 = vpack.c.bf16 %v8899_v32, %v8893_v24 }
 0xb9c   :  { %8017 = vrsqrt.f32 %v2656_v46 }
 0xba1   :  { %v8014_v59 = vpop.eup %8013 }
 0xba2   :  { %v2660_v27 = vmul.f32 %v8014_v59, %v9255_v34 }
 0xba3   :  { %v3077_v6 = vpop.xlane.xlu1 %3076 }
 0xba4   :  { %v8016_v35 = vpop.eup %8015  ;;  %8019 = vrcp.f32 %v3077_v6  ;;  %v2669_v56 = vmul.f32 %v9324_v61, %v2660_v27 }
 0xba5   :  { %v2661_v63 = vmul.f32 %v8016_v35, %v9258_v0 }
 0xba6   :  { %v8018_v55 = vpop.eup %8017  ;;  %v2678_v46 = vadd.f32 %v9329_v53, %v2669_v56  ;;  %v10338_v56 = vpack.c.bf16 %v8987_v21, %v8979_v14  ;;  %v9404_v21 = vld [vmem:[%s10330_s29 + $0x38] sm:$0xff]  }
 0xba7   :  { %v2662_v43 = vmul.f32 %v8018_v55, %v9263_v36  ;;  %v2670_v45 = vmul.f32 %v9324_v61, %v2661_v63  ;;  %v10335_v36 = vpack.c.bf16 %v8870_v9, %v8864_v13  ;;  %v10337_v63 = vpack.c.bf16 %v8867_v4, %v8861_v22  ;;  %v3080_v4 = vpop.xlane.xlu0 %3079  ;;  %v10355_v55 = vld [vmem:[#allocation27_spill] sm:$0xff] }
 0xba8   :  { %v10340_v13 = vpack.c.bf16 %v8984_v12, %v8969_v54  ;;  %v10341_v9 = vpack.c.bf16 %v8883_v16, %v8877_v23  ;;  %v10342_v22 = vpack.c.bf16 %v9013_v18, %v9005_v33  ;;  %8021 = vrcp.f32 %v3080_v4  ;;  %v10350_v33 = vld [vmem:[#allocation22_spill] sm:$0xff]  ;;  %v9399_v12 = vld [vmem:[%s10330_s29 + $0x30] sm:$0xff]   ;;  %s10396_s29 = sld [smem:[#allocation21_spill]] }
 0xba9   :  { %v2679_v59 = vadd.f32 %v9329_v53, %v2670_v45  ;;  %v2671_v34 = vmul.f32 %v9324_v61, %v2662_v43  ;;  %v10346_v23 = vpack.c.bf16 %v9040_v62, %v9033_v19  ;;  %v10347_v16 = vpack.c.bf16 %v8935_v26, %v8920_v47  ;;  %7262 = vmatprep.subr.bf16.mxu1 %v9399_v12  ;;  %v10356_v43 = vld [vmem:[#allocation28_spill] sm:$0xff]  ;;  %v10357_v45 = vld [vmem:[#allocation29_spill] sm:$0xff] }
 0xbaa   :  { %v10348_v18 = vpack.c.bf16 %v9037_v25, %v9030_v48  ;;  %v10351_v54 = vpack.c.bf16 %v10349_v30, %v10350_v33  ;;  %7263 = vmatpush3.bf16.msra.mxu1 %v9399_v12 }
 0xbab   :  { %v2681_v20 = vpack.c.bf16 %v2679_v59, %v2678_v46  ;;  %v2680_v6 = vadd.f32 %v9329_v53, %v2671_v34  ;;  %7264 = vmatprep.subr.bf16.mxu1 %v9404_v21  ;;  %v10358_v46 = vld [vmem:[#allocation30_spill] sm:$0xff]  ;;  %v10359_v59 = vld [vmem:[#allocation31_spill] sm:$0xff]  ;;  %v10360_v34 = vld [vmem:[#allocation32_spill] sm:$0xff] }
 0xbad   :  { %7246 = vmatprep.mubr.msk.bf16.mxu0 %vm1273_vm5, %v2681_v20  ;;  %v2682_v0 = vpack.c.bf16 %v2680_v6, %v2680_v6  ;;  %v10361_v20 = vld [vmem:[#allocation33_spill] sm:$0xff]  ;;  %v10362_v6 = vld [vmem:[#allocation35_spill] sm:$0xff] }
 0xbae   :  { %v8020_v27 = vpop.eup %8019  ;;  %7265 = vmatpush3.bf16.msra.mxu1 %v9404_v21 }
 0xbaf   :  { %7247 = vmatmul.mubr.msk.bf16.vlgmr.msra.gmra.mrb[92].mxu0 %vm1273_vm5, %v2682_v0  ;;  %v3088_v35 = vmul.f32 %v8020_v27, %v9274_v11  ;;  %v10339_v11 = vpack.c.bf16 %v8886_v17, %v8880_v15  ;;  %v10344_v15 = vpack.c.bf16 %v9008_v58, %v8995_v49  ;;  %v3085_v17 = vpop.xlane.xlu1 %3084  ;;  %v3087_v24 = vmul.f32 %v8020_v27, %v9272_v51  ;;  %v10352_v49 = vld [vmem:[#allocation23_spill] sm:$0xff] }
 0xbb0   :  { %7445 = vmatpush3.bf16.msra.mxu0 %v10335_v36  ;;  %8023 = vrcp.f32 %v3085_v17  ;;  %7475 = vmatprep.subr.bf16.mxu1 %v10352_v49  ;;  %v10363_v36 = vld [vmem:[#allocation36_spill] sm:$0xff] }
 0xbb1   :  { %7447 = vmatprep.subr.bf16.mxu0 %v10336_v60  ;;  %3159 = vmatprep.mubr.f32.mxu0 %v3088_v35  ;;  %v10364_v60 = vld [vmem:[#allocation37_spill] sm:$0xff] }
 0xbb2   :  { %v8022_v31 = vpop.eup %8021 }
 0xbb3   :  { %v9388_v62 = vmul.f32 %v8022_v31, %v9280_v40  ;;  %v3090_v47 = vmul.f32 %v8022_v31, %v9276_v8 }
 0xbb4   :  { %7449 = vmatpush3.bf16.msra.mxu0 %v10337_v63  ;;  %v10365_v63 = vld [vmem:[#allocation39_spill] sm:$0xff] }
 0xbb5   :  { %7451 = vmatprep.subr.bf16.mxu0 %v10338_v56 }
 0xbb8   :  { %7453 = vmatpush3.bf16.msra.mxu0 %v10339_v11 }
 0xbb9   :  { %7455 = vmatprep.subr.bf16.mxu0 %v10340_v13 }
 0xbba   :  { %v8024_v32 = vpop.eup %8023 }
 0xbbb   :  { %v3094_v26 = vmul.f32 %v8024_v32, %v9286_v44  ;;  %v3093_v14 = vmul.f32 %v8024_v32, %v9282_v10  ;;  %v10353_v10 = vld [vmem:[#allocation24_spill] sm:$0xff]  ;;  %v10354_v44 = vld [vmem:[#allocation25_spill] sm:$0xff] }
 0xbbc   :  { %7457 = vmatpush3.bf16.msra.mxu0 %v10341_v9 }
 0xbbd   :  { %7459 = vmatprep.subr.bf16.mxu0 %v10342_v22 }
 0xbc0   :  { %7461 = vmatpush3.bf16.msra.mxu0 %v10343_v50 }
 0xbc1   :  { %7463 = vmatprep.subr.bf16.mxu0 %v10344_v15 }
 0xbc4   :  { %7465 = vmatpush3.bf16.msra.mxu0 %v10345_v38 }
 0xbc5   :  { %7467 = vmatprep.subr.bf16.mxu0 %v10346_v23 }
 0xbc8   :  { %7469 = vmatpush3.bf16.msra.mxu0 %v10347_v16 }
 0xbc9   :  { %7471 = vmatprep.subr.bf16.mxu0 %v10348_v18 }
 0xbcc   :  { %7473 = vmatpush3.bf16.msra.mxu0 %v10351_v54 }
 0xbcd   :  { %7270 = vmatprep.subr.bf16.mxu0 %v9135_v42 }
 0xbcf   :  { %3160 = vmatmul.mubr.f32.vlgmr.msra.gmra.mrb[86].mxu0 %v3087_v24 }
 0xbd0   :  { %3164 = vmatprep.mubr.f32.mxu0 %v9388_v62  ;;  %7271 = vmatpush3.bf16.msra.mxu0 %v9135_v42 }
 0xbd1   :  { %7272 = vmatprep.subr.bf16.mxu0 %v9140_v37 }
 0xbd3   :  { %3165 = vmatmul.mubr.f32.gmra.mrb[96].mxu0 %v3090_v47 }
 0xbd4   :  { %3169 = vmatprep.mubr.f32.mxu0 %v3094_v26  ;;  %7273 = vmatpush3.bf16.msra.mxu0 %v9140_v37 }
 0xbd5   :  { %7278 = vmatprep.subr.bf16.mxu0 %v9145_v29 }
 0xbd7   :  { %3170 = vmatmul.mubr.f32.gmra.mrb[98].mxu0 %v3093_v14 }
 0xc82   :  { %v7248_v58 = vpop.f32.mrb[92].mxu0 }
 0xc83   :  { %v2735_v25 = vpop.f32.mrb[93].mxu0  ;;  %v2751_v19 = vmax.f32 %v7248_v58, 0.0 }
 0xc84   :  { %v7249_v48 = vpop.f32.mrb[94].mxu0  ;;  %v2749_v37 = vmax.f32 %v2735_v25, 0.0 }
 0xc85   :  { %v2738_v42 = vpop.f32.mrb[95].mxu0  ;;  %v2753_v40 = vpack.c.bf16 %v2751_v19, %v2751_v19 }
 0xc86   :  { %v2750_v51 = vmax.f32 %v2738_v42, 0.0 }
 0xc88   :  { %v2752_v8 = vpack.c.bf16 %v2750_v51, %v2749_v37 }
 0xc8a   :  { %7266 = vmatprep.mubr.bf16.mxu1 %v2752_v8 }
 0xc8b   :  { %7267 = vmatmul.mubr.bf16.vlgmr.msra.gmra.mrb[124].mxu1 %v2753_v40 }
 0xc8c   :  { %7477 = vmatpush3.bf16.msra.mxu1 %v10353_v10  ;;  %3239 = vmatprep.mubr.f32.mxu1 %v3088_v35 }
 0xc8d   :  { %7479 = vmatprep.subr.bf16.mxu1 %v10354_v44 }
 0xc90   :  { %7481 = vmatpush3.bf16.msra.mxu1 %v10355_v55 }
 0xc91   :  { %7483 = vmatprep.subr.bf16.mxu1 %v10356_v43 }
 0xc94   :  { %7485 = vmatpush3.bf16.msra.mxu1 %v10357_v45 }
 0xc95   :  { %7487 = vmatprep.subr.bf16.mxu1 %v10358_v46 }
 0xc98   :  { %7489 = vmatpush3.bf16.msra.mxu1 %v10359_v59 }
 0xc99   :  { %7491 = vmatprep.subr.bf16.mxu1 %v10360_v34 }
 0xc9c   :  { %7493 = vmatpush3.bf16.msra.mxu1 %v10361_v20 }
 0xc9d   :  { %7495 = vmatprep.subr.bf16.mxu1 %v9067_v3 }
 0xca0   :  { %7497 = vmatpush3.bf16.msra.mxu1 %v9071_v2  ;;  %v10366_v2 = vld [vmem:[#allocation38_spill] sm:$0xff] }
 0xca1   :  { %7499 = vmatprep.subr.bf16.mxu1 %v10362_v6 }
 0xca2   :  { %v6871_v0 = vpop.f32.mrb[86].mxu0 }
 0xca3   :  { %v6872_v27 = vpop.f32.mrb[87].mxu0 }
 0xca4   :  { %v9421_v35 = vadd.f32 %v6872_v27, %v6871_v0  ;;  %7501 = vmatpush3.bf16.msra.mxu1 %v10363_v36 }
 0xca5   :  { %7503 = vmatprep.subr.bf16.mxu1 %v10364_v60 }
 0xca6   :  { %v3255_v56 = vadd.f32 %v9421_v35, %v10365_v63  ;;  %v6874_v11 = vpop.f32.mrb[96].mxu0 }
 0xca7   :  { %v6875_v13 = vpop.f32.mrb[97].mxu0 }
 0xca8   :  { %v9427_v9 = vmax.f32 %v3255_v56, 0.0  ;;  %v9429_v3 = vadd.f32 %v6875_v13, %v6874_v11  ;;  %7505 = vmatpush3.bf16.msra.mxu1 %v10366_v2 }
 0xcaa   :  { %v3256_v22 = vadd.f32 %v9429_v3, %v10365_v63  ;;  %v6877_v4 = vpop.f32.mrb[98].mxu0  ;;  %v3276_v50 = vsel %vm1273_vm5, %v9427_v9, 0.0 }
 0xcab   :  { %3240 = vmatmul.mubr.f32.vlgmr.msra.gmra.mrb[102].mxu1 %v3087_v24  ;;  %3277 = vadd.xlane.f32.xlu0 %v3276_v50  ;;  %v6878_v15 = vpop.f32.mrb[99].mxu0 }
 0xcac   :  { %v9436_v17 = vmax.f32 %v3256_v22, 0.0  ;;  %v9438_v38 = vadd.f32 %v6878_v15, %v6877_v4  ;;  %3244 = vmatprep.mubr.f32.mxu1 %v9388_v62 }
 0xcae   :  { %v3257_v23 = vadd.f32 %v9438_v38, %v10365_v63  ;;  %v3279_v16 = vsel %vm1273_vm5, %v9436_v17, 0.0 }
 0xcaf   :  { %3245 = vmatmul.mubr.f32.gmra.mrb[128].mxu1 %v3090_v47  ;;  %3280 = vadd.xlane.f32.xlu1 %v3279_v16 }
 0xcb0   :  { %v9445_v18 = vmax.f32 %v3257_v23, 0.0  ;;  %3249 = vmatprep.mubr.f32.mxu1 %v3094_v26 }
 0xcb2   :  { %v3282_v31 = vsel %vm2145_vm8, %v9445_v18, 0.0 }
 0xcb3   :  { %3250 = vmatmul.mubr.f32.gmra.mrb[130].mxu1 %v3093_v14  ;;  %3283 = vadd.xlane.f32.xlu0 %v3282_v31 }
 0xd38   :  { %v3278_v30 = vpop.xlane.xlu0 %3277 }
 0xd39   :  { %v3285_v33 = vmul.f32 0.03125, %v3278_v30 }
 0xd3b   :  { %v3288_v54 = vsub.f32 %v9427_v9, %v3285_v33 }
 0xd3c   :  { %v3281_v24 = vpop.xlane.xlu1 %3280 }
 0xd3d   :  { %v3286_v62 = vmul.f32 0.03125, %v3281_v24  ;;  %v3291_v32 = vmul.f32 %v3288_v54, %v3288_v54 }
 0xd3f   :  { %v3289_v49 = vsub.f32 %v9436_v17, %v3286_v62  ;;  %v3294_v47 = vsel %vm1273_vm5, %v3291_v32, 0.0 }
 0xd40   :  { %3295 = vadd.xlane.f32.xlu1 %v3294_v47  ;;  %v3284_v58 = vpop.xlane.xlu0 %3283  ;;  %v10368_v47 = vld [vmem:[#allocation50_spill] sm:$0xff] }
 0xd41   :  { %v3287_v25 = vmul.f32 0.03125, %v3284_v58  ;;  %v3292_v26 = vmul.f32 %v3289_v49, %v3289_v49 }
 0xd43   :  { %v3290_v48 = vsub.f32 %v9445_v18, %v3287_v25  ;;  %v3297_v14 = vsel %vm1273_vm5, %v3292_v26, 0.0 }
 0xd44   :  { %3298 = vadd.xlane.f32.xlu0 %v3297_v14 }
 0xd45   :  { %v3293_v19 = vmul.f32 %v3290_v48, %v3290_v48 }
 0xd47   :  { %v3300_v42 = vsel %vm2145_vm8, %v3293_v19, 0.0 }
 0xd48   :  { %3301 = vadd.xlane.f32.xlu1 %v3300_v42 }
 0xd5e   :  { %v9455_v37 = vpop.f32.mrb[124].mxu1 }
 0xd5f   :  { %v9457_v51 = vpop.f32.mrb[125].mxu1 }
 0xd60   :  { %v7269_v8 = vpop.f32.mrb[126].mxu1 }
 0xd61   :  { %v9459_v40 = vpop.f32.mrb[127].mxu1 }
 0xd7e   :  { %v6912_v10 = vpop.f32.mrb[102].mxu1 }
 0xd7f   :  { %v6913_v44 = vpop.f32.mrb[103].mxu1 }
 0xd80   :  { %v9461_v55 = vadd.f32 %v6913_v44, %v6912_v10 }
 0xd82   :  { %v6915_v43 = vpop.f32.mrb[128].mxu1 }
 0xd83   :  { %v6916_v45 = vpop.f32.mrb[129].mxu1 }
 0xd84   :  { %v9463_v46 = vadd.f32 %v6916_v45, %v6915_v43 }
 0xd86   :  { %v6918_v59 = vpop.f32.mrb[130].mxu1 }
 0xd87   :  { %v6919_v34 = vpop.f32.mrb[131].mxu1 }
 0xd88   :  { %v9465_v20 = vadd.f32 %v6919_v34, %v6918_v59 }
 0xdcd   :  { %v3296_v6 = vpop.xlane.xlu1 %3295 }
 0xdce   :  { %v3303_v0 = vmul.f32 0.03125, %v3296_v6 }
 0xdd0   :  { %v3306_v27 = vadd.f32 1e-05, %v3303_v0 }
 0xdd1   :  { %v3299_v36 = vpop.xlane.xlu0 %3298 }
 0xdd2   :  { %8025 = vrsqrt.f32 %v3306_v27  ;;  %v3304_v60 = vmul.f32 0.03125, %v3299_v36  ;;  %v10370_v36 = vld [vmem:[#allocation52_spill] sm:$0xff] }
 0xdd4   :  { %v3307_v63 = vadd.f32 1e-05, %v3304_v60 }
 0xdd5   :  { %v3302_v56 = vpop.xlane.xlu1 %3301 }
 0xdd6   :  { %8027 = vrsqrt.f32 %v3307_v63  ;;  %v3305_v11 = vmul.f32 0.03125, %v3302_v56  ;;  %v10371_v63 = vld [vmem:[#allocation53_spill] sm:$0xff] }
 0xdd8   :  { %v3308_v13 = vadd.f32 1e-05, %v3305_v11  ;;  %v10372_v11 = vld [vmem:[#allocation54_spill] sm:$0xff] }
 0xdda   :  { %8029 = vrsqrt.f32 %v3308_v13 }
 0xddc   :  { %v8026_v2 = vpop.eup %8025 }
 0xddd   :  { %v3312_v22 = vmul.f32 %v8026_v2, %v3288_v54 }
 0xddf   :  { %v3315_v15 = vmul.f32 %v9149_v52, %v3312_v22 }
 0xde0   :  { %v8028_v4 = vpop.eup %8027 }
 0xde1   :  { %v3313_v50 = vmul.f32 %v8028_v4, %v3289_v49  ;;  %v3318_v30 = vadd.f32 %v9153_v41, %v3315_v15  ;;  %v10367_v49 = vld [vmem:[#allocation49_spill] sm:$0xff] }
 0xde3   :  { %v3316_v23 = vmul.f32 %v9149_v52, %v3313_v50 }
 0xde4   :  { %v8030_v16 = vpop.eup %8029 }
 0xde5   :  { %v3314_v31 = vmul.f32 %v8030_v16, %v3290_v48  ;;  %v3319_v33 = vadd.f32 %v9153_v41, %v3316_v23 }
 0xde7   :  { %v3317_v24 = vmul.f32 %v9149_v52, %v3314_v31  ;;  %v3321_v62 = vpack.c.bf16 %v3319_v33, %v3318_v30  ;;  %v10369_v52 = vld [vmem:[#allocation51_spill] sm:$0xff] }
 0xde9   :  { %v3320_v32 = vadd.f32 %v9153_v41, %v3317_v24  ;;  %7274 = vmatprep.mubr.msk.bf16.mxu0 %vm1273_vm5, %v3321_v62 }
 0xdeb   :  { %v3322_v54 = vpack.c.bf16 %v3320_v32, %v3320_v32 }
 0xded   :  { %7275 = vmatmul.mubr.msk.bf16.vlgmr.msra.gmra.mrb[100].mxu0 %vm1273_vm5, %v3322_v54 }
 0xdee   :  { %7279 = vmatpush3.bf16.msra.mxu0 %v9145_v29  ;;  %7282 = vmatprep.mubr.msk.bf16.mxu0 %vm1273_vm5, %v3321_v62 }
 0xdef   :  { %7280 = vmatprep.subr.bf16.mxu0 %v10367_v49 }
 0xdf2   :  { %7281 = vmatpush3.bf16.msra.mxu0 %v10367_v49 }
 0xdf3   :  { %7286 = vmatprep.subr.bf16.mxu0 %v10368_v47 }
 0xdf5   :  { %7283 = vmatmul.mubr.msk.bf16.vlgmr.msra.gmra.mrb[104].mxu0 %vm1273_vm5, %v3322_v54 }
 0xdf6   :  { %7287 = vmatpush3.bf16.msra.mxu0 %v10368_v47  ;;  %7290 = vmatprep.mubr.msk.bf16.mxu0 %vm1273_vm5, %v3321_v62 }
 0xdf7   :  { %7288 = vmatprep.subr.bf16.mxu0 %v10369_v52 }
 0xdfa   :  { %7289 = vmatpush3.bf16.msra.mxu0 %v10369_v52 }
 0xdfd   :  { %7291 = vmatmul.mubr.msk.bf16.vlgmr.msra.gmra.mrb[108].mxu0 %vm1273_vm5, %v3322_v54 }
 0xec0   :  { %v7276_v29 = vpop.f32.mrb[100].mxu0 }
 0xec1   :  { %v3363_v41 = vpop.f32.mrb[101].mxu0  ;;  %v3474_v56 = vpack.c.bf16 %v7276_v29, %v7276_v29 }
 0xec2   :  { %v7277_v58 = vpop.f32.mrb[102].mxu0 }
 0xec3   :  { %v3366_v25 = vpop.f32.mrb[103].mxu0 }
 0xec4   :  { %v3473_v26 = vpack.c.bf16 %v3366_v25, %v3363_v41 }
 0xec6   :  { %7298 = vmatprep.mubr.msk.bf16.mxu0 %vm1273_vm5, %v3473_v26 }
 0xec8   :  { %v7284_v48 = vpop.f32.mrb[104].mxu0 }
 0xec9   :  { %v3411_v14 = vpop.f32.mrb[105].mxu0  ;;  %v3476_v10 = vpack.c.bf16 %v7284_v48, %v7284_v48 }
 0xeca   :  { %v7285_v19 = vpop.f32.mrb[106].mxu0 }
 0xecb   :  { %v3414_v42 = vpop.f32.mrb[107].mxu0  ;;  %v3487_v27 = vsel %vm1273_vm5, %v3476_v10, 0 }
 0xecc   :  { %v3475_v8 = vpack.c.bf16 %v3414_v42, %v3411_v14 }
 0xece   :  { %v3484_v44 = vsel %vm1273_vm5, %v3475_v8, 0  ;;  %7525 = vmatprep.subr.msk.bf16.mxu0 %vm1273_vm5, %v3475_v8 }
 0xecf   :  { %7295 = vmatpush3.bf16.xpose.msra.mxu0 %v3484_v44 }
 0xed0   :  { %v7292_v43 = vpop.f32.mrb[108].mxu0  ;;  %7526 = vmatprep.subr.msk.bf16.mxu0 %vm1273_vm5, %v3476_v10 }
 0xed1   :  { %v3459_v45 = vpop.f32.mrb[109].mxu0  ;;  %v3576_v59 = vpack.c.bf16 %v7292_v43, %v7292_v43 }
 0xed2   :  { %v7293_v34 = vpop.f32.mrb[110].mxu0 }
 0xed3   :  { %v3462_v6 = vpop.f32.mrb[111].mxu0  ;;  %v3584_v60 = vand.u32 %v3576_v59, %v10370_v36 }
 0xed4   :  { %v3575_v0 = vpack.c.bf16 %v3462_v6, %v3459_v45 }
 0xed6   :  { %7302 = vmatprep.subr.bf16.mxu1 %v3575_v0 }
 0xed7   :  { %7297 = vmatpush3.bf16.xpose.msra.mxu0 %v3487_v27  ;;  %7303 = vmatpush3.bf16.msra.mxu1 %v3575_v0 }
 0xed8   :  { %7304 = vmatprep.subr.bf16.mxu1 %v3584_v60  ;;  %7318 = vmatprep.subr.bf16.mxu0 %v10371_v63 }
 0xedb   :  { %7305 = vmatpush3.bf16.msra.mxu1 %v3584_v60 }
 0xedc   :  { %7310 = vmatprep.subr.bf16.mxu1 %v9212_v5 }
 0xede   :  { %7299 = vmatmul.mubr.msk.bf16.vlgmr.msra.gmra.mrb[112].mxu0 %vm1273_vm5, %v3474_v56 }
 0xedf   :  { %7319 = vmatpush3.bf16.msra.mxu0 %v10371_v63 }
 0xee0   :  { %7320 = vmatprep.subr.bf16.mxu0 %v10372_v11 }
 0xee3   :  { %7321 = vmatpush3.bf16.msra.mxu0 %v10372_v11 }
 0xfb1   :  { %v7300_v13 = vpop.f32.mrb[112].mxu0 }
 0xfb2   :  { %v3523_v2 = vpop.f32.mrb[113].mxu0  ;;  %v3539_v15 = vmul.f32 0.17677669, %v7300_v13 }
 0xfb3   :  { %v3537_v22 = vmul.f32 0.17677669, %v3523_v2  ;;  %v7301_v4 = vpop.f32.mrb[114].mxu0 }
 0xfb4   :  { %v3526_v50 = vpop.f32.mrb[115].mxu0  ;;  %v3546_v30 = vsel %vm2460_vm12, %v3539_v15, -inf }
 0xfb5   :  { %v3538_v23 = vmul.f32 0.17677669, %v3526_v50  ;;  %v3540_v16 = vsel %vm2453_vm11, %v3537_v22, -inf }
 0xfb6   :  { %3541 = vmax.xlane.f32.xlu0 %v3540_v16 }
 0xfb7   :  { %v3543_v31 = vsel %vm2453_vm11, %v3538_v23, -inf }
 0xfb8   :  { %3544 = vmax.xlane.f32.xlu1 %v3543_v31 }
 0xfba   :  { %3547 = vmax.xlane.f32.xlu0 %v3546_v30 }
0x1043   :  { %v3542_v33 = vpop.xlane.xlu0 %3541 }
0x1044   :  { %v3549_v24 = vsub.f32 %v3537_v22, %v3542_v33 }
0x1045   :  { %v3545_v62 = vpop.xlane.xlu1 %3544 }
0x1046   :  { %v3552_v32 = vmul.f32 1.442695, %v3549_v24  ;;  %v3550_v54 = vsub.f32 %v3538_v23, %v3545_v62 }
0x1047   :  { %v3548_v49 = vpop.xlane.xlu0 %3547 }
0x1048   :  { %8031 = vpow2.f32 %v3552_v32  ;;  %v3554_v47 = vmul.f32 1.442695, %v3550_v54  ;;  %v3551_v52 = vsub.f32 %v3539_v15, %v3548_v49 }
0x104a   :  { %8033 = vpow2.f32 %v3554_v47  ;;  %v3556_v29 = vmul.f32 1.442695, %v3551_v52 }
0x104c   :  { %8035 = vpow2.f32 %v3556_v29 }
0x1052   :  { %v8032_v41 = vpop.eup %8031 }
0x1053   :  { %v3558_v58 = vsel %vm2453_vm11, %v8032_v41, 0.0 }
0x1054   :  { %v8034_v25 = vpop.eup %8033  ;;  %3559 = vadd.xlane.f32.xlu1 %v3558_v58  ;;  %v10376_v58 = vld [vmem:[#allocation40_spill] sm:$0xff] }
0x1055   :  { %v3561_v26 = vsel %vm2453_vm11, %v8034_v25, 0.0 }
0x1056   :  { %v8036_v48 = vpop.eup %8035  ;;  %3562 = vadd.xlane.f32.xlu0 %v3561_v26 }
0x1057   :  { %v3564_v14 = vsel %vm2460_vm12, %v8036_v48, 0.0  ;;  %vm2980_vm12 = vcmask 769024  }
0x1058   :  { %3565 = vadd.xlane.f32.xlu1 %v3564_v14 }
0x10e1   :  { %v3560_v19 = vpop.xlane.xlu1 %3559 }
0x10e2   :  { %8037 = vrcp.f32 %v3560_v19 }
0x10e3   :  { %v3563_v42 = vpop.xlane.xlu0 %3562 }
0x10e4   :  { %8039 = vrcp.f32 %v3563_v42 }
0x10e5   :  { %v3566_v8 = vpop.xlane.xlu1 %3565 }
0x10e6   :  { %8041 = vrcp.f32 %v3566_v8 }
0x10ec   :  { %v8038_v10 = vpop.eup %8037 }
0x10ed   :  { %v3570_v43 = vmul.f32 %v8038_v10, %v8032_v41  ;;  %v10375_v41 = vld [vmem:[#allocation46_spill] sm:$0xff] }
0x10ee   :  { %v8040_v44 = vpop.eup %8039 }
0x10ef   :  { %v3571_v45 = vmul.f32 %v8040_v44, %v8034_v25  ;;  %v10377_v25 = vld [vmem:[#allocation43_spill] sm:$0xff] }
0x10f0   :  { %v8042_v59 = vpop.eup %8041 }
0x10f1   :  { %v3572_v34 = vmul.f32 %v8042_v59, %v8036_v48  ;;  %v3573_v6 = vpack.c.bf16 %v3571_v45, %v3570_v43  ;;  %v10378_v45 = vld [vmem:[#allocation47_spill] sm:$0xff] }
0x10f3   :  { %v3574_v0 = vpack.c.bf16 %v3572_v34, %v3572_v34  ;;  %7306 = vmatprep.mubr.msk.bf16.mxu1 %vm2453_vm11, %v3573_v6 }
0x10f5   :  { %7307 = vmatmul.mubr.msk.bf16.vlgmr.msra.gmra.mrb[132].mxu1 %vm2453_vm11, %v3574_v0  ;;  %vm2978_vm11 = vcmask 482304  }
0x10f6   :  { %7311 = vmatpush3.bf16.msra.mxu1 %v9212_v5  ;;  %v10373_v5 = vld [vmem:[#allocation58_spill] sm:$0xff] }
0x10f7   :  { %7312 = vmatprep.subr.bf16.mxu1 %v9219_v7 }
0x10fa   :  { %7313 = vmatpush3.bf16.msra.mxu1 %v9219_v7  ;;  %v10374_v7 = vld [vmem:[#allocation59_spill] sm:$0xff] }
0x10fb   :  { %7326 = vmatprep.subr.bf16.mxu1 %v9293_v39 }
0x11c8   :  { %v7308_v27 = vpop.f32.mrb[132].mxu1 }
0x11c9   :  { %v3620_v36 = vpop.f32.mrb[133].mxu1  ;;  %v3635_v11 = vpack.c.bf16 %v7308_v27, %v7308_v27 }
0x11ca   :  { %v7309_v60 = vpop.f32.mrb[134].mxu1 }
0x11cb   :  { %v3623_v63 = vpop.f32.mrb[135].mxu1  ;;  %v10379_v60 = vld [vmem:[#allocation41_spill] sm:$0xff] }
0x11cc   :  { %v3634_v56 = vpack.c.bf16 %v3623_v63, %v3620_v36 }
0x11ce   :  { %7314 = vmatprep.mubr.msk.bf16.mxu1 %vm1273_vm5, %v3634_v56 }
0x11cf   :  { %7315 = vmatmul.mubr.msk.bf16.vlgmr.msra.gmra.mrb[136].mxu1 %vm1273_vm5, %v3635_v11 }
0x11d0   :  { %7327 = vmatpush3.bf16.msra.mxu1 %v9293_v39 }
0x11d1   :  { %7328 = vmatprep.subr.bf16.mxu1 %v9296_v57 }
0x11d4   :  { %7329 = vmatpush3.bf16.msra.mxu1 %v9296_v57 }
0x11d5   :  { %7330 = vmatprep.subr.bf16.mxu1 %v9302_v1 }
0x11d8   :  { %7331 = vmatpush3.bf16.msra.mxu1 %v9302_v1 }
0x11d9   :  { %7332 = vmatprep.subr.bf16.mxu1 %v9307_v28 }
0x11dc   :  { %7333 = vmatpush3.bf16.msra.mxu1 %v9307_v28 }
0x11dd   :  { %7334 = vmatprep.subr.bf16.mxu1 %v10373_v5 }
0x11e0   :  { %7335 = vmatpush3.bf16.msra.mxu1 %v10373_v5 }
0x11e1   :  { %7336 = vmatprep.subr.bf16.mxu1 %v10374_v7 }
0x11e4   :  { %7337 = vmatpush3.bf16.msra.mxu1 %v10374_v7  ;;  %v10380_v7 = vld [vmem:[#allocation44_spill] sm:$0xff] }
0x11e5   :  { %7338 = vmatprep.subr.bf16.mxu1 %v9399_v12 }
0x11e8   :  { %7339 = vmatpush3.bf16.msra.mxu1 %v9399_v12 }
0x11e9   :  { %7340 = vmatprep.subr.bf16.mxu1 %v9404_v21 }
0x11ec   :  { %7341 = vmatpush3.bf16.msra.mxu1 %v9404_v21 }
0x12a2   :  { %v7316_v39 = vpop.f32.mrb[136].mxu1 }
0x12a3   :  { %v3676_v57 = vpop.f32.mrb[137].mxu1  ;;  %v9531_v2 = vadd.f32 %v7316_v39, %v9445_v18 }
0x12a4   :  { %v9528_v1 = vadd.f32 %v3676_v57, %v9427_v9  ;;  %v7317_v28 = vpop.f32.mrb[138].mxu1 }
0x12a5   :  { %v3679_v13 = vpop.f32.mrb[139].mxu1  ;;  %v3699_v4 = vsel %vm2145_vm8, %v9531_v2, 0.0 }
0x12a6   :  { %v9534_v22 = vadd.f32 %v3679_v13, %v9436_v17  ;;  %v3693_v12 = vsel %vm1273_vm5, %v9528_v1, 0.0 }
0x12a7   :  { %3694 = vadd.xlane.f32.xlu0 %v3693_v12 }
0x12a8   :  { %v3696_v21 = vsel %vm1273_vm5, %v9534_v22, 0.0 }
0x12a9   :  { %3697 = vadd.xlane.f32.xlu1 %v3696_v21 }
0x12ab   :  { %3700 = vadd.xlane.f32.xlu0 %v3699_v4 }
0x1334   :  { %v3695_v50 = vpop.xlane.xlu0 %3694 }
0x1335   :  { %v3702_v15 = vmul.f32 0.03125, %v3695_v50 }
0x1336   :  { %v3698_v23 = vpop.xlane.xlu1 %3697 }
0x1337   :  { %v3705_v16 = vsub.f32 %v9528_v1, %v3702_v15  ;;  %v3703_v31 = vmul.f32 0.03125, %v3698_v23 }
0x1338   :  { %v3701_v30 = vpop.xlane.xlu0 %3700 }
0x1339   :  { %v3706_v33 = vsub.f32 %v9534_v22, %v3703_v31  ;;  %v3704_v24 = vmul.f32 0.03125, %v3701_v30  ;;  %v3708_v62 = vmul.f32 %v3705_v16, %v3705_v16 }
0x133b   :  { %v3707_v32 = vsub.f32 %v9531_v2, %v3704_v24  ;;  %v3711_v54 = vsel %vm1273_vm5, %v3708_v62, 0.0  ;;  %v3709_v49 = vmul.f32 %v3706_v33, %v3706_v33 }
0x133c   :  { %3712 = vadd.xlane.f32.xlu1 %v3711_v54 }
0x133d   :  { %v3714_v47 = vsel %vm1273_vm5, %v3709_v49, 0.0  ;;  %v3710_v52 = vmul.f32 %v3707_v32, %v3707_v32 }
0x133e   :  { %3715 = vadd.xlane.f32.xlu0 %v3714_v47 }
0x133f   :  { %v3717_v29 = vsel %vm2145_vm8, %v3710_v52, 0.0  ;;  %vm2972_vm8 = vcmask 670720  }
0x1340   :  { %3718 = vadd.xlane.f32.xlu1 %v3717_v29 }
0x1351   :  { %2130 = vrot.lane.b32.xlu1 %v10375_v41, %s8115_s14 }
0x1354   :  { %3268 = vrot.lane.b32.xlu0 %v9438_v38, %s8115_s14 }
0x1355   :  { %3264 = vrot.lane.b32.xlu1 %v9421_v35, %s8115_s14 }
0x1358   :  { %2126 = vrot.lane.b32.xlu0 %v10376_v58, %s8115_s14 }
0x1359   :  { %3266 = vrot.lane.b32.xlu1 %v9429_v3, %s8115_s14 }
0x135c   :  { %2128 = vrot.lane.b32.xlu0 %v10377_v25, %s8115_s14  ;;  %s8055_s14 = scalar_lea.vmem %s6169_s8, 2048 }
0x135d   :  { %p8056_p0 = scmp.ne.s32.totalorder %s6169_s8, %s8055_s14  ;;  %p8061_p2 = scmp.lt.s32.totalorder %s8055_s14, %s8055_s14 }
0x135f   :  { %p8062_p3 = por %p8061_p2, %p8060_p1 }
0x1361   :  { %p8063_p4 = pnand %p8062_p3, %p8056_p0 }
0x13c9   :  { %v3713_v26 = vpop.xlane.xlu1 %3712 }
0x13ca   :  { %v3720_v48 = vmul.f32 0.03125, %v3713_v26 }
0x13cb   :  { %v3716_v14 = vpop.xlane.xlu0 %3715 }
0x13cc   :  { %v3723_v19 = vadd.f32 1e-05, %v3720_v48  ;;  %v3721_v42 = vmul.f32 0.03125, %v3716_v14 }
0x13cd   :  { %v3719_v8 = vpop.xlane.xlu1 %3718 }
0x13ce   :  { %8043 = vrsqrt.f32 %v3723_v19  ;;  %v3724_v10 = vadd.f32 1e-05, %v3721_v42  ;;  %v3722_v44 = vmul.f32 0.03125, %v3719_v8 }
0x13cf   :  { %v3269_v43 = vpop.permute.xlu0 %3268 }
0x13d0   :  { %8045 = vrsqrt.f32 %v3724_v10  ;;  %v3725_v38 = vadd.f32 1e-05, %v3722_v44  ;;  %v9556_v3 = vsel %vm2135_vm13, %v9465_v20, %v3269_v43  ;;  %v7777_v44 = vld [vmem:[%s10383_s24 + $0x40] sm:$0xff]  }
0x13d1   :  { %v2131_v35 = vpop.permute.xlu1 %2130  ;;  %v7778_v43 = vld [vmem:[%s10383_s24] sm:$0xff]   ;;  %6959 = vmatprep.subr.bf16.mxu0 %v7777_v44 }
0x13d2   :  { %8047 = vrsqrt.f32 %v3725_v38  ;;  %v9560_v59 = vsel %vm2135_vm13, %v10378_v45, %v2131_v35  ;;  %v7779_v38 = vld [vmem:[%s10383_s24 + $0x48] sm:$0xff]   ;;  %v7781_v45 = vld [vmem:[%s10383_s24 + $0x50] sm:$0xff]  }
0x13d3   :  { %v7593_v34 = vpack.i.bf16 %v9560_v59, %v9556_v3  ;;  %v2127_v6 = vpop.permute.xlu0 %2126  ;;  %v7780_v35 = vld [vmem:[%s10383_s24 + $0x8] sm:$0xff]  }
0x13d4   :  { %v9573_v63 = vsel %vm2135_vm13, %v10379_v60, %v2127_v6  ;;  %v7783_v6 = vld [vmem:[%s10383_s24 + $0x58] sm:$0xff]  }
0x13d5   :  { %7594 = vrot.lane.b32.xlu1 %v7593_v34, %s8116_s19  ;;  %v3265_v0 = vpop.permute.xlu1 %3264  ;;  %v7782_v34 = vld [vmem:[%s10383_s24 + $0x10] sm:$0xff]  }
0x13d6   :  { %v9567_v27 = vsel %vm2135_vm13, %v9461_v55, %v3265_v0 }
0x13d7   :  { %v2129_v36 = vpop.permute.xlu0 %2128  ;;  %3887 = vrot.lane.b32.xlu0 %v9567_v27, %s8116_s19 }
0x13d8   :  { %v8044_v20 = vpop.eup %8043  ;;  %v9579_v39 = vsel %vm2135_vm13, %v10380_v7, %v2129_v36 }
0x13d9   :  { %v3729_v56 = vmul.f32 %v8044_v20, %v3705_v16  ;;  %2890 = vrot.lane.b32.xlu1 %v9573_v63, %s8116_s19  ;;  %v3267_v11 = vpop.permute.xlu1 %3266 }
0x13da   :  { %v8046_v5 = vpop.eup %8045  ;;  %v9583_v55 = vsel %vm2135_vm13, %v9463_v46, %v3267_v11  ;;  %v7785_v11 = vld [vmem:[%s10383_s24 + $0x60] sm:$0xff]   ;;  %vm2984_vm13 = vcmask 293888  }
0x13db   :  { %v3730_v57 = vmul.f32 %v8046_v5, %v3706_v33  ;;  %v7598_v28 = vpack.i.bf16 %v9579_v39, %v9583_v55  ;;  %v3732_v13 = vmul.f32 %v9324_v61, %v3729_v56  ;;  %v10381_v33 = vld [vmem:[#allocation56_spill] sm:$0xff]  ;;  %v7784_v56 = vld [vmem:[%s10383_s24 + $0x18] sm:$0xff]  }
0x13dc   :  { %v8048_v12 = vpop.eup %8047  ;;  %v9598_v24 = vadd.f32 %v9455_v37, %v10381_v33  ;;  %v7787_v33 = vld [vmem:[%s10383_s24 + $0xc0] sm:$0xff]  }
0x13dd   :  { %v3731_v21 = vmul.f32 %v8048_v12, %v3707_v32  ;;  %7599 = vrot.lane.b32.xlu0 %v7598_v28, %s8116_s19  ;;  %v3733_v4 = vmul.f32 %v9324_v61, %v3730_v57  ;;  %v3735_v50 = vadd.f32 %v9329_v53, %v3732_v13  ;;  %v10382_v32 = vld [vmem:[#allocation55_spill] sm:$0xff]  ;;  %6981 = vmatprep.subr.bf16.mxu1 %v7787_v33 }
0x13de   :  { %v9602_v54 = vadd.f32 %v9457_v51, %v10382_v32  ;;  %v7789_v32 = vld [vmem:[%s10383_s24 + $0x68] sm:$0xff]  }
0x13df   :  { %v3736_v15 = vadd.f32 %v9329_v53, %v3733_v4  ;;  %v3734_v23 = vmul.f32 %v9324_v61, %v3731_v21  ;;  %v7803_v33 = vld [vmem:[%s10383_s24 + $0xe8] sm:$0xff]  }
0x13e1   :  { %v3738_v46 = vpack.c.bf16 %v3736_v15, %v3735_v50  ;;  %v3737_v16 = vadd.f32 %v9329_v53, %v3734_v23  ;;  %v7786_v23 = vld [vmem:[%s10383_s24 + $0x20] sm:$0xff]  }
0x13e3   :  { %7322 = vmatprep.mubr.msk.bf16.mxu0 %vm1273_vm5, %v3738_v46  ;;  %v3739_v31 = vpack.c.bf16 %v3737_v16, %v3737_v16 }
0x13e5   :  { %7323 = vmatmul.mubr.msk.bf16.vlgmr.msra.gmra.mrb[116].mxu0 %vm1273_vm5, %v3739_v31 }
0x13e6   :  { %6960 = vmatpush3.bf16.msra.mxu0 %v7778_v43 }
0x13e7   :  { %6961 = vmatprep.subr.bf16.mxu0 %v7779_v38  ;;  %v7796_v38 = vld [vmem:[%s10383_s24 + $0x90] sm:$0xff]  }
0x13ea   :  { %6962 = vmatpush3.bf16.msra.mxu0 %v7780_v35 }
0x13eb   :  { %6963 = vmatprep.subr.bf16.mxu0 %v7781_v45 }
0x13ee   :  { %6964 = vmatpush3.bf16.msra.mxu0 %v7782_v34 }
0x13ef   :  { %6965 = vmatprep.subr.bf16.mxu0 %v7783_v6 }
0x13f2   :  { %6966 = vmatpush3.bf16.msra.mxu0 %v7784_v56 }
0x13f3   :  { %6967 = vmatprep.subr.bf16.mxu0 %v7785_v11 }
0x13f6   :  { %6968 = vmatpush3.bf16.msra.mxu0 %v7786_v23 }
0x13f7   :  { %6969 = vmatprep.subr.bf16.mxu0 %v7789_v32 }
0x1447   :  { %v7595_v30 = vpop.permute.xlu1 %7594 }
0x1448   :  { %v7597_v62 = vunpack.i.h.bf16 %v7595_v30  ;;  %v7596_v36 = vunpack.i.l.bf16 %v7595_v30 }
0x1449   :  { %v3888_v57 = vpop.permute.xlu0 %3887 }
0x144a   :  { %v9606_v61 = vsel %vm1273_vm5, %v9598_v24, %v7597_v62  ;;  %v7788_v62 = vld [vmem:[%s10383_s24 + $0x80] sm:$0xff]  }
0x144b   :  { %v2891_v53 = vpop.permute.xlu1 %2890  ;;  %v3005_v52 = vrot.slane %v9606_v61, 4  ;;  %v3001_v29 = vrot.slane %v9606_v61, 3  ;;  %v2997_v12 = vrot.slane %v9606_v61, 2  ;;  %v2993_v21 = vrot.slane %v9606_v61, 1 }
0x144c   :  { %v9610_v49 = vsel %vm1273_vm5, %v9602_v54, %v2891_v53  ;;  %v7790_v53 = vld [vmem:[%s10383_s24 + $0x28] sm:$0xff]  }
0x144d   :  { %v2915_v47 = vrot.slane %v9610_v49, 4  ;;  %v2911_v37 = vrot.slane %v9610_v49, 3  ;;  %6970 = vmatpush3.bf16.msra.mxu0 %v7790_v53  ;;  %v2907_v45 = vrot.slane %v9610_v49, 2  ;;  %v2923_v34 = vrot.slane %v9610_v49, 6 }
0x144f   :  { %v7608_v41 = vpack.i.bf16 %v2915_v47, %v3005_v52  ;;  %v7603_v51 = vpack.i.bf16 %v2911_v37, %v3001_v29 }
0x1451   :  { %7609 = vrot.lane.b32.xlu0 %v7608_v41, %s8117_s30  ;;  %7604 = vrot.lane.b32.xlu1 %v7603_v51, %s8118_s6  ;;  %v7791_v41 = vld [vmem:[%s10383_s24 + $0xc8] sm:$0xff]  }
0x1452   :  { %v7792_v51 = vld [vmem:[%s10383_s24 + $0x88] sm:$0xff]  }
0x14b8   :  { %v7324_v58 = vpop.f32.mrb[116].mxu0 }
0x14b9   :  { %v3780_v25 = vpop.f32.mrb[117].mxu0  ;;  %v3796_v48 = vmax.f32 %v7324_v58, 0.0  ;;  %v7793_v58 = vld [vmem:[%s10383_s24 + $0x70] sm:$0xff]  }
0x14ba   :  { %v7325_v26 = vpop.f32.mrb[118].mxu0  ;;  %v3794_v19 = vmax.f32 %v3780_v25, 0.0  ;;  %v2903_v25 = vrot.slane %v9610_v49, 1  ;;  %6971 = vmatprep.subr.bf16.mxu0 %v7793_v58  ;;  %v7807_v58 = vld [vmem:[%s10383_s24 + $0xf8] sm:$0xff]  }
0x14bb   :  { %v3783_v14 = vpop.f32.mrb[119].mxu0  ;;  %v3798_v10 = vpack.c.bf16 %v3796_v48, %v3796_v48  ;;  %v2919_v26 = vrot.slane %v9610_v49, 5  ;;  %v7794_v48 = vld [vmem:[%s10383_s24 + $0x30] sm:$0xff]  }
0x14bc   :  { %v3795_v42 = vmax.f32 %v3783_v14, 0.0  ;;  %v7795_v14 = vld [vmem:[%s10383_s24 + $0xd0] sm:$0xff]   ;;  %6972 = vmatpush3.bf16.msra.mxu0 %v7794_v48 }
0x14be   :  { %v3797_v8 = vpack.c.bf16 %v3795_v42, %v3794_v19  ;;  %v7797_v19 = vld [vmem:[%s10383_s24 + $0x78] sm:$0xff]   ;;  %v7600_v42 = vpop.permute.xlu0 %7599 }
0x14bf   :  { %v7602_v6 = vunpack.i.h.bf16 %v7600_v42  ;;  %6973 = vmatprep.subr.bf16.mxu0 %v7797_v19 }
0x14c0   :  { %7342 = vmatprep.mubr.bf16.mxu1 %v3797_v8 }
0x14c1   :  { %7343 = vmatmul.mubr.bf16.vlgmr.msra.gmra.mrb[140].mxu1 %v3798_v10 }
0x14c2   :  { %6982 = vmatpush3.bf16.msra.mxu1 %v7788_v62  ;;  %v7804_v62 = vld [vmem:[%s10383_s24 + $0xa8] sm:$0xff]  }
0x14c3   :  { %6983 = vmatprep.subr.bf16.mxu1 %v7791_v41  ;;  %v7805_v41 = vld [vmem:[%s10383_s24 + $0xf0] sm:$0xff]  }
0x14c6   :  { %6984 = vmatpush3.bf16.msra.mxu1 %v7792_v51  ;;  %v7806_v51 = vld [vmem:[%s10383_s24 + $0xb0] sm:$0xff]  }
0x14c7   :  { %6985 = vmatprep.subr.bf16.mxu1 %v7795_v14 }
0x14ca   :  { %6986 = vmatpush3.bf16.msra.mxu1 %v7796_v38 }
0x1594   :  { %v7344_v0 = vpop.f32.mrb[140].mxu1 }
0x1595   :  { %v9626_v20 = vadd.f32 %v7344_v0, %v9531_v2  ;;  %v3833_v60 = vpop.f32.mrb[141].mxu1  ;;  %v7601_v0 = vunpack.i.l.bf16 %v7600_v42 }
0x1596   :  { %v9631_v5 = vadd.f32 %v3833_v60, %v9528_v1  ;;  %v7345_v7 = vpop.f32.mrb[142].mxu1  ;;  %v7799_v60 = vld [vmem:[%s10383_s24 + $0xd8] sm:$0xff]  }
0x1597   :  { %v9635_v28 = vsel %vm1273_vm5, %v9626_v20, %v7596_v36  ;;  %v3836_v13 = vpop.f32.mrb[143].mxu1  ;;  %v7798_v36 = vld [vmem:[%s10383_s24 + $0x38] sm:$0xff]   ;;  %6987 = vmatprep.subr.bf16.mxu1 %v7799_v60 }
0x1598   :  { %v9640_v2 = vsel %vm1273_vm5, %v9631_v5, %v3888_v57  ;;  %v3980_v1 = vrot.slane %v9635_v28, 2  ;;  %v3976_v4 = vrot.slane %v9635_v28, 1  ;;  %v3988_v15 = vrot.slane %v9635_v28, 4  ;;  %v10384_v7 = vld [vmem:[#allocation57_spill] sm:$0xff]  ;;  %6974 = vmatpush3.bf16.msra.mxu0 %v7798_v36 }
0x1599   :  { %v3912_v50 = vrot.slane %v9640_v2, 4  ;;  %v3908_v31 = vrot.slane %v9640_v2, 3  ;;  %v3984_v30 = vrot.slane %v9635_v28, 3  ;;  %v3900_v37 = vrot.slane %v9640_v2, 1 }
0x159a   :  { %v7618_v46 = vpack.i.bf16 %v2997_v12, %v3980_v1  ;;  %v7613_v16 = vpack.i.bf16 %v2993_v21, %v3976_v4  ;;  %v3916_v29 = vrot.slane %v9640_v2, 5  ;;  %v3904_v44 = vrot.slane %v9640_v2, 2 }
0x159b   :  { %v7628_v47 = vpack.i.bf16 %v3912_v50, %v3988_v15  ;;  %v7623_v52 = vpack.i.bf16 %v3908_v31, %v3984_v30  ;;  %v7638_v8 = vpack.i.bf16 %v2903_v25, %v3900_v37  ;;  %v3920_v43 = vrot.slane %v9640_v2, 6  ;;  %v7801_v50 = vld [vmem:[%s10383_s24 + $0xe0] sm:$0xff]  }
0x159c   :  { %7619 = vrot.lane.b32.xlu0 %v7618_v46, %s8119_s15  ;;  %7614 = vrot.lane.b32.xlu1 %v7613_v16, %s8120_s16  ;;  %v7633_v10 = vpack.i.bf16 %v2919_v26, %v3916_v29  ;;  %v9672_v35 = vadd.f32 %v3836_v13, %v9534_v22  ;;  %v7648_v56 = vpack.i.bf16 %v2907_v45, %v3904_v44  ;;  %v7800_v22 = vld [vmem:[%s10383_s24 + $0x98] sm:$0xff]   ;;  %v10385_v1 = vmov 0   ;;  %v7802_v15 = vld [vmem:[%s10383_s24 + $0xa0] sm:$0xff]  }
0x159d   :  { %v7643_v11 = vpack.i.bf16 %v2923_v34, %v3920_v43  ;;  %v9682_v57 = vadd.f32 %v9459_v40, %v10384_v7  ;;  %4521 = vmatprep.subr.bf16.mxu0 %v10385_v1  ;;  %v2927_v21 = vrot.slane %v9610_v49, 7  ;;  %v3924_v40 = vrot.slane %v9640_v2, 7  ;;  %6988 = vmatpush3.bf16.msra.mxu1 %v7800_v22  ;;  %v7610_v34 = vpop.permute.xlu0 %7609 }
0x159e   :  { %v9686_v13 = vsel %vm1273_vm5, %v9672_v35, %v7601_v0  ;;  %6989 = vmatprep.subr.bf16.mxu1 %v7801_v50  ;;  %v8130_v45 = vmov 0.0   ;;  %v7611_v22 = vunpack.i.l.bf16 %v7610_v34 }
0x159f   :  { %v2900_v12 = vsel %vm1273_vm5, %v9682_v57, %v7602_v6  ;;  %v3936_v4 = vrot.slane %v9686_v13, 2  ;;  %v3940_v31 = vrot.slane %v9686_v13, 3  ;;  %v3944_v30 = vrot.slane %v9686_v13, 4  ;;  %v9711_v6 = vpop.permute.xlu1 %7604 }
0x15a0   :  { %7629 = vrot.lane.b32.xlu0 %v7628_v47, %s8117_s30  ;;  %7624 = vrot.lane.b32.xlu1 %v7623_v52, %s8118_s6  ;;  %v2939_v23 = vrot.slane %v2900_v12, 2  ;;  %v7653_v46 = vpack.i.bf16 %v2900_v12, %v9686_v13  ;;  %v2943_v32 = vrot.slane %v2900_v12, 3  ;;  %v2947_v53 = vrot.slane %v2900_v12, 4 }
0x15a1   :  { %6990 = vmatpush3.bf16.msra.mxu1 %v7802_v15  ;;  %v3932_v37 = vrot.slane %v9686_v13, 1  ;;  %v3948_v29 = vrot.slane %v9686_v13, 5  ;;  %v2935_v25 = vrot.slane %v2900_v12, 1  ;;  %v2951_v26 = vrot.slane %v2900_v12, 5 }
0x15a2   :  { %v7658_v16 = vpack.i.bf16 %v2939_v23, %v3936_v4  ;;  %6991 = vmatprep.subr.bf16.mxu1 %v7803_v33  ;;  %v7663_v47 = vpack.i.bf16 %v2943_v32, %v3940_v31  ;;  %v7668_v52 = vpack.i.bf16 %v2947_v53, %v3944_v30  ;;  %v3956_v19 = vrot.slane %v9686_v13, 7 }
0x15a3   :  { %v7678_v48 = vpack.i.bf16 %v2935_v25, %v3932_v37  ;;  %v7673_v14 = vpack.i.bf16 %v2951_v26, %v3948_v29  ;;  %v3952_v42 = vrot.slane %v9686_v13, 6  ;;  %v2955_v44 = vrot.slane %v2900_v12, 6 }
0x15a4   :  { %7639 = vrot.lane.b32.xlu0 %v7638_v8, %s8120_s16  ;;  %7634 = vrot.lane.b32.xlu1 %v7633_v10, %s8121_s18  ;;  %v7808_v8 = vld [vmem:[%s10383_s24 + $0xb8] sm:$0xff]   ;;  %v2959_v10 = vrot.slane %v2900_v12, 7  ;;  %v7606_v7 = vunpack.i.l.bf16 %v9711_v6  ;;  %v7607_v37 = vunpack.i.h.bf16 %v9711_v6 }
0x15a5   :  { %6992 = vmatpush3.bf16.msra.mxu1 %v7804_v62  ;;  %v7683_v38 = vpack.i.bf16 %v2955_v44, %v3952_v42 }
0x15a6   :  { %6993 = vmatprep.subr.bf16.mxu1 %v7805_v41  ;;  %v7688_v43 = vpack.i.bf16 %v2959_v10, %v3956_v19 }
0x15a8   :  { %7649 = vrot.lane.b32.xlu0 %v7648_v56, %s8119_s15  ;;  %7644 = vrot.lane.b32.xlu1 %v7643_v11, %s8122_s22 }
0x15a9   :  { %6994 = vmatpush3.bf16.msra.mxu1 %v7806_v51 }
0x15aa   :  { %6995 = vmatprep.subr.bf16.mxu1 %v7807_v58 }
0x15ac   :  { %2928 = vrot.lane.b32.xlu0 %v2927_v21, %s8123_s23  ;;  %3925 = vrot.lane.b32.xlu1 %v3924_v40, %s8123_s23 }
0x15ad   :  { %6996 = vmatpush3.bf16.msra.mxu1 %v7808_v8 }
0x15ae   :  { %7346 = vmatprep.subr.bf16.mxu1 %v8130_v45 }
0x15b0   :  { %7654 = vrot.lane.b32.xlu0 %v7653_v46, %s8124_s26  ;;  %7659 = vrot.lane.b32.xlu1 %v7658_v16, %s8125_s28  ;;  %v3012_v16 = vsel %vm377_vm1, %v7606_v7, %v7611_v22 }
0x15b4   :  { %7664 = vrot.lane.b32.xlu0 %v7663_v47, %s8126_s1  ;;  %7669 = vrot.lane.b32.xlu1 %v7668_v52, %s8127_s2  ;;  %v7612_v52 = vunpack.i.h.bf16 %v7610_v34 }
0x15b6   :  { %v2969_v10 = vsel %vm377_vm1, %v7607_v37, %v7612_v52 }
0x15b8   :  { %7679 = vrot.lane.b32.xlu0 %v7678_v48, %s8128_s7  ;;  %7674 = vrot.lane.b32.xlu1 %v7673_v14, %s8129_s10 }
0x15bc   :  { %7689 = vrot.lane.b32.xlu0 %v7688_v43, %s8131_s11  ;;  %7684 = vrot.lane.b32.xlu1 %v7683_v38, %s8132_s0 }
0x160e   :  { %v7620_v0 = vpop.permute.xlu0 %7619  ;;  %v7615_v36 = vpop.permute.xlu1 %7614 }
0x160f   :  { %v7622_v60 = vunpack.i.h.bf16 %v7620_v0  ;;  %v7617_v56 = vunpack.i.h.bf16 %v7615_v36  ;;  %v7616_v11 = vunpack.i.l.bf16 %v7615_v36  ;;  %v7621_v13 = vunpack.i.l.bf16 %v7620_v0 }
0x1611   :  { %v3009_v12 = vsel %vm2963_vm14, %v9606_v61, %v7617_v56  ;;  %v3992_v21 = vsel %vm2963_vm14, %v9635_v28, %v7616_v11 }
0x1612   :  { %v7630_v40 = vpop.permute.xlu0 %7629  ;;  %v7625_v4 = vpop.permute.xlu1 %7624  ;;  %v3010_v50 = vsel %vm2965_vm15, %v3009_v12, %v7622_v60  ;;  %v3993_v31 = vsel %vm2965_vm15, %v3992_v21, %v7621_v13 }
0x1613   :  { %v7631_v15 = vunpack.i.l.bf16 %v7630_v40  ;;  %v7626_v23 = vunpack.i.l.bf16 %v7625_v4  ;;  %v3011_v46 = vsel %vm2967_vm0, %v3010_v50, %v7606_v7  ;;  %v7632_v62 = vunpack.i.h.bf16 %v7630_v40 }
0x1614   :  { %v7698_v30 = vpack.i.bf16 %v3012_v16, %v3011_v46  ;;  %v7627_v28 = vunpack.i.h.bf16 %v7625_v4 }
0x1615   :  { %v3994_v33 = vsel %vm2967_vm0, %v3993_v31, %v7626_v23  ;;  %v3995_v61 = vsel %vm377_vm1, %v7626_v23, %v7631_v15 }
0x1616   :  { %v7640_v32 = vpop.permute.xlu0 %7639  ;;  %v7635_v53 = vpop.permute.xlu1 %7634  ;;  %v7693_v47 = vpack.i.bf16 %v3995_v61, %v3994_v33  ;;  %7699 = vrot.lane.b32.xlu0 %v7698_v30, %s8133_s5  ;;  %v3963_v25 = vsel %vm377_vm1, %v7627_v28, %v7632_v62  ;;  %vm2976_vm1 = vcmask 195584  }
0x1617   :  { %v7641_v29 = vunpack.i.l.bf16 %v7640_v32  ;;  %v7636_v41 = vunpack.i.l.bf16 %v7635_v53  ;;  %v7642_v51 = vunpack.i.h.bf16 %v7640_v32  ;;  %v7637_v58 = vunpack.i.h.bf16 %v7635_v53  ;;  %v7813_v32 = vld [vmem:[%s10383_s24 + $0x110] sm:$0xff]  }
0x1618   :  { %7694 = vrot.lane.b32.xlu1 %v7693_v47, %s8133_s5 }
0x1619   :  { %v3960_v44 = vsel %vm2963_vm14, %v9640_v2, %v7641_v29  ;;  %v3964_v43 = vsel %vm2970_vm3, %v3963_v25, %v7636_v41  ;;  %v2964_v38 = vsel %vm2963_vm14, %v9610_v49, %v7642_v51  ;;  %v2971_v6 = vsel %vm2970_vm3, %v2969_v10, %v7637_v58 }
0x161a   :  { %v7650_v26 = vpop.permute.xlu0 %7649  ;;  %v7645_v48 = vpop.permute.xlu1 %7644  ;;  %2858 = vrot.lane.b32.xlu0 %v9682_v57, %s8116_s19  ;;  %vm2986_vm14 = vcmask 580608   ;;  %vm4434_vm3 = vcmask 1046528  }
0x161b   :  { %v7652_v14 = vunpack.i.h.bf16 %v7650_v26  ;;  %v7651_v19 = vunpack.i.l.bf16 %v7650_v26  ;;  %v7647_v42 = vunpack.i.h.bf16 %v7645_v48  ;;  %v7646_v8 = vunpack.i.l.bf16 %v7645_v48 }
0x161c   :  { %2856 = vrot.lane.b32.xlu1 %v9602_v54, %s8116_s19 }
0x161d   :  { %v3961_v34 = vsel %vm2965_vm15, %v3960_v44, %v7651_v19  ;;  %v3965_v57 = vsel %vm2972_vm8, %v3964_v43, %v7646_v8  ;;  %v2966_v0 = vsel %vm2965_vm15, %v2964_v38, %v7652_v14  ;;  %v2973_v60 = vsel %vm2972_vm8, %v2971_v6, %v7647_v42  ;;  %v7814_v19 = vld [vmem:[%s10383_s24 + $0x118] sm:$0xff]  }
0x161e   :  { %v3962_v36 = vsel %vm2967_vm0, %v3961_v34, %v7627_v28  ;;  %v2929_v2 = vpop.permute.xlu0 %2928  ;;  %v3926_v54 = vpop.permute.xlu1 %3925  ;;  %2868 = vrot.lane.b32.xlu0 %v9573_v63, %s8134_s9  ;;  %v2968_v22 = vsel %vm2967_vm0, %v2966_v0, %v7607_v37  ;;  %vm2988_vm15 = vcmask 867328   ;;  %v7815_v34 = vld [vmem:[%s10383_s24 + $0x120] sm:$0xff]   ;;  %vm8135_vm0 = vmmov 0  }
0x161f   :  { %v4032_v56 = vrot.slane %v3962_v36, 7  ;;  %v3966_v11 = vsel %vm2974_vm9, %v3965_v57, %v3926_v54  ;;  %v2975_v7 = vsel %vm2974_vm9, %v2973_v60, %v2929_v2  ;;  %v7809_v0 = vld [vmem:[%s10386_s13] sm:$0xff]   ;;  %v7810_v60 = vld [vmem:[%s10386_s13 + $0x8] sm:$0xff]   ;;  %vm4435_vm8 = vcmask 1047552  }
0x1620   :  { %v4033_v49 = vrot.slane %v3966_v11, 7  ;;  %2860 = vrot.lane.b32.xlu1 %v9598_v24, %s8116_s19  ;;  %v7811_v24 = vld [vmem:[%s10383_s24 + $0x100] sm:$0xff]   ;;  %vm2990_vm9 = vcmask 105472  }
0x1621   :  { %v4045_v40 = vsel %vm4044_vm7, %v2968_v22, %v4032_v56  ;;  %v10387_v56 = vld [vmem:[#allocation34_spill] sm:$0xff] }
0x1622   :  { %v7655_v13 = vpop.permute.xlu0 %7654  ;;  %v9749_v12 = vpop.permute.xlu1 %7659  ;;  %v4046_v21 = vsel %vm4044_vm7, %v2975_v7, %v4033_v49  ;;  %2872 = vrot.lane.b32.xlu0 %v9560_v59, %s8134_s9  ;;  %v4057_v4 = vpack.c.bf16 %v4045_v40, %v4045_v40  ;;  %v7812_v59 = vld [vmem:[%s10383_s24 + $0x108] sm:$0xff]   ;;  %v4052_v11 = vpack.c.bf16 %v10387_v56, %v10387_v56  ;;  %v7818_v49 = vld [vmem:[%s10383_s24 + $0x138] sm:$0xff]   ;;  %v7819_v22 = vld [vmem:[%s10383_s24 + $0x140] sm:$0xff]  }
0x1623   :  { %v4058_v63 = vpack.c.bf16 %v4046_v21, %v4046_v21  ;;  %v7656_v23 = vunpack.i.l.bf16 %v7655_v13  ;;  %v7657_v30 = vunpack.i.h.bf16 %v7655_v13  ;;  %v7662_v53 = vunpack.i.h.bf16 %v9749_v12  ;;  %v7820_v7 = vld [vmem:[%s10383_s24 + $0x148] sm:$0xff]   ;;  %v7821_v13 = vld [vmem:[%s10383_s24 + $0x150] sm:$0xff]   ;;  %v7831_v56 = vld [vmem:[%s10390_s17 + $0x18] ss:$12 sps:$4 sm:$0xff]  }
0x1624   :  { %2870 = vrot.lane.b32.xlu1 %v9579_v39, %s8134_s9  ;;  %v7661_v39 = vunpack.i.l.bf16 %v9749_v12  ;;  %v7822_v12 = vld [vmem:[%s10383_s24 + $0x158] sm:$0xff]   ;;  %v10388_v21 = vmov 65535  }
0x1625   :  { %4473 = vmatprep.mubr.bf16.mxu0 %v4058_v63  ;;  %v2977_v41 = vsel %vm2976_vm1, %v2929_v2, %v7657_v30  ;;  %v7816_v2 = vld [vmem:[%s10383_s24 + $0x128] sm:$0xff]   ;;  %v4436_v40 = vsel %vm4434_vm3, 4294967295, %v10388_v21  ;;  %v7823_v63 = vld [vmem:[%s10383_s24 + $0x160] sm:$0xff]  }
0x1626   :  { %v7665_v50 = vpop.permute.xlu0 %7664  ;;  %v7670_v15 = vpop.permute.xlu1 %7669  ;;  %4474 = vmatmul.mubr.bf16.vlgmr.msra.gmra.mrb[120].mxu0 %v4057_v4  ;;  %3855 = vrot.lane.b32.xlu0 %v9672_v35, %s8116_s19  ;;  %v4437_v4 = vsel %vm4435_vm8, %v4436_v40, 0 }
0x1627   :  { %v7666_v46 = vunpack.i.l.bf16 %v7665_v50  ;;  %4522 = vmatpush1.bf16.msra.mxu0 %v7811_v24  ;;  %v7667_v35 = vunpack.i.h.bf16 %v7665_v50  ;;  %v7671_v33 = vunpack.i.l.bf16 %v7670_v15  ;;  %v7672_v37 = vunpack.i.h.bf16 %v7670_v15  ;;  %v7824_v24 = vld [vmem:[%s10383_s24 + $0x168] sm:$0xff]  }
0x1628   :  { %3853 = vrot.lane.b32.xlu1 %v9631_v5, %s8116_s19  ;;  %4523 = vmatprep.subr.bf16.mxu0 %v10385_v1  ;;  %v3967_v5 = vsel %vm2976_vm1, %v3926_v54, %v7656_v23  ;;  %v7817_v54 = vld [vmem:[%s10383_s24 + $0x130] sm:$0xff]   ;;  %v4439_v50 = vand.u32 %v7824_v24, %v4437_v4  ;;  %vm2883_vm1 = vcmask 547840  }
0x1629   :  { %v3970_v62 = vsel %vm2982_vm10, %v7661_v39, %v7666_v46 }
0x162a   :  { %v7680_v16 = vpop.permute.xlu0 %7679  ;;  %v7675_v31 = vpop.permute.xlu1 %7674  ;;  %3865 = vrot.lane.b32.xlu0 %v9567_v27, %s8134_s9  ;;  %v3971_v51 = vsel %vm2984_vm13, %v3970_v62, %v7671_v33 }
0x162b   :  { %v7681_v61 = vunpack.i.l.bf16 %v7680_v16  ;;  %v7682_v28 = vunpack.i.h.bf16 %v7680_v16  ;;  %4524 = vmatpush1.bf16.msra.mxu0 %v7812_v59  ;;  %v7676_v52 = vunpack.i.l.bf16 %v7675_v31  ;;  %v7677_v58 = vunpack.i.h.bf16 %v7675_v31 }
0x162c   :  { %3857 = vrot.lane.b32.xlu1 %v9626_v20, %s8116_s19  ;;  %4525 = vmatprep.subr.bf16.mxu0 %v10385_v1  ;;  %v2983_v20 = vsel %vm2982_vm10, %v7662_v53, %v7667_v35  ;;  %vm4430_vm10 = vcmask 777216  }
0x162d   :  { %v3968_v47 = vsel %vm2978_vm11, %v3967_v5, %v7681_v61  ;;  %v2979_v25 = vsel %vm2978_vm11, %v2977_v41, %v7682_v28  ;;  %v3972_v42 = vsel %vm2986_vm14, %v3971_v51, %v7676_v52 }
0x162e   :  { %v3969_v27 = vsel %vm2980_vm12, %v3968_v47, %v7661_v39  ;;  %v9776_v29 = vpop.permute.xlu1 %7684  ;;  %3869 = vrot.lane.b32.xlu0 %v9556_v3, %s8134_s9  ;;  %v2985_v3 = vsel %vm2984_vm13, %v2983_v20, %v7672_v37  ;;  %v2981_v10 = vsel %vm2980_vm12, %v2979_v25, %v7662_v53  ;;  %v7690_v15 = vpop.permute.xlu0 %7689 }
0x162f   :  { %v4034_v26 = vrot.slane %v3969_v27, 7  ;;  %v7687_v48 = vunpack.i.h.bf16 %v9776_v29  ;;  %v7686_v14 = vunpack.i.l.bf16 %v9776_v29  ;;  %4526 = vmatpush1.bf16.msra.mxu0 %v7813_v32  ;;  %v2987_v44 = vsel %vm2986_vm14, %v2985_v3, %v7677_v58  ;;  %v10389_v27 = vld [vmem:[#allocation42_spill] sm:$0xff] }
0x1630   :  { %3867 = vrot.lane.b32.xlu1 %v9583_v55, %s8134_s9  ;;  %4527 = vmatprep.subr.bf16.mxu0 %v10385_v1  ;;  %v7691_v23 = vunpack.i.l.bf16 %v7690_v15  ;;  %v7692_v59 = vunpack.i.h.bf16 %v7690_v15 }
0x1631   :  { %v3973_v8 = vsel %vm2988_vm15, %v3972_v42, %v7686_v14  ;;  %v2989_v55 = vsel %vm2988_vm15, %v2987_v44, %v7687_v48  ;;  %v4047_v38 = vsel %vm4044_vm7, %v2981_v10, %v4034_v26 }
0x1632   :  { %v4035_v43 = vrot.slane %v3973_v8, 7  ;;  %v4059_v36 = vpack.c.bf16 %v4047_v38, %v4047_v38  ;;  %v3974_v33 = vsel %vm2990_vm9, %v7686_v14, %v7691_v23  ;;  %v2991_v28 = vsel %vm2990_vm9, %v7687_v48, %v7692_v59  ;;  %v10393_v8 = vld [vmem:[#allocation45_spill] sm:$0xff]  ;;  %v7839_v23 = vld [vmem:[%s10390_s17 + $0x34] ss:$12 sps:$4 sm:$0xff]  }
0x1633   :  { %4528 = vmatpush1.bf16.msra.mxu0 %v7814_v19  ;;  %v10391_v19 = vld [vmem:[#allocation48_spill] sm:$0xff] }
0x1634   :  { %v4048_v6 = vsel %vm4044_vm7, %v2989_v55, %v4035_v43  ;;  %4529 = vmatprep.subr.bf16.mxu0 %v10385_v1  ;;  %v7837_v59 = vld [vmem:[%s10390_s17 + $0x30] ss:$12 sps:$4 sm:$0xff]  }
0x1635   :  { %v4060_v57 = vpack.c.bf16 %v4048_v6, %v4048_v6  ;;  %v7827_v6 = vld [vmem:[%s10390_s17 + $0x4] ss:$12 sps:$4 sm:$0xff]  }
0x1637   :  { %4513 = vmatprep.mubr.bf16.mxu1 %v4060_v57  ;;  %4530 = vmatpush1.bf16.msra.mxu0 %v7815_v34  ;;  %v7825_v34 = vld [vmem:[%s10390_s17] ss:$12 sps:$4 sm:$0xff]  }
0x1638   :  { %4514 = vmatmul.mubr.bf16.vlgmr.msra.gmra.mrb[144].mxu1 %v4059_v36  ;;  %4531 = vmatprep.subr.bf16.mxu0 %v10385_v1  ;;  %v7830_v36 = vld [vmem:[%s10392_s21 + $0x4] ss:$84 sps:$4 sm:$0xff]  }
0x1639   :  { %7347 = vmatpush3.bf16.msra.mxu1 %v7809_v0  ;;  %7350 = vmatprep.mubr.msk.bf16.mxu1 %vm8135_vm0, %v8130_v45  ;;  %v7828_v0 = vld [vmem:[%s10392_s21] ss:$84 sps:$4 sm:$0xff]  }
0x163a   :  { %7348 = vmatprep.subr.bf16.mxu1 %v8130_v45 }
0x163b   :  { %4532 = vmatpush1.bf16.msra.mxu0 %v7816_v2 }
0x163c   :  { %4533 = vmatprep.subr.bf16.mxu0 %v10385_v1 }
0x163d   :  { %7349 = vmatpush3.bf16.msra.mxu1 %v7810_v60  ;;  %v7833_v60 = vld [vmem:[%s10390_s17 + $0x1c] ss:$12 sps:$4 sm:$0xff]  }
0x163e   :  { %4732 = vmatprep.subr.bf16.mxu1 %v7827_v6  ;;  %v7855_v6 = vld [vmem:[%s10392_s21 + $0xbc] ss:$84 sps:$4 sm:$0xff]  }
0x163f   :  { %4534 = vmatpush1.bf16.msra.mxu0 %v7817_v54 }
0x1640   :  { %7351 = vmatmul.mubr.msk.bf16.vlgmr.msra.gmra.mrb[148].mxu1 %vm1273_vm5, %v4052_v11  ;;  %4535 = vmatprep.subr.bf16.mxu0 %v10385_v1  ;;  %v7836_v11 = vld [vmem:[%s10392_s21 + $0xac] ss:$84 sps:$4 sm:$0xff]  }
0x1641   :  { %4764 = vmatprep.mubr.bf16.mxu1 %v10385_v1  ;;  %4733 = vmatpush1.bf16.msra.mxu1 %v7825_v34 }
0x1642   :  { %4734 = vmatprep.subr.bf16.mxu1 %v7833_v60  ;;  %v7857_v60 = vld [vmem:[%s10392_s21 + $0x160] ss:$84 sps:$4 sm:$0xff]  }
0x1643   :  { %4536 = vmatpush1.bf16.msra.mxu0 %v7818_v49 }
0x1644   :  { %4537 = vmatprep.subr.bf16.mxu0 %v10385_v1 }
0x1645   :  { %4735 = vmatpush1.bf16.msra.mxu1 %v7831_v56  ;;  %v7861_v56 = vld [vmem:[%s10392_s21 + $0x20c] ss:$84 sps:$4 sm:$0x1f]  }
0x1646   :  { %4736 = vmatprep.subr.bf16.mxu1 %v7839_v23  ;;  %v7882_v23 = vld [vmem:[%s10392_s21 + $0x174] ss:$84 sps:$4 sm:$0xff]  }
0x1647   :  { %4538 = vmatpush1.bf16.msra.mxu0 %v7819_v22  ;;  %v7834_v22 = vld [vmem:[%s10392_s21 + $0xa8] ss:$84 sps:$4 sm:$0xff]  }
0x1648   :  { %4539 = vmatprep.subr.bf16.mxu0 %v10385_v1 }
0x1649   :  { %4737 = vmatpush1.bf16.msra.mxu1 %v7837_v59  ;;  %v7880_v59 = vld [vmem:[%s10392_s21 + $0x170] ss:$84 sps:$4 sm:$0xff]  }
0x164b   :  { %4540 = vmatpush1.bf16.msra.mxu0 %v7820_v7 }
0x164c   :  { %4541 = vmatprep.subr.bf16.mxu0 %v10385_v1 }
0x164f   :  { %4542 = vmatpush1.bf16.msra.mxu0 %v7821_v13 }
0x1650   :  { %4543 = vmatprep.subr.bf16.mxu0 %v10385_v1 }
0x1653   :  { %4544 = vmatpush1.bf16.msra.mxu0 %v7822_v12 }
0x1654   :  { %4545 = vmatprep.subr.bf16.mxu0 %v10385_v1 }
0x1657   :  { %4546 = vmatpush1.bf16.msra.mxu0 %v7823_v63 }
0x1658   :  { %4547 = vmatprep.subr.bf16.mxu0 %v10385_v1 }
0x165b   :  { %4548 = vmatpush1.bf16.msra.mxu0 %v4439_v50 }
0x165c   :  { %5478 = vmatprep.subr.bf16.mxu0 %v7830_v36  ;;  %v7856_v36 = vld [vmem:[%s10390_s17 + $0x20] ss:$12 sps:$4 sm:$0xff]  }
0x1688   :  { %v7700_v46 = vpop.permute.xlu0 %7699 }
0x1689   :  { %v7702_v16 = vunpack.i.h.bf16 %v7700_v46  ;;  %v7701_v31 = vunpack.i.l.bf16 %v7700_v46  ;;  %v7842_v46 = vld [vmem:[%s10392_s21 + $0x154] ss:$84 sps:$4 sm:$0xff]  }
0x168a   :  { %v7695_v39 = vpop.permute.xlu1 %7694 }
0x168b   :  { %v7697_v30 = vunpack.i.h.bf16 %v7695_v39  ;;  %v7696_v35 = vunpack.i.l.bf16 %v7695_v39  ;;  %v3019_v52 = vsel %vm950_vm2, %v7701_v31, %v7702_v16  ;;  %v3022_v37 = vsel %vm950_vm2, %v2991_v28, %v7701_v31  ;;  %v7843_v39 = vld [vmem:[%s10390_s17 + $0x4c] ss:$12 sps:$4 sm:$0x1f]   ;;  %v7845_v16 = vld [vmem:[%s10392_s21 + $0x1fc] ss:$84 sps:$4 sm:$0x1f]  }
0x168c   :  { %v2859_v62 = vpop.permute.xlu0 %2858  ;;  %v7847_v31 = vld [vmem:[%s10390_s17 + $0x48] ss:$12 sps:$4 sm:$0x1f]   ;;  %6479 = vmatprep.subr.msk.bf16.mxu1 %vm1907_vm6, %v7843_v39 }
0x168d   :  { %v4002_v61 = vsel %vm950_vm2, %v7696_v35, %v7697_v30  ;;  %v4004_v5 = vsel %vm950_vm2, %v3974_v33, %v7696_v35  ;;  %v2878_v10 = vsel %vm1273_vm5, %v10393_v8, %v2859_v62  ;;  %v7848_v30 = vld [vmem:[%s10392_s21 + $0x1f8] ss:$84 sps:$4 sm:$0x1f]   ;;  %v7851_v35 = vld [vmem:[%s10392_s21 + $0x14] ss:$84 sps:$4 sm:$0xff]   ;;  %v4724_v33 = vsel %vm1907_vm6, %v7847_v31, 0 }
0x168e   :  { %v4036_v32 = vrot.slane %v4004_v5, 7  ;;  %v4037_v53 = vrot.slane %v4002_v61, 7  ;;  %v2857_v47 = vpop.permute.xlu1 %2856  ;;  %v5416_v61 = vsel %vm1907_vm6, %v7848_v30, 0  ;;  %v8136_v5 = vmov 58   ;;  %4739 = vmatpush1.bf16.msra.mxu1 %v4724_v33 }
0x168f   :  { %v2877_v41 = vsel %vm1273_vm5, %v10389_v27, %v2857_v47  ;;  %7704 = vset.pattern.permute.xlu0 %v8136_v5  ;;  %7354 = vmatprep.subr.bf16.mxu1 %v8130_v45  ;;  %vm4719_vm2 = vcmask 474112   ;;  %v7887_v39 = vld [vmem:[%s10392_s21 + $0x200] ss:$84 sps:$4 sm:$0x1f]   ;;  %v7891_v5 = vld [vmem:[%s10392_s21 + $0x1c] ss:$84 sps:$4 sm:$0xff]  }
0x1690   :  { %v4050_v20 = vsel %vm4044_vm7, %v3019_v52, %v4037_v53  ;;  %v4049_v51 = vsel %vm4044_vm7, %v3022_v37, %v4036_v32  ;;  %v2869_v58 = vpop.permute.xlu0 %2868  ;;  %v8137_v52 = vmov 60   ;;  %v7885_v30 = vld [vmem:[%s10392_s21 + $0x21c] ss:$84 sps:$4 sm:$0x1f]   ;;  %v5422_v33 = vsel %vm1907_vm6, %v7887_v39, 0 }
0x1691   :  { %v4062_v29 = vpack.c.bf16 %v4050_v20, %v4050_v20  ;;  %v4061_v25 = vpack.c.bf16 %v4049_v51, %v4049_v51  ;;  %v2880_v26 = vsel %vm1135_vm4, %v2877_v41, %v2869_v58  ;;  %7703 = vset.pattern.permute.xlu1 %v8137_v52  ;;  %v7900_v52 = vld [vmem:[%s10392_s21 + $0xdc] ss:$84 sps:$4 sm:$0xff]   ;;  %v7958_v39 = vld [vmem:[%s10392_s21 + $0xf4] ss:$84 sps:$4 sm:$0xff]  }
0x1692   :  { %v2861_v48 = vpop.permute.xlu1 %2860  ;;  %v2884_v14 = vsel %vm2883_vm1, %v2880_v26, 0.0 }
0x1693   :  { %v2879_v42 = vsel %vm1273_vm5, %v10391_v19, %v2861_v48  ;;  %6462 = vmatprep.mubr.msk.bf16.mxu0 %vm4430_vm10, %v4062_v29  ;;  %2887 = vst [vmem:[%s8306_s20] sm:$0xff] %v2884_v14 }
0x1694   :  { %4554 = vmatmul.mubr.bf16.vlgmr.msra.gmra.mrb[124].mxu0 %v4061_v25  ;;  %v2873_v3 = vpop.permute.xlu0 %2872 }
0x1695   :  { %5510 = vmatprep.mubr.bf16.mxu0 %v10385_v1  ;;  %v2882_v44 = vsel %vm1135_vm4, %v2879_v42, %v2873_v3  ;;  %5479 = vmatpush1.bf16.msra.mxu0 %v7828_v0  ;;  %v7853_v0 = vld [vmem:[%s10392_s21 + $0xb8] ss:$84 sps:$4 sm:$0xff]  }
0x1696   :  { %v2871_v43 = vpop.permute.xlu1 %2870  ;;  %v2886_v55 = vsel %vm2883_vm1, %v2882_v44, 0.0  ;;  %5480 = vmatprep.subr.bf16.mxu0 %v7836_v11  ;;  %v7863_v11 = vld [vmem:[%s10390_s17 + $0x50] ss:$12 sps:$4 sm:$0x1f]  }
0x1697   :  { %v2881_v38 = vsel %vm1135_vm4, %v2878_v10, %v2871_v43  ;;  %2889 = vst [vmem:[%s8306_s20 + $0x10] sm:$0x1f] %v2886_v55  ;;  %v7849_v55 = vld [vmem:[%s10392_s21 + $0x10] ss:$84 sps:$4 sm:$0xff]  }
0x1698   :  { %v2885_v57 = vsel %vm2883_vm1, %v2881_v38, 0.0  ;;  %v3856_v2 = vpop.permute.xlu0 %3855  ;;  %v7852_v38 = vld [vmem:[%s10390_s17 + $0x8] ss:$12 sps:$4 sm:$0xff]  }
0x1699   :  { %2888 = vst [vmem:[%s8306_s20 + $0x8] sm:$0xff] %v2885_v57  ;;  %5481 = vmatpush1.bf16.msra.mxu0 %v7834_v22  ;;  %v3875_v63 = vsel %vm1273_vm5, %v9436_v17, %v3856_v2  ;;  %v7840_v17 = vld [vmem:[%s10392_s21 + $0x150] ss:$84 sps:$4 sm:$0xff]  }
0x169a   :  { %v3854_v54 = vpop.permute.xlu1 %3853  ;;  %5482 = vmatprep.subr.bf16.mxu0 %v7842_v46  ;;  %v7859_v2 = vld [vmem:[%s10392_s21 + $0x164] ss:$84 sps:$4 sm:$0xff]  }
0x169b   :  { %v3874_v49 = vsel %vm1273_vm5, %v9427_v9, %v3854_v54  ;;  %v7860_v54 = vld [vmem:[%s10390_s17 + $0x38] ss:$12 sps:$4 sm:$0xff]  }
0x169c   :  { %v3866_v7 = vpop.permute.xlu0 %3865  ;;  %v7877_v46 = vld [vmem:[%s10392_s21 + $0x158] ss:$84 sps:$4 sm:$0xff]  }
0x169d   :  { %v3877_v13 = vsel %vm1135_vm4, %v3874_v49, %v3866_v7  ;;  %5483 = vmatpush1.bf16.msra.mxu0 %v7840_v17  ;;  %v7864_v49 = vld [vmem:[%s10392_s21 + $0x208] ss:$84 sps:$4 sm:$0x1f]   ;;  %v4730_v7 = vsel %vm1907_vm6, %v7863_v11, 0 }
0x169e   :  { %v3858_v12 = vpop.permute.xlu1 %3857  ;;  %v3880_v21 = vsel %vm2883_vm1, %v3877_v13, 0.0  ;;  %6566 = vmatprep.subr.msk.bf16.mxu0 %vm1907_vm6, %v7845_v16  ;;  %v5428_v13 = vsel %vm1907_vm6, %v7864_v49, 0  ;;  %v7883_v17 = vld [vmem:[%s10392_s21 + $0x204] ss:$84 sps:$4 sm:$0x1f]  }
0x169f   :  { %v3876_v9 = vsel %vm1273_vm5, %v9445_v18, %v3858_v12  ;;  %6413 = vst [vmem:[%s8306_s20 + $0x18] sm:$0xff] %v3880_v21  ;;  %v7867_v12 = vld [vmem:[%s10392_s21 + $0xc] ss:$84 sps:$4 sm:$0xff]   ;;  %v7870_v21 = vld [vmem:[%s10392_s21 + $0x24] ss:$84 sps:$4 sm:$0xff]  }
0x16a0   :  { %v3870_v40 = vpop.permute.xlu0 %3869  ;;  %v7888_v16 = vld [vmem:[%s10392_s21 + $0x218] ss:$84 sps:$4 sm:$0x1f]  }
0x16a1   :  { %v3879_v24 = vsel %vm1135_vm4, %v3876_v9, %v3870_v40  ;;  %5485 = vmatpush1.bf16.msra.mxu0 %v5416_v61  ;;  %v7865_v40 = vld [vmem:[%s10392_s21 + $0x8] ss:$84 sps:$4 sm:$0xff]   ;;  %v5440_v61 = vsel %vm1907_vm6, %v7888_v16, 0  ;;  %v7936_v11 = vld [vmem:[%s10392_s21 + $0x238] ss:$84 sps:$4 sm:$0x1f]  }
0x16a2   :  { %v3868_v4 = vpop.permute.xlu1 %3867  ;;  %v3882_v50 = vsel %vm2883_vm1, %v3879_v24, 0.0  ;;  %5560 = vmatprep.subr.bf16.mxu0 %v7851_v35  ;;  %v7873_v24 = vld [vmem:[%s10392_s21 + $0xb4] ss:$84 sps:$4 sm:$0xff]   ;;  %v7961_v16 = vld [vmem:[%s10392_s21 + $0x19c] ss:$84 sps:$4 sm:$0xff]  }
0x16a3   :  { %v3878_v15 = vsel %vm1135_vm4, %v3875_v63, %v3868_v4  ;;  %6415 = vst [vmem:[%s8306_s20 + $0x28] sm:$0x1f] %v3882_v50  ;;  %v7868_v63 = vld [vmem:[%s10392_s21 + $0x20] ss:$84 sps:$4 sm:$0xff]   ;;  %v7871_v50 = vld [vmem:[%s10392_s21 + $0xb0] ss:$84 sps:$4 sm:$0xff]  }
0x16a4   :  { %v3881_v18 = vsel %vm2883_vm1, %v3878_v15, 0.0  ;;  %v7876_v4 = vld [vmem:[%s10392_s21 + $0xcc] ss:$84 sps:$4 sm:$0xff]   ;;  %v7874_v15 = vld [vmem:[%s10392_s21 + $0xc8] ss:$84 sps:$4 sm:$0xff]  }
0x16a5   :  { %6414 = vst [vmem:[%s8306_s20 + $0x20] sm:$0xff] %v3881_v18  ;;  %s10394_s20 = sld [smem:[#allocation17_spill]]  ;;  %v7879_v18 = vld [vmem:[%s10392_s21 + $0x15c] ss:$84 sps:$4 sm:$0xff]  }
0x16ab   :  { %v6466_v3 = vld [vmem:[%s10394_s20] ss:$0 sm:$0xff] }
0x16f9   :  { %v6975_v62 = vpop.f32.mrb[120].mxu0 }
0x16fa   :  { %v6976_v28 = vpop.f32.mrb[121].mxu0 }
0x16fb   :  { %v6977_v32 = vadd.f32 %v6976_v28, %v6975_v62  ;;  %v6978_v53 = vpop.f32.mrb[122].mxu0  ;;  %v7894_v62 = vld [vmem:[%s10392_s21 + $0x34] ss:$84 sps:$4 sm:$0xff]   ;;  %v7889_v28 = vld [vmem:[%s10392_s21 + $0x18] ss:$84 sps:$4 sm:$0xff]  }
0x16fc   :  { %v6979_v47 = vpop.f32.mrb[123].mxu0  ;;  %v8138_v53 = vmov 59  }
0x16fd   :  { %v7897_v47 = vld [vmem:[%s10392_s21 + $0xc4] ss:$84 sps:$4 sm:$0xff]  }
0x170b   :  { %v6997_v37 = vpop.f32.mrb[144].mxu1 }
0x170c   :  { %v6998_v27 = vpop.f32.mrb[145].mxu1 }
0x170d   :  { %v6999_v41 = vadd.f32 %v6998_v27, %v6997_v37  ;;  %v7000_v20 = vpop.f32.mrb[146].mxu1  ;;  %v7895_v37 = vld [vmem:[%s10392_s21 + $0xc0] ss:$84 sps:$4 sm:$0xff]   ;;  %v7898_v27 = vld [vmem:[%s10392_s21 + $0xd8] ss:$84 sps:$4 sm:$0xff]  }
0x170e   :  { %v7001_v51 = vpop.f32.mrb[147].mxu1  ;;  %v7906_v20 = vld [vmem:[%s10392_s21 + $0x184] ss:$84 sps:$4 sm:$0xff]  }
0x170f   :  { %v4516_v58 = vadd.f32 %v6999_v41, %v6977_v32  ;;  %v7892_v32 = vld [vmem:[%s10392_s21 + $0x30] ss:$84 sps:$4 sm:$0xff]   ;;  %v7903_v41 = vld [vmem:[%s10392_s21 + $0x16c] ss:$84 sps:$4 sm:$0xff]   ;;  %v7901_v51 = vld [vmem:[%s10392_s21 + $0x168] ss:$84 sps:$4 sm:$0xff]  }
0x1713   :  { %v4610_v29 = vpop.f32.mrb[148].mxu1 }
0x1714   :  { %v7352_v25 = vpop.f32.mrb[149].mxu1 }
0x1715   :  { %v4613_v26 = vpop.f32.mrb[150].mxu1  ;;  %v7909_v25 = vld [vmem:[%s10392_s21 + $0x22c] ss:$84 sps:$4 sm:$0x1f]  }
0x1716   :  { %v7353_v48 = vpop.f32.mrb[151].mxu1  ;;  %v7911_v26 = vld [vmem:[%s10392_s21 + $0x210] ss:$84 sps:$4 sm:$0x1f]  }
0x1717   :  { %v7912_v48 = vld [vmem:[%s10392_s21 + $0x228] ss:$84 sps:$4 sm:$0x1f]  }
0x1767   :  { %v4555_v14 = vpop.f32.mrb[124].mxu0 }
0x1768   :  { %v4556_v19 = vadd.f32 %v4555_v14, %v4516_v58  ;;  %v4557_v42 = vpop.f32.mrb[125].mxu0  ;;  %v7904_v58 = vld [vmem:[%s10392_s21 + $0x180] ss:$84 sps:$4 sm:$0xff]   ;;  %v5434_v14 = vsel %vm1907_vm6, %v7911_v26, 0 }
0x1769   :  { %v4558_v8 = vpop.f32.mrb[126].mxu0  ;;  %v7915_v42 = vld [vmem:[%s10392_s21 + $0x2c] ss:$84 sps:$4 sm:$0xff]  }
0x176a   :  { %v4611_v10 = vadd.f32 %v4610_v29, %v4556_v19  ;;  %v4559_v44 = vpop.f32.mrb[127].mxu0  ;;  %v7907_v29 = vld [vmem:[%s10392_s21 + $0x214] ss:$84 sps:$4 sm:$0x1f]   ;;  %v5452_v19 = vsel %vm1907_vm6, %v7912_v48, 0 }
0x176b   :  { %v7913_v8 = vld [vmem:[%s10392_s21 + $0x28] ss:$84 sps:$4 sm:$0xff]  }
0x176c   :  { %v9896_v43 = vadd.f32 %v6466_v3, %v4611_v10  ;;  %v7918_v3 = vld [vmem:[%s10392_s21 + $0x44] ss:$84 sps:$4 sm:$0xff]   ;;  %v7916_v10 = vld [vmem:[%s10392_s21 + $0x40] ss:$84 sps:$4 sm:$0xff]  }
0x176d   :  { %v7921_v44 = vld [vmem:[%s10392_s21 + $0xd4] ss:$84 sps:$4 sm:$0xff]  }
0x176e   :  { %v9902_v34 = vpack.c.bf16 %v9896_v43, %v9896_v43  ;;  %5946 = vperm.xlu0 %7704, %v9896_v43   ;;  %v6587_v57 = vmul.f32 -1.442695, %v9896_v43 }
0x1770   :  { %6480 = vmatmul.mubr.msk.bf16.vlgmr.msra.gmra.mrb[152].mxu1 %vm4719_vm2, %v9902_v34  ;;  %6567 = vmatmul.mubr.msk.bf16.vlgmr.msra.gmra.mrb[128].mxu0 %vm4719_vm2, %v9902_v34  ;;  %8049 = vpow2.f32 %v6587_v57  ;;  %v7927_v57 = vld [vmem:[%s10392_s21 + $0x17c] ss:$84 sps:$4 sm:$0xff]  }
0x1771   :  { %7355 = vmatpush3.bf16.msra.mxu1 %v7852_v38  ;;  %5561 = vmatpush1.bf16.msra.mxu0 %v7849_v55  ;;  %v7924_v55 = vld [vmem:[%s10392_s21 + $0xec] ss:$84 sps:$4 sm:$0xff]   ;;  %v7919_v38 = vld [vmem:[%s10392_s21 + $0xd0] ss:$84 sps:$4 sm:$0xff]  }
0x1772   :  { %7356 = vmatprep.subr.bf16.mxu1 %v8130_v45  ;;  %5562 = vmatprep.subr.bf16.mxu0 %v7855_v6  ;;  %v7922_v6 = vld [vmem:[%s10392_s21 + $0xe8] ss:$84 sps:$4 sm:$0xff]  }
0x1773   :  { %7362 = vmatprep.mubr.msk.bf16.mxu1 %vm8135_vm0, %v8130_v45  ;;  %5592 = vmatprep.mubr.bf16.mxu0 %v10385_v1 }
0x1774   :  { %7707 = vset.pattern.permute.xlu0 %v10385_v1 }
0x1775   :  { %7357 = vmatpush3.bf16.msra.mxu1 %v7856_v36  ;;  %5563 = vmatpush1.bf16.msra.mxu0 %v7853_v0  ;;  %v7930_v0 = vld [vmem:[%s10392_s21 + $0x194] ss:$84 sps:$4 sm:$0xff]   ;;  %v7925_v36 = vld [vmem:[%s10392_s21 + $0x178] ss:$84 sps:$4 sm:$0xff]  }
0x1776   :  { %7358 = vmatprep.subr.bf16.mxu1 %v8130_v45  ;;  %5564 = vmatprep.subr.bf16.mxu0 %v7859_v2  ;;  %v7928_v2 = vld [vmem:[%s10392_s21 + $0x190] ss:$84 sps:$4 sm:$0xff]  }
0x1779   :  { %7359 = vmatpush3.bf16.msra.mxu1 %v7860_v54  ;;  %5565 = vmatpush1.bf16.msra.mxu0 %v7857_v60  ;;  %v7931_v60 = vld [vmem:[%s10392_s21 + $0x224] ss:$84 sps:$4 sm:$0x1f]   ;;  %v7933_v54 = vld [vmem:[%s10392_s21 + $0x23c] ss:$84 sps:$4 sm:$0x1f]  }
0x177a   :  { %v8050_v22 = vpop.eup %8049  ;;  %7360 = vmatprep.subr.bf16.mxu1 %v8130_v45  ;;  %6570 = vmatprep.subr.msk.bf16.mxu0 %vm1907_vm6, %v7861_v56  ;;  %v7935_v56 = vld [vmem:[%s10392_s21 + $0x220] ss:$84 sps:$4 sm:$0x1f]  }
0x177b   :  { %v5931_v9 = vadd.f32 1.0, %v8050_v22  ;;  %v5446_v49 = vsel %vm1907_vm6, %v7935_v56, 0  ;;  %v5464_v22 = vsel %vm1907_vm6, %v7936_v11, 0 }
0x177d   :  { %7361 = vmatpush3.bf16.msra.mxu1 %v4730_v7  ;;  %5567 = vmatpush1.bf16.msra.mxu0 %v5428_v13  ;;  %8051 = vrcp.f32 %v5931_v9  ;;  %v7939_v7 = vld [vmem:[%s10392_s21 + $0x3c] ss:$84 sps:$4 sm:$0xff]   ;;  %v7937_v13 = vld [vmem:[%s10392_s21 + $0x38] ss:$84 sps:$4 sm:$0xff]   ;;  %v7941_v9 = vld [vmem:[%s10392_s21 + $0xe0] ss:$84 sps:$4 sm:$0xff]  }
0x177e   :  { %5519 = vmatprep.subr.bf16.mxu1 %v7867_v12  ;;  %5642 = vmatprep.subr.bf16.mxu0 %v7870_v21  ;;  %v7940_v12 = vld [vmem:[%s10392_s21 + $0x50] ss:$84 sps:$4 sm:$0xff]  }
0x177f   :  { %v7943_v21 = vld [vmem:[%s10392_s21 + $0xe4] ss:$84 sps:$4 sm:$0xff]  }
0x1780   :  { %7363 = vmatmul.mubr.msk.bf16.vlgmr.msra.gmra.mrb[156].mxu1 %vm4719_vm2, %v9902_v34  ;;  %6571 = vmatmul.mubr.msk.bf16.vlgmr.msra.gmra.mrb[132].mxu0 %vm4719_vm2, %v9902_v34 }
0x1781   :  { %5520 = vmatpush1.bf16.msra.mxu1 %v7865_v40  ;;  %5643 = vmatpush1.bf16.msra.mxu0 %v7868_v63  ;;  %v7944_v40 = vld [vmem:[%s10392_s21 + $0xf8] ss:$84 sps:$4 sm:$0xff]  }
0x1782   :  { %5521 = vmatprep.subr.bf16.mxu1 %v7873_v24  ;;  %5644 = vmatprep.subr.bf16.mxu0 %v7876_v4  ;;  %v7947_v63 = vld [vmem:[%s10392_s21 + $0x18c] ss:$84 sps:$4 sm:$0xff]   ;;  %v7945_v24 = vld [vmem:[%s10392_s21 + $0x188] ss:$84 sps:$4 sm:$0xff]  }
0x1783   :  { %5551 = vmatprep.mubr.bf16.mxu1 %v10385_v1  ;;  %5674 = vmatprep.mubr.bf16.mxu0 %v10385_v1  ;;  %v7948_v4 = vld [vmem:[%s10392_s21 + $0x1a0] ss:$84 sps:$4 sm:$0xff]  }
0x1785   :  { %5522 = vmatpush1.bf16.msra.mxu1 %v7871_v50  ;;  %5645 = vmatpush1.bf16.msra.mxu0 %v7874_v15  ;;  %v7949_v50 = vld [vmem:[%s10392_s21 + $0x234] ss:$84 sps:$4 sm:$0x1f]   ;;  %v7951_v15 = vld [vmem:[%s10392_s21 + $0x230] ss:$84 sps:$4 sm:$0x1f]  }
0x1786   :  { %5523 = vmatprep.subr.bf16.mxu1 %v7879_v18  ;;  %5646 = vmatprep.subr.bf16.mxu0 %v7882_v23  ;;  %v7952_v18 = vld [vmem:[%s10392_s21 + $0x248] ss:$84 sps:$4 sm:$0x1f]   ;;  %v5458_v23 = vsel %vm1907_vm6, %v7951_v15, 0 }
0x1787   :  { %v8052_v31 = vpop.eup %8051 }
0x1788   :  { %v5934_v35 = vmul.f32 117.1875, %v8052_v31  ;;  %v7959_v31 = vld [vmem:[%s10392_s21 + $0x198] ss:$84 sps:$4 sm:$0xff]  }
0x1789   :  { %5524 = vmatpush1.bf16.msra.mxu1 %v7877_v46  ;;  %5647 = vmatpush1.bf16.msra.mxu0 %v7880_v59  ;;  %v5476_v46 = vsel %vm1907_vm6, %v7952_v18, 0  ;;  %v7955_v59 = vld [vmem:[%s10392_s21 + $0x4c] ss:$84 sps:$4 sm:$0xff]  }
0x178a   :  { %5937 = vperm.xlu1 %7703, %v5934_v35   ;;  %6568 = vmatprep.subr.msk.bf16.mxu1 %vm1907_vm6, %v7883_v17  ;;  %v7953_v17 = vld [vmem:[%s10392_s21 + $0x48] ss:$84 sps:$4 sm:$0xff]   ;;  %v7964_v35 = vld [vmem:[%s10392_s21 + $0x240] ss:$84 sps:$4 sm:$0x1f]  }
0x178b   :  { %6574 = vmatprep.subr.msk.bf16.mxu0 %vm1907_vm6, %v7885_v30  ;;  %v7962_v30 = vld [vmem:[%s10392_s21 + $0x244] ss:$84 sps:$4 sm:$0x1f]  }
0x178d   :  { %5526 = vmatpush1.bf16.msra.mxu1 %v5422_v33  ;;  %5649 = vmatpush1.bf16.msra.mxu0 %v5440_v61  ;;  %v5470_v33 = vsel %vm1907_vm6, %v7964_v35, 0  ;;  %v4643_v61 = vlaneseq }
0x178e   :  { %7705 = vset.pattern.permute.xlu1 %v8138_v53  ;;  %5601 = vmatprep.subr.bf16.mxu1 %v7891_v5 }
0x178f   :  { %5955 = vperm.xlu1 %7705, %v9896_v43   ;;  %5724 = vmatprep.subr.bf16.mxu0 %v7894_v62  ;;  %v4641_v62 = vld [vmem:[%s10395_s25] sm:$0x7] }
0x1790   :  { %6569 = vmatmul.mubr.msk.bf16.vlgmr.msra.gmra.mrb[160].mxu1 %vm4719_vm2, %v9902_v34  ;;  %6575 = vmatmul.mubr.msk.bf16.vlgmr.msra.gmra.mrb[136].mxu0 %vm4719_vm2, %v9902_v34 }
0x1791   :  { %5602 = vmatpush1.bf16.msra.mxu1 %v7889_v28  ;;  %5725 = vmatpush1.bf16.msra.mxu0 %v7892_v32  ;;  %v10059_v28 = vld [vmem:[%s10396_s29] sm:$0xff] }
0x1792   :  { %5603 = vmatprep.subr.bf16.mxu1 %v7897_v47  ;;  %5726 = vmatprep.subr.bf16.mxu0 %v7900_v52 }
0x1793   :  { %5633 = vmatprep.mubr.bf16.mxu1 %v10385_v1  ;;  %5756 = vmatprep.mubr.bf16.mxu0 %v10385_v1 }
0x1794   :  { %7706 = vset.pattern.permute.xlu1 %v10385_v1 }
0x1795   :  { %5604 = vmatpush1.bf16.msra.mxu1 %v7895_v37  ;;  %5727 = vmatpush1.bf16.msra.mxu0 %v7898_v27 }
0x1796   :  { %5605 = vmatprep.subr.bf16.mxu1 %v7903_v41  ;;  %5728 = vmatprep.subr.bf16.mxu0 %v7906_v20 }
0x1799   :  { %5606 = vmatpush1.bf16.msra.mxu1 %v7901_v51  ;;  %5729 = vmatpush1.bf16.msra.mxu0 %v7904_v58 }
0x179a   :  { %6572 = vmatprep.subr.msk.bf16.mxu1 %vm1907_vm6, %v7907_v29  ;;  %6578 = vmatprep.subr.msk.bf16.mxu0 %vm1907_vm6, %v7909_v25 }
0x179d   :  { %5608 = vmatpush1.bf16.msra.mxu1 %v5434_v14  ;;  %5731 = vmatpush1.bf16.msra.mxu0 %v5452_v19 }
0x179e   :  { %5683 = vmatprep.subr.bf16.mxu1 %v7915_v42  ;;  %5806 = vmatprep.subr.bf16.mxu0 %v7918_v3 }
0x17a0   :  { %6573 = vmatmul.mubr.msk.bf16.vlgmr.msra.gmra.mrb[164].mxu1 %vm4719_vm2, %v9902_v34  ;;  %6579 = vmatmul.mubr.msk.bf16.vlgmr.msra.gmra.mrb[140].mxu0 %vm4719_vm2, %v9902_v34 }
0x17a1   :  { %5684 = vmatpush1.bf16.msra.mxu1 %v7913_v8  ;;  %5807 = vmatpush1.bf16.msra.mxu0 %v7916_v10 }
0x17a2   :  { %5685 = vmatprep.subr.bf16.mxu1 %v7921_v44  ;;  %5808 = vmatprep.subr.bf16.mxu0 %v7924_v55 }
0x17a3   :  { %5715 = vmatprep.mubr.bf16.mxu1 %v10385_v1  ;;  %5838 = vmatprep.mubr.bf16.mxu0 %v10385_v1 }
0x17a5   :  { %5686 = vmatpush1.bf16.msra.mxu1 %v7919_v38  ;;  %5809 = vmatpush1.bf16.msra.mxu0 %v7922_v6 }
0x17a6   :  { %5687 = vmatprep.subr.bf16.mxu1 %v7927_v57  ;;  %5810 = vmatprep.subr.bf16.mxu0 %v7930_v0 }
0x17a9   :  { %5688 = vmatpush1.bf16.msra.mxu1 %v7925_v36  ;;  %5811 = vmatpush1.bf16.msra.mxu0 %v7928_v2 }
0x17aa   :  { %6576 = vmatprep.subr.msk.bf16.mxu1 %vm1907_vm6, %v7931_v60  ;;  %6582 = vmatprep.subr.msk.bf16.mxu0 %vm1907_vm6, %v7933_v54 }
0x17ad   :  { %5690 = vmatpush1.bf16.msra.mxu1 %v5446_v49  ;;  %5813 = vmatpush1.bf16.msra.mxu0 %v5464_v22 }
0x17ae   :  { %5765 = vmatprep.subr.bf16.mxu1 %v7939_v7  ;;  %7366 = vmatprep.subr.bf16.mxu0 %v8130_v45 }
0x17b0   :  { %6577 = vmatmul.mubr.msk.bf16.vlgmr.msra.gmra.mrb[168].mxu1 %vm4719_vm2, %v9902_v34  ;;  %6583 = vmatmul.mubr.msk.bf16.vlgmr.msra.gmra.mrb[144].mxu0 %vm4719_vm2, %v9902_v34 }
0x17b1   :  { %5766 = vmatpush1.bf16.msra.mxu1 %v7937_v13  ;;  %7367 = vmatpush3.bf16.msra.mxu0 %v7940_v12 }
0x17b2   :  { %5767 = vmatprep.subr.bf16.mxu1 %v7943_v21  ;;  %7368 = vmatprep.subr.bf16.mxu0 %v8130_v45 }
0x17b3   :  { %5797 = vmatprep.mubr.bf16.mxu1 %v10385_v1  ;;  %7374 = vmatprep.mubr.msk.bf16.mxu0 %vm8135_vm0, %v8130_v45 }
0x17b5   :  { %5768 = vmatpush1.bf16.msra.mxu1 %v7941_v9  ;;  %7369 = vmatpush3.bf16.msra.mxu0 %v7944_v40 }
0x17b6   :  { %5769 = vmatprep.subr.bf16.mxu1 %v7947_v63  ;;  %7370 = vmatprep.subr.bf16.mxu0 %v8130_v45 }
0x17b9   :  { %5770 = vmatpush1.bf16.msra.mxu1 %v7945_v24  ;;  %7371 = vmatpush3.bf16.msra.mxu0 %v7948_v4  ;;  %v10113_v24 = vld [vmem:[%s10396_s29 + $0x8] sm:$0xff] }
0x17ba   :  { %6580 = vmatprep.subr.msk.bf16.mxu1 %vm1907_vm6, %v7949_v50  ;;  %7372 = vmatprep.subr.bf16.mxu0 %v8130_v45  ;;  %v7956_v45 = vld [vmem:[%s10392_s21 + $0xf0] ss:$84 sps:$4 sm:$0xff]  }
0x17bd   :  { %5772 = vmatpush1.bf16.msra.mxu1 %v5458_v23  ;;  %7373 = vmatpush3.bf16.msra.mxu0 %v5476_v46 }
0x17be   :  { %5847 = vmatprep.subr.bf16.mxu1 %v7955_v59 }
0x17c0   :  { %6581 = vmatmul.mubr.msk.bf16.vlgmr.msra.gmra.mrb[172].mxu1 %vm4719_vm2, %v9902_v34  ;;  %7375 = vmatmul.mubr.msk.bf16.vlgmr.msra.gmra.mrb[148].mxu0 %vm4719_vm2, %v9902_v34 }
0x17c1   :  { %5848 = vmatpush1.bf16.msra.mxu1 %v7953_v17  ;;  %5879 = vmatprep.mubr.bf16.mxu1 %v10385_v1  ;;  %v10052_v1 = vshrl.u32 %v4643_v61, 7 }
0x17c2   :  { %5849 = vmatprep.subr.bf16.mxu1 %v7958_v39 }
0x17c3   :  { %v10055_v5 = vsub.s32 0, %v10052_v1  ;;  %v10062_v32 = vsub.s32 1, %v10052_v1  ;;  %v10087_v44 = vsub.s32 2, %v10052_v1  ;;  %v10090_v55 = vsub.s32 4, %v10052_v1 }
0x17c4   :  { %v4929_v38 = vsub.s32 5, %v10052_v1  ;;  %v10116_v4 = vsub.s32 3, %v10052_v1 }
0x17c5   :  { %5850 = vmatpush1.bf16.msra.mxu1 %v7956_v45  ;;  %v4646_v53 = vrot.slane %v4641_v62, %v10055_v5  ;;  %v4910_v47 = vrot.slane %v10059_v28, %v10055_v5  ;;  %v4650_v52 = vrot.slane %v4641_v62, %v10062_v32  ;;  %v4654_v6 = vrot.slane %v4641_v62, %v10087_v44 }
0x17c6   :  { %5851 = vmatprep.subr.bf16.mxu1 %v7961_v16  ;;  %v4926_v57 = vrot.slane %v10059_v28, %v10090_v55  ;;  %v4930_v0 = vrot.slane %v10059_v28, %v4929_v38 }
0x17c9   :  { %5852 = vmatpush1.bf16.msra.mxu1 %v7959_v31 }
0x17ca   :  { %6584 = vmatprep.subr.msk.bf16.mxu1 %vm1907_vm6, %v7962_v30 }
0x17cd   :  { %5854 = vmatpush1.bf16.msra.mxu1 %v5470_v33 }
0x17d0   :  { %6585 = vmatmul.mubr.msk.bf16.vlgmr.msra.gmra.mrb[176].mxu1 %vm4719_vm2, %v9902_v34  ;;  %v4914_v34 = vrot.slane %v10059_v28, %v10062_v32 }
0x17ed   :  { %v10070_v37 = vpop.permute.xlu0 %5946 }
0x1809   :  { %v10110_v63 = vpop.permute.xlu1 %5937 }
0x1843   :  { %v4766_v27 = vpop.f32.mrb[152].mxu1  ;;  %v5512_v41 = vpop.f32.mrb[128].mxu0 }
0x1844   :  { %v10072_v20 = vadd.f32 %v4766_v27, %v4646_v53  ;;  %v5513_v51 = vadd.f32 %v5512_v41, %v4910_v47  ;;  %v4768_v58 = vpop.f32.mrb[153].mxu1  ;;  %v5514_v29 = vpop.f32.mrb[129].mxu0 }
0x1845   :  { %v10074_v25 = vadd.f32 %v4768_v58, %v4650_v52  ;;  %v5515_v26 = vadd.f32 %v5514_v29, %v4914_v34  ;;  %v4770_v48 = vpop.f32.mrb[154].mxu1  ;;  %v5516_v14 = vpop.f32.mrb[130].mxu0 }
0x1846   :  { %v10077_v19 = vadd.f32 %v10070_v37, %v5513_v51  ;;  %v4771_v42 = vpop.f32.mrb[155].mxu1  ;;  %v5517_v3 = vpop.f32.mrb[131].mxu0  ;;  %5965 = vperm.xlu1 %7706, %v10072_v20  }
0x1847   :  { %v10081_v8 = vadd.f32 %v10070_v37, %v5515_v26  ;;  %5971 = vperm.xlu0 %7707, %v10074_v25  }
0x1849   :  { %v6057_v10 = vcombine.low %v10077_v19, %v10081_v8 }
0x1853   :  { %v4807_v36 = vpop.f32.mrb[156].mxu1  ;;  %v5594_v2 = vpop.f32.mrb[132].mxu0 }
0x1854   :  { %v10099_v60 = vadd.f32 %v4807_v36, %v4654_v6  ;;  %v5595_v54 = vadd.f32 %v5594_v2, %v4926_v57  ;;  %v7364_v56 = vpop.f32.mrb[157].mxu1  ;;  %v5596_v11 = vpop.f32.mrb[133].mxu0 }
0x1855   :  { %v5597_v49 = vadd.f32 %v5596_v11, %v4930_v0  ;;  %v4810_v22 = vpop.f32.mrb[158].mxu1  ;;  %v5598_v7 = vpop.f32.mrb[134].mxu0 }
0x1856   :  { %v10102_v13 = vadd.f32 %v10070_v37, %v5595_v54  ;;  %v7365_v12 = vpop.f32.mrb[159].mxu1  ;;  %v5599_v21 = vpop.f32.mrb[135].mxu0  ;;  %5977 = vperm.xlu1 %7706, %v10099_v60  }
0x1857   :  { %v10106_v9 = vadd.f32 %v10070_v37, %v5597_v49 }
0x1859   :  { %v6074_v40 = vcombine.low %v10102_v13, %v10106_v9 }
0x185a   :  { %8066 = shalt.err (!%p8063_p4)
}
0x185b   :  { %s8067_s19 = scalar_lea.hbm %s8311_s27, 2048 }
0x185c   :  { %p8068_p5 = scmp.ne.s32.totalorder %s8311_s27, %s8067_s19  ;;  %p8071_p6 = scmp.lt.u32.totalorder %s8067_s19, %s8311_s27 }
0x185e   :  { %p8073_p7 = pnand %p8071_p6, %p8068_p5 }
0x1860   :  { %8076 = shalt.err (!%p8073_p7)
}
0x1861   :  { %s8140_s24 = smov 128   ;;  %s8141_s30 = smov 8   ;;  %v8142_v50 = vmov 1983009808   ;;  %v4918_v18 = vrot.slane %v10059_v28, %v10087_v44  ;;  %v4942_v23 = vrot.slane %v10113_v24, %v10055_v5  ;;  %v4922_v46 = vrot.slane %v10059_v28, %v10116_v4  ;;  %v10130_v17 = vpop.permute.xlu1 %5955 }
0x1862   :  { %6174 = dma.vmem_to_hbm [thread:$0]  %s6169_s8, 2048, %s8311_s27, [#allocation3], %s8140_s24, %s8140_s24, %s8141_s30   ;;  %v5989_v15 = vunpack.c.l.s4 %v8142_v50  ;;  %v4946_v59 = vrot.slane %v10113_v24, %v10062_v32  ;;  %v4933_v3 = vsub.s32 6, %v10052_v1  ;;  %v4937_v57 = vsub.s32 7, %v10052_v1 }
0x1863   :  { %v5553_v45 = vpop.f32.mrb[160].mxu1  ;;  %v5676_v16 = vpop.f32.mrb[136].mxu0  ;;  %v4958_v36 = vrot.slane %v10113_v24, %v10090_v55  ;;  %v4962_v19 = vrot.slane %v10113_v24, %v4929_v38 }
0x1864   :  { %v5990_v39 = vunpack.c.0.s8 %v5989_v15  ;;  %v5554_v31 = vadd.f32 %v5553_v45, %v4918_v18  ;;  %v5677_v30 = vadd.f32 %v5676_v16, %v4942_v23  ;;  %v5555_v35 = vpop.f32.mrb[161].mxu1  ;;  %v5678_v33 = vpop.f32.mrb[137].mxu0  ;;  %v4934_v0 = vrot.slane %v10059_v28, %v4933_v3  ;;  %v4903_v16 = vld [vmem:[%s10396_s29 + $0x10] sm:$0x1f] }
0x1865   :  { %v5556_v61 = vadd.f32 %v5555_v35, %v4922_v46  ;;  %v5679_v62 = vadd.f32 %v5678_v33, %v4946_v59  ;;  %v5557_v53 = vpop.f32.mrb[162].mxu1  ;;  %v5680_v47 = vpop.f32.mrb[138].mxu0  ;;  %v4938_v2 = vrot.slane %v10059_v28, %v4937_v57  ;;  %v4954_v35 = vrot.slane %v10113_v24, %v10116_v4 }
0x1866   :  { %v6017_v52 = vadd.f32 %v10070_v37, %v5554_v31  ;;  %v10134_v34 = vadd.f32 %v10130_v17, %v5677_v30  ;;  %v5558_v27 = vpop.f32.mrb[163].mxu1  ;;  %v5681_v41 = vpop.f32.mrb[139].mxu0  ;;  %v10137_v51 = vsub.s32 %v5990_v39, %v10052_v1  ;;  %v4950_v31 = vrot.slane %v10113_v24, %v10087_v44 }
0x1867   :  { %v6018_v58 = vadd.f32 %v10070_v37, %v5556_v61  ;;  %v6024_v29 = vadd.f32 %v10130_v17, %v5679_v62  ;;  %v4974_v30 = vrot.slane %v4903_v16, %v10055_v5  ;;  %v4978_v33 = vrot.slane %v4903_v16, %v10062_v32 }
0x1868   :  { %v6065_v14 = vrot.slane %v6057_v10, %v10137_v51  ;;  %v6082_v59 = vrot.slane %v6074_v40, %v10137_v51 }
0x1869   :  { %v6058_v26 = vcombine.low %v6017_v52, %v6018_v58  ;;  %v6091_v48 = vcombine.low %v10134_v34, %v6024_v29 }
0x186b   :  { %v6072_v42 = vrot.slane %v6058_v26, %v10137_v51 }
0x186d   :  { %v6073_v6 = vcombine.low %v6065_v14, %v6072_v42 }
0x186f   :  { %6155 = vst [vmem:[%s8321_s12] sm:$0xff] %v6073_v6  ;;  %v6099_v6 = vrot.slane %v6091_v48, %v10137_v51 }
0x1873   :  { %v5635_v8 = vpop.f32.mrb[164].mxu1  ;;  %v5758_v10 = vpop.f32.mrb[140].mxu0 }
0x1874   :  { %v5636_v54 = vadd.f32 %v5635_v8, %v4934_v0  ;;  %v5759_v56 = vadd.f32 %v5758_v10, %v4958_v36  ;;  %v5637_v11 = vpop.f32.mrb[165].mxu1  ;;  %v5760_v49 = vpop.f32.mrb[141].mxu0  ;;  %v4970_v8 = vrot.slane %v10113_v24, %v4937_v57 }
0x1875   :  { %v5638_v22 = vadd.f32 %v5637_v11, %v4938_v2  ;;  %v5761_v7 = vadd.f32 %v5760_v49, %v4962_v19  ;;  %v5639_v12 = vpop.f32.mrb[166].mxu1  ;;  %v5762_v21 = vpop.f32.mrb[142].mxu0  ;;  %v4966_v2 = vrot.slane %v10113_v24, %v4933_v3  ;;  %v4990_v19 = vrot.slane %v4903_v16, %v10090_v55 }
0x1876   :  { %v6021_v50 = vadd.f32 %v10070_v37, %v5636_v54  ;;  %v6027_v28 = vadd.f32 %v10130_v17, %v5759_v56  ;;  %v5640_v15 = vpop.f32.mrb[167].mxu1  ;;  %v5763_v1 = vpop.f32.mrb[143].mxu0 }
0x1877   :  { %v6022_v38 = vadd.f32 %v10130_v17, %v5638_v22  ;;  %v6028_v18 = vadd.f32 %v10130_v17, %v5761_v7 }
0x1879   :  { %v6075_v23 = vcombine.low %v6021_v50, %v6022_v38  ;;  %v6108_v46 = vcombine.low %v6027_v28, %v6028_v18  ;;  %v4982_v38 = vrot.slane %v4903_v16, %v10087_v44  ;;  %v5940_v18 = vadd.f32 %v10110_v63, %v10099_v60 }
0x187b   :  { %v6089_v39 = vrot.slane %v6075_v23, %v10137_v51  ;;  %v6116_v57 = vrot.slane %v6108_v46, %v10137_v51  ;;  %v4986_v23 = vrot.slane %v4903_v16, %v10116_v4  ;;  %v5949_v16 = vadd.f32 %v10070_v37, %v10072_v20 }
0x187d   :  { %v6090_v45 = vcombine.low %v6082_v59, %v6089_v39 }
0x187f   :  { %6156 = vst [vmem:[%s8321_s12 + $0x8] sm:$0xff] %v6090_v45 }
0x1883   :  { %v5717_v61 = vpop.f32.mrb[168].mxu1  ;;  %v5840_v62 = vpop.f32.mrb[144].mxu0 }
0x1884   :  { %v5718_v53 = vadd.f32 %v5717_v61, %v4950_v31  ;;  %v5841_v13 = vadd.f32 %v5840_v62, %v4974_v30  ;;  %v5719_v9 = vpop.f32.mrb[169].mxu1  ;;  %v5842_v40 = vpop.f32.mrb[145].mxu0  ;;  %v5941_v31 = vadd.f32 0.0001, %v5940_v18 }
0x1885   :  { %v5720_v47 = vadd.f32 %v5719_v9, %v4954_v35  ;;  %v5843_v52 = vadd.f32 %v5842_v40, %v4978_v33  ;;  %v5721_v34 = vpop.f32.mrb[170].mxu1  ;;  %v5844_v27 = vpop.f32.mrb[146].mxu0  ;;  %v5958_v40 = vadd.f32 %v10130_v17, %v10074_v25 }
0x1886   :  { %v6025_v41 = vadd.f32 %v10130_v17, %v5718_v53  ;;  %v6031_v5 = vadd.f32 %v10110_v63, %v5841_v13  ;;  %v5722_v58 = vpop.f32.mrb[171].mxu1  ;;  %v5845_v29 = vpop.f32.mrb[147].mxu0  ;;  %8053 = vrcp.f32 %v5941_v31 }
0x1887   :  { %v6026_v26 = vadd.f32 %v10130_v17, %v5720_v47  ;;  %v6032_v32 = vadd.f32 %v10110_v63, %v5843_v52 }
0x1889   :  { %v6092_v14 = vcombine.low %v6025_v41, %v6026_v26  ;;  %v6125_v42 = vcombine.low %v6031_v5, %v6032_v32 }
0x188b   :  { %v6106_v0 = vrot.slane %v6092_v14, %v10137_v51  ;;  %v6133_v44 = vrot.slane %v6125_v42, %v10137_v51 }
0x188d   :  { %v6107_v36 = vcombine.low %v6099_v6, %v6106_v0 }
0x188f   :  { %6157 = vst [vmem:[%s8321_s12 + $0x10] sm:$0xff] %v6107_v36 }
0x1890   :  { %v8054_v4 = vpop.eup %8053 }
0x1891   :  { %v5950_v9 = vmul.f32 %v8054_v4, %v5949_v16  ;;  %v5959_v47 = vmul.f32 %v8054_v4, %v5958_v40 }
0x1893   :  { %v5799_v10 = vpop.f32.mrb[172].mxu1  ;;  %v5922_v54 = vpop.f32.mrb[148].mxu0  ;;  %v5951_v52 = vmul.f32 1500.0, %v5950_v9 }
0x1894   :  { %v5800_v56 = vadd.f32 %v5799_v10, %v4966_v2  ;;  %v5923_v11 = vadd.f32 %v5922_v54, %v4990_v19  ;;  %v5801_v49 = vpop.f32.mrb[173].mxu1  ;;  %v7376_v22 = vpop.f32.mrb[149].mxu0 }
0x1895   :  { %v5802_v7 = vadd.f32 %v5801_v49, %v4970_v8  ;;  %v5803_v48 = vpop.f32.mrb[174].mxu1  ;;  %v5925_v12 = vpop.f32.mrb[150].mxu0  ;;  %v5952_v34 = vadd.f32 16.0, %v5951_v52 }
0x1896   :  { %v6029_v21 = vadd.f32 %v10110_v63, %v5800_v56  ;;  %v6035_v50 = vadd.f32 %v10110_v63, %v5923_v11  ;;  %v5804_v3 = vpop.f32.mrb[175].mxu1  ;;  %v7377_v28 = vpop.f32.mrb[151].mxu0 }
0x1897   :  { %v6030_v55 = vadd.f32 %v10110_v63, %v5802_v7  ;;  %v5953_v41 = vmul.f32 0.03125, %v5952_v34 }
0x1898   :  { %6589 = vst.sshfl [vmem:[%s8321_s12 + $0x28] sm:$0x3 pattern:$0x76325410] %v6035_v50 }
0x1899   :  { %v6109_v24 = vcombine.low %v6029_v21, %v6030_v55  ;;  %v5986_v26 = vcombine.low %v9896_v43, %v5953_v41 }
0x189b   :  { %v6123_v15 = vrot.slane %v6109_v24, %v10137_v51  ;;  %v5994_v37 = vrot.slane %v5986_v26, %v10137_v51 }
0x189d   :  { %v6124_v1 = vcombine.low %v6116_v57, %v6123_v15 }
0x189f   :  { %6158 = vst [vmem:[%s8321_s12 + $0x18] sm:$0xff] %v6124_v1 }
0x18a3   :  { %v5881_v59 = vpop.f32.mrb[176].mxu1 }
0x18a4   :  { %v5882_v39 = vadd.f32 %v5881_v59, %v4982_v38  ;;  %v5883_v45 = vpop.f32.mrb[177].mxu1 }
0x18a5   :  { %v5884_v30 = vadd.f32 %v5883_v45, %v4986_v23  ;;  %v5885_v35 = vpop.f32.mrb[178].mxu1 }
0x18a6   :  { %v6033_v46 = vadd.f32 %v10110_v63, %v5882_v39  ;;  %v5886_v33 = vpop.f32.mrb[179].mxu1 }
0x18a7   :  { %v6034_v61 = vadd.f32 %v10110_v63, %v5884_v30  ;;  %v5960_v63 = vmul.f32 1500.0, %v5959_v47 }
0x18a9   :  { %v6126_v62 = vcombine.low %v6033_v46, %v6034_v61  ;;  %v5961_v27 = vadd.f32 16.0, %v5960_v63 }
0x18ab   :  { %v6140_v53 = vrot.slane %v6126_v62, %v10137_v51  ;;  %v5962_v58 = vmul.f32 0.03125, %v5961_v27 }
0x18ad   :  { %v6141_v13 = vcombine.low %v6133_v44, %v6140_v53 }
0x18af   :  { %6159 = vst [vmem:[%s8321_s12 + $0x20] sm:$0xff] %v6141_v13 }
0x18c5   :  { %v5966_v5 = vpop.permute.xlu1 %5965 }
0x18c6   :  { %v5968_v29 = vsub.f32 %v10072_v20, %v5966_v5  ;;  %v5972_v17 = vpop.permute.xlu0 %5971 }
0x18c7   :  { %v5974_v0 = vsub.f32 %v10074_v25, %v5972_v17 }
0x18c8   :  { %v5987_v32 = vcombine.low %v5962_v58, %v5968_v29 }
0x18ca   :  { %v6001_v14 = vrot.slane %v5987_v32, %v10137_v51 }
0x18cc   :  { %v6002_v42 = vcombine.low %v5994_v37, %v6001_v14 }
0x18ce   :  { %6013 = vst [vmem:[%s8316_s4] sm:$0xff] %v6002_v42 }
0x18d5   :  { %v5978_v6 = vpop.permute.xlu1 %5977 }
0x18d6   :  { %v5980_v36 = vsub.f32 %v10099_v60, %v5978_v6 }
0x18d8   :  { %v6003_v2 = vcombine.low %v5974_v0, %v5980_v36 }
0x18da   :  { %6588 = vst.sshfl [vmem:[%s8316_s4 + $0x8] sm:$0x33 pattern:$0x76325410] %v6003_v2 }
0x18db   :  { %8077 = dma.done.wait [#allocation3], 2048  }
0x18dc   :  { %8078 = vsyncadd [#allocation3], 4294965248 }
0x18dd   :  { %6188 = vsyncpa [#allocation3], 1 }

</bundles_post_ra>
